<compile_context>
chip_gen: v7x
topology: tpu7x:2x2x1
jax: 0.10.0
libtpu: 0.0.40
codegen_flags: <defaults>
</compile_context>

<pallas_src>
import jax
import jax.numpy as jnp
from jax.experimental import pallas as pl
from jax.experimental.pallas import tpu as pltpu


def _ae2_kernel(state_ref, action_ref,
                w1s_ref, w1a_ref, b1_ref,
                w2_ref, b2_ref,
                wz_ref, bz_ref,
                wd1_ref, bd1_ref,
                wd2_ref, bd2_ref,
                wx_ref, bx_ref,
                enc_ref, dec_ref):
    """Fused AE2 forward for one batch tile: encoder -> z -> decoder."""
    f32 = jnp.float32
    bf16 = jnp.bfloat16

    s = state_ref[...]    # (TILE_B, state_dim)  f32
    a = action_ref[...]   # (TILE_B, action_dim) f32

    # ----- encoder -----
    # Layer e1 computed as a split matmul to avoid a concat.
    h = (jnp.dot(s.astype(bf16), w1s_ref[...], preferred_element_type=f32)
         + jnp.dot(a.astype(bf16), w1a_ref[...], preferred_element_type=f32)
         + b1_ref[...])
    h = jnp.maximum(h, 0.0)
    h = jnp.dot(h.astype(bf16), w2_ref[...], preferred_element_type=f32) + b2_ref[...]
    h = jnp.maximum(h, 0.0)
    z = jnp.dot(h.astype(bf16), wz_ref[...], preferred_element_type=f32) + bz_ref[...]

    # ----- decoder -----
    d = jnp.dot(z.astype(bf16), wd1_ref[...], preferred_element_type=f32) + bd1_ref[...]
    d = jnp.maximum(d, 0.0)
    d = jnp.dot(d.astype(bf16), wd2_ref[...], preferred_element_type=f32) + bd2_ref[...]
    d = jnp.maximum(d, 0.0)
    x_bar = jnp.dot(d.astype(bf16), wx_ref[...], preferred_element_type=f32) + bx_ref[...]

    # TODO(synk): enc/dec last dims (16/24) are < 128 lanes -> masked stores;
    # downstream wants separate tensors and the byte count is tiny, so we keep
    # two lane-sparse outputs rather than packing into one 128-wide slab.
    enc_ref[...] = z
    dec_ref[...] = x_bar


def init_params(key, state_dim, action_dim, hidden=512):
    """Deterministic PyTorch-Linear-style init: U(-1/sqrt(fan_in), 1/sqrt(fan_in))."""
    sa_dim = state_dim + action_dim
    layer_dims = [
        ("w1", "b1", sa_dim, hidden),
        ("w2", "b2", hidden, hidden),
        ("wz", "bz", hidden, state_dim),
        ("wd1", "bd1", state_dim, hidden),
        ("wd2", "bd2", hidden, hidden),
        ("wx", "bx", hidden, sa_dim),
    ]
    params = {}
    keys = jax.random.split(key, 2 * len(layer_dims))
    for i, (wn, bn, fan_in, fan_out) in enumerate(layer_dims):
        bound = 1.0 / (fan_in ** 0.5)
        params[wn] = jax.random.uniform(
            keys[2 * i], (fan_in, fan_out), jnp.float32, -bound, bound)
        params[bn] = jax.random.uniform(
            keys[2 * i + 1], (1, fan_out), jnp.float32, -bound, bound)
    return params


def prepare_params(params_f32):
    """One-time prep: split w1 into (state, action) halves, cast weights to bf16.

    Biases stay f32 (added post-accumulation on the VPU)."""
    state_dim = params_f32["wz"].shape[1]
    p = {}
    w1 = params_f32["w1"]
    p["w1s"] = w1[:state_dim].astype(jnp.bfloat16)
    p["w1a"] = w1[state_dim:].astype(jnp.bfloat16)
    for k in ("w2", "wz", "wd1", "wd2", "wx"):
        p[k] = params_f32[k].astype(jnp.bfloat16)
    for k in ("b1", "b2", "bz", "bd1", "bd2", "bx"):
        p[k] = params_f32[k].astype(jnp.float32)
    return p


def ae2_forward(state, action, kparams, *, tile_b=256):
    """Batch-tiled fused AE2 forward.  Returns (encoder_state, decoder_state)."""
    B, state_dim = state.shape
    action_dim = action.shape[1]
    sa_dim = state_dim + action_dim
    hidden = kparams["w2"].shape[0]

    # Batch tile: 256 rows by default; for small batches shrink to a single
    # 8-row-aligned tile (sublane granularity).
    if B < tile_b:
        tile_b = max(8, ((B + 7) // 8) * 8)
    b_pad = ((B + tile_b - 1) // tile_b) * tile_b
    if b_pad != B:
        state = jnp.pad(state, ((0, b_pad - B), (0, 0)))
        action = jnp.pad(action, ((0, b_pad - B), (0, 0)))

    grid = (b_pad // tile_b,)

    def batch_spec(ncols):
        return pl.BlockSpec((tile_b, ncols), lambda i: (i, 0))

    def resident_spec(arr):
        # Constant index_map: DMA'd once, stays resident across batch tiles.
        return pl.BlockSpec(arr.shape, lambda i: (0, 0))

    operands = (
        state, action,
        kparams["w1s"], kparams["w1a"], kparams["b1"],
        kparams["w2"], kparams["b2"],
        kparams["wz"], kparams["bz"],
        kparams["wd1"], kparams["bd1"],
        kparams["wd2"], kparams["bd2"],
        kparams["wx"], kparams["bx"],
    )
    in_specs = [batch_spec(state_dim), batch_spec(action_dim)] + [
        resident_spec(op) for op in operands[2:]
    ]

    flops = 2 * b_pad * (sa_dim * hidden + hidden * hidden + hidden * state_dim
                         + state_dim * hidden + hidden * hidden + hidden * sa_dim)
    bytes_accessed = (sum(int(op.size) * op.dtype.itemsize for op in operands)
                      + b_pad * (state_dim + sa_dim) * 4)
    cost = pl.CostEstimate(flops=flops, transcendentals=0,
                           bytes_accessed=bytes_accessed)

    enc, dec = pl.pallas_call(
        _ae2_kernel,
        grid=grid,
        in_specs=in_specs,
        out_specs=(
            pl.BlockSpec((tile_b, state_dim), lambda i: (i, 0)),
            pl.BlockSpec((tile_b, sa_dim), lambda i: (i, 0)),
        ),
        out_shape=(
            jax.ShapeDtypeStruct((b_pad, state_dim), jnp.float32),
            jax.ShapeDtypeStruct((b_pad, sa_dim), jnp.float32),
        ),
        compiler_params=pltpu.CompilerParams(
            dimension_semantics=("parallel",)),
        cost_estimate=cost,
    )(*operands)

    if b_pad != B:
        enc = enc[:B]
        dec = dec[:B]
    return enc, dec


def ae2_forward_ref(state, action, params):
    """Pure-JAX f32 reference (matches the PyTorch module)."""
    sa = jnp.concatenate([state, action], axis=1)
    a = jax.nn.relu(sa @ params["w1"] + params["b1"])
    a = jax.nn.relu(a @ params["w2"] + params["b2"])
    z = a @ params["wz"] + params["bz"]
    b = jax.nn.relu(z @ params["wd1"] + params["bd1"])
    b = jax.nn.relu(b @ params["wd2"] + params["bd2"])
    x_bar = b @ params["wx"] + params["bx"]
    return z, x_bar


if __name__ == "__main__":
    state_dim = 16
    action_dim = 8

    key = jax.random.PRNGKey(0)
    k_params, k_data = jax.random.split(key)

    params_f32 = init_params(k_params, state_dim, action_dim)
    kparams = prepare_params(params_f32)

    fwd = jax.jit(ae2_forward)

    # batch=512 -> two 256-row tiles (exercises the batch grid);
    # batch=200 -> single padded 256-row tile (exercises the padding path);
    # batch=8   -> small-batch / single 8-row tile path.
    for batch in (512, 200, 8):
        ks, ka = jax.random.split(jax.random.fold_in(k_data, batch))
        state = jax.random.normal(ks, (batch, state_dim), jnp.float32)
        action = jax.random.normal(ka, (batch, action_dim), jnp.float32)

        enc, dec = fwd(state, action, kparams)
        jax.block_until_ready((enc, dec))

        enc_ref, dec_ref = ae2_forward_ref(state, action, params_f32)
        assert enc.shape == (batch, state_dim)
        assert dec.shape == (batch, state_dim + action_dim)
        # bf16 weights/activations with f32 accumulation -> relaxed tolerances.
        assert jnp.allclose(enc, enc_ref, atol=5e-2, rtol=5e-2), (
            float(jnp.max(jnp.abs(enc - enc_ref))))
        assert jnp.allclose(dec, dec_ref, atol=5e-2, rtol=5e-2), (
            float(jnp.max(jnp.abs(dec - dec_ref))))

    print("KERNEL_OK")
</pallas_src>

<mosaic_0001>
module attributes {stable_mosaic.version = 11 : i64} {
  func.func @_ae2_kernel(%arg0: i32, %arg1: memref<256x16xf32, #tpu.memory_space<vmem>>, %arg2: memref<256x8xf32, #tpu.memory_space<vmem>>, %arg3: memref<16x512xbf16, #tpu.memory_space<vmem>>, %arg4: memref<8x512xbf16, #tpu.memory_space<vmem>>, %arg5: memref<1x512xf32, #tpu.memory_space<vmem>>, %arg6: memref<512x512xbf16, #tpu.memory_space<vmem>>, %arg7: memref<1x512xf32, #tpu.memory_space<vmem>>, %arg8: memref<512x16xbf16, #tpu.memory_space<vmem>>, %arg9: memref<1x16xf32, #tpu.memory_space<vmem>>, %arg10: memref<16x512xbf16, #tpu.memory_space<vmem>>, %arg11: memref<1x512xf32, #tpu.memory_space<vmem>>, %arg12: memref<512x512xbf16, #tpu.memory_space<vmem>>, %arg13: memref<1x512xf32, #tpu.memory_space<vmem>>, %arg14: memref<512x24xbf16, #tpu.memory_space<vmem>>, %arg15: memref<1x24xf32, #tpu.memory_space<vmem>>, %arg16: memref<256x16xf32, #tpu.memory_space<vmem>>, %arg17: memref<256x24xf32, #tpu.memory_space<vmem>>) attributes {dimension_semantics = [#tpu.dimension_semantics<parallel>], iteration_bounds = array<i64: 2>, scalar_prefetch = 0 : i64, scratch_operands = 0 : i64, tpu.core_type = #tpu.core_type<tc>, window_params = [{transform_indices = @transform_0, window_bounds = array<i64: 256, 16>}, {transform_indices = @transform_1, window_bounds = array<i64: 256, 8>}, {pipeline_mode = #tpu.pipeline_mode<synchronous>, transform_indices = @transform_2, window_bounds = array<i64: 16, 512>}, {pipeline_mode = #tpu.pipeline_mode<synchronous>, transform_indices = @transform_3, window_bounds = array<i64: 8, 512>}, {pipeline_mode = #tpu.pipeline_mode<synchronous>, transform_indices = @transform_4, window_bounds = array<i64: 1, 512>}, {pipeline_mode = #tpu.pipeline_mode<synchronous>, transform_indices = @transform_5, window_bounds = array<i64: 512, 512>}, {pipeline_mode = #tpu.pipeline_mode<synchronous>, transform_indices = @transform_6, window_bounds = array<i64: 1, 512>}, {pipeline_mode = #tpu.pipeline_mode<synchronous>, transform_indices = @transform_7, window_bounds = array<i64: 512, 16>}, {pipeline_mode = #tpu.pipeline_mode<synchronous>, transform_indices = @transform_8, window_bounds = array<i64: 1, 16>}, {pipeline_mode = #tpu.pipeline_mode<synchronous>, transform_indices = @transform_9, window_bounds = array<i64: 16, 512>}, {pipeline_mode = #tpu.pipeline_mode<synchronous>, transform_indices = @transform_10, window_bounds = array<i64: 1, 512>}, {pipeline_mode = #tpu.pipeline_mode<synchronous>, transform_indices = @transform_11, window_bounds = array<i64: 512, 512>}, {pipeline_mode = #tpu.pipeline_mode<synchronous>, transform_indices = @transform_12, window_bounds = array<i64: 1, 512>}, {pipeline_mode = #tpu.pipeline_mode<synchronous>, transform_indices = @transform_13, window_bounds = array<i64: 512, 24>}, {pipeline_mode = #tpu.pipeline_mode<synchronous>, transform_indices = @transform_14, window_bounds = array<i64: 1, 24>}, {transform_indices = @transform_15, window_bounds = array<i64: 256, 16>}, {transform_indices = @transform_16, window_bounds = array<i64: 256, 24>}]} {
    %c0 = arith.constant 0 : index
    %c0_0 = arith.constant 0 : index
    %0 = vector.load %arg1[%c0, %c0_0] : memref<256x16xf32, #tpu.memory_space<vmem>>, vector<256x16xf32>
    %c0_1 = arith.constant 0 : index
    %c0_2 = arith.constant 0 : index
    %1 = vector.load %arg2[%c0_1, %c0_2] : memref<256x8xf32, #tpu.memory_space<vmem>>, vector<256x8xf32>
    %2 = arith.truncf %0 : vector<256x16xf32> to vector<256x16xbf16>
    %c0_3 = arith.constant 0 : index
    %c0_4 = arith.constant 0 : index
    %3 = vector.load %arg3[%c0_3, %c0_4] : memref<16x512xbf16, #tpu.memory_space<vmem>>, vector<16x512xbf16>
    %cst = arith.constant dense<0.000000e+00> : vector<256x512xf32>
    %4 = tpu.matmul %2, %3, %cst {dimension_numbers = #tpu.dot_dimension_numbers<[1], [0], [0], [1], [0, 0, 1, 1], [], []>} : vector<256x16xbf16>, vector<16x512xbf16>, vector<256x512xf32> -> vector<256x512xf32>
    %5 = arith.truncf %1 : vector<256x8xf32> to vector<256x8xbf16>
    %c0_5 = arith.constant 0 : index
    %c0_6 = arith.constant 0 : index
    %6 = vector.load %arg4[%c0_5, %c0_6] : memref<8x512xbf16, #tpu.memory_space<vmem>>, vector<8x512xbf16>
    %cst_7 = arith.constant dense<0.000000e+00> : vector<256x512xf32>
    %7 = tpu.matmul %5, %6, %cst_7 {dimension_numbers = #tpu.dot_dimension_numbers<[1], [0], [0], [1], [0, 0, 1, 1], [], []>} : vector<256x8xbf16>, vector<8x512xbf16>, vector<256x512xf32> -> vector<256x512xf32>
    %8 = arith.addf %4, %7 : vector<256x512xf32>
    %c0_8 = arith.constant 0 : index
    %c0_9 = arith.constant 0 : index
    %9 = vector.load %arg5[%c0_8, %c0_9] : memref<1x512xf32, #tpu.memory_space<vmem>>, vector<1x512xf32>
    %10 = vector.broadcast %9 : vector<1x512xf32> to vector<256x512xf32>
    %11 = arith.addf %8, %10 : vector<256x512xf32>
    %cst_10 = arith.constant 0.000000e+00 : f32
    %12 = vector.broadcast %cst_10 : f32 to vector<256x512xf32>
    %13 = arith.maximumf %11, %12 : vector<256x512xf32>
    %14 = arith.truncf %13 : vector<256x512xf32> to vector<256x512xbf16>
    %c0_11 = arith.constant 0 : index
    %c0_12 = arith.constant 0 : index
    %15 = vector.load %arg6[%c0_11, %c0_12] : memref<512x512xbf16, #tpu.memory_space<vmem>>, vector<512x512xbf16>
    %cst_13 = arith.constant dense<0.000000e+00> : vector<256x512xf32>
    %16 = tpu.matmul %14, %15, %cst_13 {dimension_numbers = #tpu.dot_dimension_numbers<[1], [0], [0], [1], [0, 0, 1, 1], [], []>} : vector<256x512xbf16>, vector<512x512xbf16>, vector<256x512xf32> -> vector<256x512xf32>
    %c0_14 = arith.constant 0 : index
    %c0_15 = arith.constant 0 : index
    %17 = vector.load %arg7[%c0_14, %c0_15] : memref<1x512xf32, #tpu.memory_space<vmem>>, vector<1x512xf32>
    %18 = vector.broadcast %17 : vector<1x512xf32> to vector<256x512xf32>
    %19 = arith.addf %16, %18 : vector<256x512xf32>
    %cst_16 = arith.constant 0.000000e+00 : f32
    %20 = vector.broadcast %cst_16 : f32 to vector<256x512xf32>
    %21 = arith.maximumf %19, %20 : vector<256x512xf32>
    %22 = arith.truncf %21 : vector<256x512xf32> to vector<256x512xbf16>
    %c0_17 = arith.constant 0 : index
    %c0_18 = arith.constant 0 : index
    %23 = vector.load %arg8[%c0_17, %c0_18] : memref<512x16xbf16, #tpu.memory_space<vmem>>, vector<512x16xbf16>
    %cst_19 = arith.constant dense<0.000000e+00> : vector<256x16xf32>
    %24 = tpu.matmul %22, %23, %cst_19 {dimension_numbers = #tpu.dot_dimension_numbers<[1], [0], [0], [1], [0, 0, 1, 1], [], []>} : vector<256x512xbf16>, vector<512x16xbf16>, vector<256x16xf32> -> vector<256x16xf32>
    %c0_20 = arith.constant 0 : index
    %c0_21 = arith.constant 0 : index
    %25 = vector.load %arg9[%c0_20, %c0_21] : memref<1x16xf32, #tpu.memory_space<vmem>>, vector<1x16xf32>
    %26 = vector.broadcast %25 : vector<1x16xf32> to vector<256x16xf32>
    %27 = arith.addf %24, %26 : vector<256x16xf32>
    %28 = arith.truncf %27 : vector<256x16xf32> to vector<256x16xbf16>
    %c0_22 = arith.constant 0 : index
    %c0_23 = arith.constant 0 : index
    %29 = vector.load %arg10[%c0_22, %c0_23] : memref<16x512xbf16, #tpu.memory_space<vmem>>, vector<16x512xbf16>
    %cst_24 = arith.constant dense<0.000000e+00> : vector<256x512xf32>
    %30 = tpu.matmul %28, %29, %cst_24 {dimension_numbers = #tpu.dot_dimension_numbers<[1], [0], [0], [1], [0, 0, 1, 1], [], []>} : vector<256x16xbf16>, vector<16x512xbf16>, vector<256x512xf32> -> vector<256x512xf32>
    %c0_25 = arith.constant 0 : index
    %c0_26 = arith.constant 0 : index
    %31 = vector.load %arg11[%c0_25, %c0_26] : memref<1x512xf32, #tpu.memory_space<vmem>>, vector<1x512xf32>
    %32 = vector.broadcast %31 : vector<1x512xf32> to vector<256x512xf32>
    %33 = arith.addf %30, %32 : vector<256x512xf32>
    %cst_27 = arith.constant 0.000000e+00 : f32
    %34 = vector.broadcast %cst_27 : f32 to vector<256x512xf32>
    %35 = arith.maximumf %33, %34 : vector<256x512xf32>
    %36 = arith.truncf %35 : vector<256x512xf32> to vector<256x512xbf16>
    %c0_28 = arith.constant 0 : index
    %c0_29 = arith.constant 0 : index
    %37 = vector.load %arg12[%c0_28, %c0_29] : memref<512x512xbf16, #tpu.memory_space<vmem>>, vector<512x512xbf16>
    %cst_30 = arith.constant dense<0.000000e+00> : vector<256x512xf32>
    %38 = tpu.matmul %36, %37, %cst_30 {dimension_numbers = #tpu.dot_dimension_numbers<[1], [0], [0], [1], [0, 0, 1, 1], [], []>} : vector<256x512xbf16>, vector<512x512xbf16>, vector<256x512xf32> -> vector<256x512xf32>
    %c0_31 = arith.constant 0 : index
    %c0_32 = arith.constant 0 : index
    %39 = vector.load %arg13[%c0_31, %c0_32] : memref<1x512xf32, #tpu.memory_space<vmem>>, vector<1x512xf32>
    %40 = vector.broadcast %39 : vector<1x512xf32> to vector<256x512xf32>
    %41 = arith.addf %38, %40 : vector<256x512xf32>
    %cst_33 = arith.constant 0.000000e+00 : f32
    %42 = vector.broadcast %cst_33 : f32 to vector<256x512xf32>
    %43 = arith.maximumf %41, %42 : vector<256x512xf32>
    %44 = arith.truncf %43 : vector<256x512xf32> to vector<256x512xbf16>
    %c0_34 = arith.constant 0 : index
    %c0_35 = arith.constant 0 : index
    %45 = vector.load %arg14[%c0_34, %c0_35] : memref<512x24xbf16, #tpu.memory_space<vmem>>, vector<512x24xbf16>
    %cst_36 = arith.constant dense<0.000000e+00> : vector<256x24xf32>
    %46 = tpu.matmul %44, %45, %cst_36 {dimension_numbers = #tpu.dot_dimension_numbers<[1], [0], [0], [1], [0, 0, 1, 1], [], []>} : vector<256x512xbf16>, vector<512x24xbf16>, vector<256x24xf32> -> vector<256x24xf32>
    %c0_37 = arith.constant 0 : index
    %c0_38 = arith.constant 0 : index
    %47 = vector.load %arg15[%c0_37, %c0_38] : memref<1x24xf32, #tpu.memory_space<vmem>>, vector<1x24xf32>
    %48 = vector.broadcast %47 : vector<1x24xf32> to vector<256x24xf32>
    %49 = arith.addf %46, %48 : vector<256x24xf32>
    %c0_39 = arith.constant 0 : index
    %c0_40 = arith.constant 0 : index
    %50 = vector.load %arg16[%c0_39, %c0_40] : memref<256x16xf32, #tpu.memory_space<vmem>>, vector<256x16xf32>
    tpu.vector_store %arg16[%c0_39, %c0_40], %27 {strides = array<i32>} : memref<256x16xf32, #tpu.memory_space<vmem>>, vector<256x16xf32>,
    %c0_41 = arith.constant 0 : index
    %c0_42 = arith.constant 0 : index
    %51 = vector.load %arg17[%c0_41, %c0_42] : memref<256x24xf32, #tpu.memory_space<vmem>>, vector<256x24xf32>
    tpu.vector_store %arg17[%c0_41, %c0_42], %49 {strides = array<i32>} : memref<256x24xf32, #tpu.memory_space<vmem>>, vector<256x24xf32>,
    return
  }
  func.func @transform_0(%arg0: i32) -> (i32, i32) {
    %c0_i32 = arith.constant 0 : i32
    %c0_i32_0 = arith.constant 0 : i32
    return %arg0, %c0_i32 : i32, i32
  }
  func.func @transform_1(%arg0: i32) -> (i32, i32) {
    %c0_i32 = arith.constant 0 : i32
    %c0_i32_0 = arith.constant 0 : i32
    return %arg0, %c0_i32 : i32, i32
  }
  func.func @transform_2(%arg0: i32) -> (i32, i32) {
    %c0_i32 = arith.constant 0 : i32
    %c0_i32_0 = arith.constant 0 : i32
    %c0_i32_1 = arith.constant 0 : i32
    return %c0_i32, %c0_i32_0 : i32, i32
  }
  func.func @transform_3(%arg0: i32) -> (i32, i32) {
    %c0_i32 = arith.constant 0 : i32
    %c0_i32_0 = arith.constant 0 : i32
    %c0_i32_1 = arith.constant 0 : i32
    return %c0_i32, %c0_i32_0 : i32, i32
  }
  func.func @transform_4(%arg0: i32) -> (i32, i32) {
    %c0_i32 = arith.constant 0 : i32
    %c0_i32_0 = arith.constant 0 : i32
    %c0_i32_1 = arith.constant 0 : i32
    return %c0_i32, %c0_i32_0 : i32, i32
  }
  func.func @transform_5(%arg0: i32) -> (i32, i32) {
    %c0_i32 = arith.constant 0 : i32
    %c0_i32_0 = arith.constant 0 : i32
    %c0_i32_1 = arith.constant 0 : i32
    return %c0_i32, %c0_i32_0 : i32, i32
  }
  func.func @transform_6(%arg0: i32) -> (i32, i32) {
    %c0_i32 = arith.constant 0 : i32
    %c0_i32_0 = arith.constant 0 : i32
    %c0_i32_1 = arith.constant 0 : i32
    return %c0_i32, %c0_i32_0 : i32, i32
  }
  func.func @transform_7(%arg0: i32) -> (i32, i32) {
    %c0_i32 = arith.constant 0 : i32
    %c0_i32_0 = arith.constant 0 : i32
    %c0_i32_1 = arith.constant 0 : i32
    return %c0_i32, %c0_i32_0 : i32, i32
  }
  func.func @transform_8(%arg0: i32) -> (i32, i32) {
    %c0_i32 = arith.constant 0 : i32
    %c0_i32_0 = arith.constant 0 : i32
    %c0_i32_1 = arith.constant 0 : i32
    return %c0_i32, %c0_i32_0 : i32, i32
  }
  func.func @transform_9(%arg0: i32) -> (i32, i32) {
    %c0_i32 = arith.constant 0 : i32
    %c0_i32_0 = arith.constant 0 : i32
    %c0_i32_1 = arith.constant 0 : i32
    return %c0_i32, %c0_i32_0 : i32, i32
  }
  func.func @transform_10(%arg0: i32) -> (i32, i32) {
    %c0_i32 = arith.constant 0 : i32
    %c0_i32_0 = arith.constant 0 : i32
    %c0_i32_1 = arith.constant 0 : i32
    return %c0_i32, %c0_i32_0 : i32, i32
  }
  func.func @transform_11(%arg0: i32) -> (i32, i32) {
    %c0_i32 = arith.constant 0 : i32
    %c0_i32_0 = arith.constant 0 : i32
    %c0_i32_1 = arith.constant 0 : i32
    return %c0_i32, %c0_i32_0 : i32, i32
  }
  func.func @transform_12(%arg0: i32) -> (i32, i32) {
    %c0_i32 = arith.constant 0 : i32
    %c0_i32_0 = arith.constant 0 : i32
    %c0_i32_1 = arith.constant 0 : i32
    return %c0_i32, %c0_i32_0 : i32, i32
  }
  func.func @transform_13(%arg0: i32) -> (i32, i32) {
    %c0_i32 = arith.constant 0 : i32
    %c0_i32_0 = arith.constant 0 : i32
    %c0_i32_1 = arith.constant 0 : i32
    return %c0_i32, %c0_i32_0 : i32, i32
  }
  func.func @transform_14(%arg0: i32) -> (i32, i32) {
    %c0_i32 = arith.constant 0 : i32
    %c0_i32_0 = arith.constant 0 : i32
    %c0_i32_1 = arith.constant 0 : i32
    return %c0_i32, %c0_i32_0 : i32, i32
  }
  func.func @transform_15(%arg0: i32) -> (i32, i32) {
    %c0_i32 = arith.constant 0 : i32
    %c0_i32_0 = arith.constant 0 : i32
    return %arg0, %c0_i32 : i32, i32
  }
  func.func @transform_16(%arg0: i32) -> (i32, i32) {
    %c0_i32 = arith.constant 0 : i32
    %c0_i32_0 = arith.constant 0 : i32
    return %arg0, %c0_i32 : i32, i32
  }
}

</mosaic_0001>

<bundles_post_ra>
// kernel: ae2_forward.1
= control target key start
LH: loop header
LB: loop body
LE: loop exit
PB: predicated region body
PF: predicated region fallthrough
CT: control target
= control target key end

     0   :  { %s11610_s0 = inlined_call_operand.vmem [shape: f32[512,16], index: 0, kind: input, shape index: {}]   ;;  %s11611_s1 = inlined_call_operand.vmem [shape: f32[512,8], index: 1, kind: input, shape index: {}]   ;;  %s11612_s2 = inlined_call_operand.vmem [shape: bf16[16,512], index: 2, kind: input, shape index: {}]   ;;  %s11613_s3 = inlined_call_operand.vmem [shape: bf16[8,512], index: 3, kind: input, shape index: {}]   ;;  %s11614_s4 = inlined_call_operand.vmem [shape: f32[1,512], index: 4, kind: input, shape index: {}]   ;;  %s11615_s5 = inlined_call_operand.vmem [shape: bf16[512,512], index: 5, kind: input, shape index: {}]   ;;  %s11616_s6 = inlined_call_operand.vmem [shape: f32[1,512], index: 6, kind: input, shape index: {}]   ;;  %s11617_s7 = inlined_call_operand.vmem [shape: bf16[512,16], index: 7, kind: input, shape index: {}]   ;;  %s11618_s8 = inlined_call_operand.vmem [shape: f32[1,16], index: 8, kind: input, shape index: {}]   ;;  %s11619_s9 = inlined_call_operand.vmem [shape: bf16[16,512], index: 9, kind: input, shape index: {}]   ;;  %s11620_s10 = inlined_call_operand.vmem [shape: f32[1,512], index: 10, kind: input, shape index: {}]   ;;  %s11621_s11 = inlined_call_operand.hbm [shape: bf16[512,512], index: 11, kind: input, shape index: {}]   ;;  %s11622_s12 = inlined_call_operand.vmem [shape: f32[1,512], index: 12, kind: input, shape index: {}]   ;;  %s11623_s13 = inlined_call_operand.vmem [shape: bf16[512,24], index: 13, kind: input, shape index: {}]   ;;  %s11624_s14 = inlined_call_operand.vmem [shape: f32[1,24], index: 14, kind: input, shape index: {}]   ;;  %s11625_s15 = inlined_call_operand.vmem [shape: f32[512,16], index: 15, kind: output, shape index: {0}]   ;;  %s11626_s16 = inlined_call_operand.vmem [shape: f32[512,24], index: 16, kind: output, shape index: {1}]  }
   0x1   :  { %11630 = sst [smem:[#allocation5_spill]] %s11610_s0 }
   0x2   :  { %22 = vsyncpa [#allocation3], 0  ;;  %s9631_s21 = smov 0  }
   0x3 LB: > { %s7479_s22 = sadd.s32 4294967295, %s9540_s21   ;;  %p7481_p0 = scmp.ge.s32.totalorder %s9540_s21, 1  ;;  %s9540_s21 = sphi %s9631_s21, %s28_s21  }
   0x4   : > { %p410_p1 = scmp.lt.s32.totalorder %s9540_s21, 3  ;;  %s9542_s23 = smov [#allocation2]  }
   0x5   : > { %s449_s24 = sshll.u32 %s9542_s23, 4  ;;  %p9645_p3 = scmp.eq.s32.totalorder %s7479_s22, 0  ;;  %s450_s24 = int_to_ptr.vmem [resolvable:$true] %s449_s24 }
   0x6   : > { %p9639_p2 = pnand %p7481_p0, %p410_p1  ;;  %s9502_s30 = scalar_lea.hbm %s11621_s11, 16384 }
   0x7   : > { %s11632_s26 = scalar_select %p9645_p3, 1, 0 }
   0x8   : > { %s11631_s25 = scalar_select %p9639_p2, 1, 0 }
   0x9   : > { %p9020_p4 = pneg %p9639_p2  ;;  %p9503_p6 = scmp.ne.s32.totalorder %s11621_s11, %s9502_s30 }
   0xa   : > { %p9509_p10 = scmp.lt.u32.totalorder %s9502_s30, %s11621_s11 }
   0xb   : > { %p9653_p5 = pnand %p9645_p3, %p9020_p4 }
   0xd   : > { %p9504_p7 = pneg %p9653_p5 }
   0xf   : > { %p9505_p8 = pnand %p9504_p7, %p9503_p6 }
  0x11   : > { %p9506_p9 = pneg %p9505_p8 }
  0x13   : > { %p9511_p11 = pnand %p9509_p10, %p9506_p9 }
  0x15   : > { %9514 = shalt.err (!%p9511_p11)
}
  0x16   : > { %s9515_s20 = scalar_lea.vmem %s450_s24, 16384  ;;  %p9523_p1 = scmp.lt.s32.totalorder %s450_s24, %s450_s24 }
  0x17   : > { %p9516_p12 = scmp.ne.s32.totalorder %s450_s24, %s9515_s20  ;;  %p9524_p4 = scmp.lt.s32.totalorder %s9515_s20, %s9515_s20 }
  0x19   : > { %p9518_p13 = pnand %p9516_p12, %p9504_p7  ;;  %p9525_p3 = por %p9524_p4, %p9523_p1 }
  0x1b   : > { %p9519_p0 = pneg %p9518_p13 }
  0x1d   : > { %p9526_p2 = pnand %p9525_p3, %p9519_p0 }
  0x1f   : > { %9529 = shalt.err (!%p9526_p2)
}
  0x20   : > { %s9543_s23 = smov 256   ;;  %s9544_s28 = smov 16  }
  0x21   : > { %9023 = dma.hbm_to_vmem [thread:$0]  (!%p9653_p5), %s11621_s11, 16384, %s450_s24, [#allocation3], %s9543_s23, %s9543_s23, %s9544_s28  }
  0x22   : > { %p11634_p6 = scmp.ne.s32.totalorder %s11631_s25, 0 }
  0x23   : > { %p11635_p8 = scmp.ne.s32.totalorder (!%p11634_p6), %s11632_s26, 0 }
  0x24   : > { %492 = sbr.rel (%p11634_p6) target bundleno = 1890 (0x762), region = 80 }
  0x2b   : > { %9535 = dma.done.wait (%p11635_p8), [#allocation3], 16384  }
  0x2c   : > { %9537 = vsyncadd (%p11635_p8), [#allocation3], 4294950912  ;;  %s7486_s30 = sshll.u32 %s7479_s22, 5  ;;  %v9545_v0 = vmov 0   ;;  %v677_v1 = vld [vmem:[%s11613_s3] sm:$0xff]  ;;  %vm738_vm0 = vcmask 1043456  }
  0x2d   : > { %783 = vmatprep.mubr.bf16.mxu0 %v9545_v0  ;;  %976 = vmatprep.mubr.bf16.mxu1 %v9545_v0  ;;  %p553_p2 = scmp.lt.s32.totalorder %s7486_s30, 63  ;;  %v678_v2 = vld [vmem:[%s11613_s3 + $0x8] sm:$0xff]  ;;  %v7495_v4 = vcombine.high %v677_v1, %v677_v1  ;;  %v7494_v6 = vcombine.low %v677_v1, %v677_v1  ;;  %v9044_v9 = vld [vmem:[%s11612_s2 + $0x4] ss:$16 sps:$4 sm:$0xff]   ;;  %vm689_vm1 = vcmask 64512   ;;  %s11636_s28 = sld [smem:[#allocation5_spill]] }
  0x2e   : > { %v7497_v5 = vcombine.high %v678_v2, %v678_v2  ;;  %v7496_v7 = vcombine.low %v678_v2, %v678_v2  ;;  %v9042_v13 = vld [vmem:[%s11612_s2] ss:$16 sps:$4 sm:$0xff]   ;;  %v9045_v17 = vld [vmem:[%s11612_s2 + $0x8] ss:$16 sps:$4 sm:$0xff]   ;;  %v9047_v18 = vld [vmem:[%s11612_s2 + $0xc] ss:$16 sps:$4 sm:$0xff]  }
  0x2f   : > { %s11638_s30 = smov (!%p553_p2, %s7486_s30), 63  ;;  %7498 = vmatprep.subr.msk.bf16.mxu0 %vm738_vm0, %v7495_v4  ;;  %v740_v10 = vsel %vm738_vm0, %v7494_v6, 0  ;;  %v9050_v49 = vld [vmem:[%s11615_s5 + $0x4] ss:$16 sps:$4 sm:$0xff]   ;;  %v9053_v53 = vld [vmem:[%s11615_s5 + $0xc] ss:$16 sps:$4 sm:$0xff]  }
  0x30   : > { %s9683_s24 = sshll.u32 %s11638_s30, 3  ;;  %7515 = vmatprep.subr.msk.bf16.mxu1 %vm738_vm0, %v7497_v5  ;;  %v746_v11 = vsel %vm738_vm0, %v7496_v7, 0  ;;  %752 = vmatpush1.bf16.msra.mxu0 %v740_v10  ;;  %vm1157_vm2 = vcmask 130048   ;;  %v9051_v4 = vld [vmem:[%s11615_s5 + $0x8] ss:$16 sps:$4 sm:$0xff]   ;;  %vm7332_vm3 = vcmask 195584  }
  0x31   : > { %s9689_s17 = scalar_lea.vmem %s11611_s1, %s9683_s24  ;;  %945 = vmatpush1.bf16.msra.mxu1 %v746_v11  ;;  %1206 = vmatprep.subr.bf16.mxu0 %v9044_v9  ;;  %v9056_v5 = vld [vmem:[%s11615_s5 + $0x24] ss:$16 sps:$4 sm:$0xff]   ;;  %v9059_v6 = vld [vmem:[%s11615_s5 + $0x2c] ss:$16 sps:$4 sm:$0xff]   ;;  %v9054_v9 = vld [vmem:[%s11615_s5 + $0x20] ss:$16 sps:$4 sm:$0xff]   ;;  %s10831_s27 = scalar_lea.vmem %s11625_s15, %s9683_s24 }
  0x32   : > { %v609_v3 = vld [vmem:[%s9689_s17] sm:$0xff]  ;;  %v610_v8 = vld [vmem:[%s9689_s17 + $0x8] sm:$0xff]  ;;  %v611_v14 = vld [vmem:[%s9689_s17 + $0x10] sm:$0xff]  ;;  %1399 = vmatprep.subr.bf16.mxu1 %v9047_v18 }
  0x33   : > { %v661_v12 = vpack.c.bf16 %v610_v8, %v609_v3  ;;  %v612_v15 = vld [vmem:[%s9689_s17 + $0x18] sm:$0xff]  ;;  %v613_v19 = vld [vmem:[%s9689_s17 + $0x20] sm:$0xff]  ;;  %v614_v20 = vld [vmem:[%s9689_s17 + $0x28] sm:$0xff]  ;;  %s9811_s29 = scalar_lea.vmem %s11636_s28, %s9683_s24  ;;  %s11510_s28 = scalar_lea.vmem %s11626_s16, %s9683_s24 }
  0x34   : > { %v662_v16 = vpack.c.bf16 %v612_v15, %v611_v14  ;;  %v663_v21 = vpack.c.bf16 %v614_v20, %v613_v19  ;;  %v615_v22 = vld [vmem:[%s9689_s17 + $0x30] sm:$0xff]  ;;  %v616_v23 = vld [vmem:[%s9689_s17 + $0x38] sm:$0xff]  ;;  %v617_v25 = vld [vmem:[%s9689_s17 + $0x40] sm:$0xff] }
  0x35   : > { %7499 = vmatmul.mubr.msk.bf16.vlgmr.msra.gmra.mrb[0].mxu0 %vm689_vm1, %v661_v12  ;;  %7516 = vmatmul.mubr.msk.bf16.vlgmr.msra.gmra.mrb[0].mxu1 %vm689_vm1, %v661_v12  ;;  %v664_v24 = vpack.c.bf16 %v616_v23, %v615_v22  ;;  %v618_v26 = vld [vmem:[%s9689_s17 + $0x48] sm:$0xff]  ;;  %v619_v28 = vld [vmem:[%s9689_s17 + $0x50] sm:$0xff]  ;;  %v620_v29 = vld [vmem:[%s9689_s17 + $0x58] sm:$0xff] }
  0x36   : > { %1207 = vmatpush1.bf16.msra.mxu0 %v9042_v13  ;;  %793 = vmatprep.mubr.bf16.mxu0 %v9545_v0  ;;  %v665_v27 = vpack.c.bf16 %v618_v26, %v617_v25  ;;  %v666_v30 = vpack.c.bf16 %v620_v29, %v619_v28  ;;  %v621_v31 = vld [vmem:[%s9689_s17 + $0x60] sm:$0xff]  ;;  %v622_v32 = vld [vmem:[%s9689_s17 + $0x68] sm:$0xff]  ;;  %v623_v34 = vld [vmem:[%s9689_s17 + $0x70] sm:$0xff] }
  0x37   : > { %986 = vmatprep.mubr.bf16.mxu1 %v9545_v0  ;;  %1400 = vmatpush1.bf16.msra.mxu1 %v9045_v17  ;;  %v667_v33 = vpack.c.bf16 %v622_v32, %v621_v31  ;;  %v624_v35 = vld [vmem:[%s9689_s17 + $0x78] sm:$0xff]  ;;  %v625_v37 = vld [vmem:[%s9689_s17 + $0x80] sm:$0xff]  ;;  %v626_v38 = vld [vmem:[%s9689_s17 + $0x88] sm:$0xff] }
  0x38   : > { %v668_v36 = vpack.c.bf16 %v624_v35, %v623_v34  ;;  %v669_v39 = vpack.c.bf16 %v626_v38, %v625_v37  ;;  %v627_v40 = vld [vmem:[%s9689_s17 + $0x90] sm:$0xff]  ;;  %v628_v41 = vld [vmem:[%s9689_s17 + $0x98] sm:$0xff]  ;;  %v629_v43 = vld [vmem:[%s9689_s17 + $0xa0] sm:$0xff]  ;;  %2724 = vmatprep.subr.bf16.mxu0 %v9050_v49  ;;  %3110 = vmatprep.subr.bf16.mxu1 %v9053_v53 }
  0x39   : > { %v670_v42 = vpack.c.bf16 %v628_v41, %v627_v40  ;;  %v630_v44 = vld [vmem:[%s9689_s17 + $0xa8] sm:$0xff]  ;;  %v631_v46 = vld [vmem:[%s9689_s17 + $0xb0] sm:$0xff]  ;;  %v632_v47 = vld [vmem:[%s9689_s17 + $0xb8] sm:$0xff] }
  0x3a   : > { %v671_v45 = vpack.c.bf16 %v630_v44, %v629_v43  ;;  %v672_v48 = vpack.c.bf16 %v632_v47, %v631_v46  ;;  %v633_v50 = vld [vmem:[%s9689_s17 + $0xc0] sm:$0xff]  ;;  %v634_v51 = vld [vmem:[%s9689_s17 + $0xc8] sm:$0xff]  ;;  %v635_v54 = vld [vmem:[%s9689_s17 + $0xd0] sm:$0xff] }
  0x3b   : > { %v673_v52 = vpack.c.bf16 %v634_v51, %v633_v50  ;;  %v636_v55 = vld [vmem:[%s9689_s17 + $0xd8] sm:$0xff]  ;;  %v637_v57 = vld [vmem:[%s9689_s17 + $0xe0] sm:$0xff]  ;;  %v638_v58 = vld [vmem:[%s9689_s17 + $0xe8] sm:$0xff] }
  0x3c   : > { %v674_v56 = vpack.c.bf16 %v636_v55, %v635_v54  ;;  %v675_v59 = vpack.c.bf16 %v638_v58, %v637_v57  ;;  %v639_v60 = vld [vmem:[%s9689_s17 + $0xf0] sm:$0xff]  ;;  %v640_v61 = vld [vmem:[%s9689_s17 + $0xf8] sm:$0xff]  ;;  %v577_v63 = vld [vmem:[%s9811_s29] sm:$0xff] }
  0x3d   : > { %7500 = vmatmul.mubr.msk.bf16.gmra.mrb[4].mxu0 %vm689_vm1, %v662_v16  ;;  %7517 = vmatmul.mubr.msk.bf16.gmra.mrb[4].mxu1 %vm689_vm1, %v662_v16  ;;  %v676_v62 = vpack.c.bf16 %v640_v61, %v639_v60  ;;  %v578_v1 = vld [vmem:[%s9811_s29 + $0x8] sm:$0xff]  ;;  %v9048_v3 = vld [vmem:[%s11615_s5] ss:$16 sps:$4 sm:$0xff]   ;;  %v580_v8 = vld [vmem:[%s9811_s29 + $0x18] sm:$0xff] }
  0x3e   : > { %803 = vmatprep.mubr.bf16.mxu0 %v9545_v0  ;;  %996 = vmatprep.mubr.bf16.mxu1 %v9545_v0  ;;  %v641_v2 = vpack.c.bf16 %v578_v1, %v577_v63  ;;  %v579_v7 = vld [vmem:[%s9811_s29 + $0x10] sm:$0xff]  ;;  %v9057_v10 = vld [vmem:[%s11615_s5 + $0x28] ss:$16 sps:$4 sm:$0xff]   ;;  %v9065_v12 = vld [vmem:[%s11615_s5 + $0x4c] ss:$16 sps:$4 sm:$0xff]  }
  0x3f   : > { %v9062_v11 = vld [vmem:[%s11615_s5 + $0x44] ss:$16 sps:$4 sm:$0xff]   ;;  %v642_v13 = vpack.c.bf16 %v580_v8, %v579_v7  ;;  %v9060_v14 = vld [vmem:[%s11615_s5 + $0x40] ss:$16 sps:$4 sm:$0xff]   ;;  %v9063_v15 = vld [vmem:[%s11615_s5 + $0x48] ss:$16 sps:$4 sm:$0xff]  }
  0x40   : > { %v9068_v16 = vld [vmem:[%s11615_s5 + $0x64] ss:$16 sps:$4 sm:$0xff]   ;;  %v582_v18 = vld [vmem:[%s9811_s29 + $0x28] sm:$0xff]  ;;  %v9066_v20 = vld [vmem:[%s11615_s5 + $0x60] ss:$16 sps:$4 sm:$0xff]  }
  0x41   : > { %v581_v17 = vld [vmem:[%s9811_s29 + $0x20] sm:$0xff]  ;;  %v9071_v19 = vld [vmem:[%s11615_s5 + $0x6c] ss:$16 sps:$4 sm:$0xff]   ;;  %v9075_v26 = vld [vmem:[%s11615_s5 + $0x88] ss:$16 sps:$4 sm:$0xff]  }
  0x42   : > { %v9074_v22 = vld [vmem:[%s11615_s5 + $0x84] ss:$16 sps:$4 sm:$0xff]   ;;  %v9077_v23 = vld [vmem:[%s11615_s5 + $0x8c] ss:$16 sps:$4 sm:$0xff]   ;;  %v9072_v25 = vld [vmem:[%s11615_s5 + $0x80] ss:$16 sps:$4 sm:$0xff]  }
  0x43   : > { %v9083_v28 = vld [vmem:[%s11615_s5 + $0xac] ss:$16 sps:$4 sm:$0xff]   ;;  %v583_v29 = vld [vmem:[%s9811_s29 + $0x30] sm:$0xff]  ;;  %v9081_v32 = vld [vmem:[%s11615_s5 + $0xa8] ss:$16 sps:$4 sm:$0xff]  }
  0x44   : > { %v9078_v31 = vld [vmem:[%s11615_s5 + $0xa0] ss:$16 sps:$4 sm:$0xff]   ;;  %v9089_v34 = vld [vmem:[%s11615_s5 + $0xcc] ss:$16 sps:$4 sm:$0xff]   ;;  %v9087_v37 = vld [vmem:[%s11615_s5 + $0xc8] ss:$16 sps:$4 sm:$0xff]  }
  0x45   : > { %7501 = vmatmul.mubr.msk.bf16.gmra.mrb[8].mxu0 %vm689_vm1, %v663_v21  ;;  %7518 = vmatmul.mubr.msk.bf16.gmra.mrb[8].mxu1 %vm689_vm1, %v663_v21  ;;  %v9069_v21 = vld [vmem:[%s11615_s5 + $0x68] ss:$16 sps:$4 sm:$0xff]   ;;  %v9092_v38 = vld [vmem:[%s11615_s5 + $0xe4] ss:$16 sps:$4 sm:$0xff]   ;;  %v9096_v47 = vld [vmem:[%s11615_s5 + $0x100] ss:$16 sps:$4 sm:$0xff]  }
  0x46   : > { %813 = vmatprep.mubr.bf16.mxu0 %v9545_v0  ;;  %1006 = vmatprep.mubr.bf16.mxu1 %v9545_v0  ;;  %v585_v40 = vld [vmem:[%s9811_s29 + $0x40] sm:$0xff]  ;;  %v586_v41 = vld [vmem:[%s9811_s29 + $0x48] sm:$0xff]  ;;  %v587_v51 = vld [vmem:[%s9811_s29 + $0x50] sm:$0xff] }
  0x47   : > { %v9093_v43 = vld [vmem:[%s11615_s5 + $0xe8] ss:$16 sps:$4 sm:$0xff]   ;;  %v9098_v44 = vld [vmem:[%s11615_s5 + $0x104] ss:$16 sps:$4 sm:$0xff]   ;;  %v645_v46 = vpack.c.bf16 %v586_v41, %v585_v40  ;;  %v9107_v50 = vld [vmem:[%s11615_s5 + $0x12c] ss:$16 sps:$4 sm:$0xff]  }
  0x48   : > { %v9104_v49 = vld [vmem:[%s11615_s5 + $0x124] ss:$16 sps:$4 sm:$0xff]   ;;  %v9102_v53 = vld [vmem:[%s11615_s5 + $0x120] ss:$16 sps:$4 sm:$0xff]   ;;  %v9105_v54 = vld [vmem:[%s11615_s5 + $0x128] ss:$16 sps:$4 sm:$0xff]  }
  0x49   : > { %v9110_v55 = vld [vmem:[%s11615_s5 + $0x144] ss:$16 sps:$4 sm:$0xff]   ;;  %v9108_v58 = vld [vmem:[%s11615_s5 + $0x140] ss:$16 sps:$4 sm:$0xff]   ;;  %v9119_v61 = vld [vmem:[%s11615_s5 + $0x16c] ss:$16 sps:$4 sm:$0xff]  }
  0x4a   : > { %v9116_v60 = vld [vmem:[%s11615_s5 + $0x164] ss:$16 sps:$4 sm:$0xff]   ;;  %v590_v63 = vld [vmem:[%s9811_s29 + $0x68] sm:$0xff]  ;;  %v9114_v1 = vld [vmem:[%s11615_s5 + $0x160] ss:$16 sps:$4 sm:$0xff]  }
  0x4b   : > { %v9123_v7 = vld [vmem:[%s11615_s5 + $0x188] ss:$16 sps:$4 sm:$0xff]   ;;  %v9128_v8 = vld [vmem:[%s11615_s5 + $0x1a4] ss:$16 sps:$4 sm:$0xff]  }
  0x4c   : > { %v603_v40 = vld [vmem:[%s9811_s29 + $0xd0] sm:$0xff]  ;;  %v604_v41 = vld [vmem:[%s9811_s29 + $0xd8] sm:$0xff] }
  0x4d   : > { %7502 = vmatmul.mubr.msk.bf16.gmra.mrb[12].mxu0 %vm689_vm1, %v664_v24  ;;  %7519 = vmatmul.mubr.msk.bf16.gmra.mrb[12].mxu1 %vm689_vm1, %v664_v24  ;;  %v643_v24 = vpack.c.bf16 %v582_v18, %v581_v17  ;;  %v9132_v17 = vld [vmem:[%s11615_s5 + $0x1c0] ss:$16 sps:$4 sm:$0xff]   ;;  %v9135_v18 = vld [vmem:[%s11615_s5 + $0x1c8] ss:$16 sps:$4 sm:$0xff]  }
  0x4e   : > { %823 = vmatprep.mubr.bf16.mxu0 %v9545_v0  ;;  %1016 = vmatprep.mubr.bf16.mxu1 %v9545_v0 }
  0x55   : > { %7503 = vmatmul.mubr.msk.bf16.gmra.mrb[16].mxu0 %vm689_vm1, %v665_v27  ;;  %7520 = vmatmul.mubr.msk.bf16.gmra.mrb[16].mxu1 %vm689_vm1, %v665_v27  ;;  %v9080_v27 = vld [vmem:[%s11615_s5 + $0xa4] ss:$16 sps:$4 sm:$0xff]  }
  0x56   : > { %833 = vmatprep.mubr.bf16.mxu0 %v9545_v0  ;;  %1026 = vmatprep.mubr.bf16.mxu1 %v9545_v0 }
  0x5d   : > { %7504 = vmatmul.mubr.msk.bf16.gmra.mrb[20].mxu0 %vm689_vm1, %v666_v30  ;;  %7521 = vmatmul.mubr.msk.bf16.gmra.mrb[20].mxu1 %vm689_vm1, %v666_v30  ;;  %v584_v30 = vld [vmem:[%s9811_s29 + $0x38] sm:$0xff] }
  0x5e   : > { %843 = vmatprep.mubr.bf16.mxu0 %v9545_v0  ;;  %1036 = vmatprep.mubr.bf16.mxu1 %v9545_v0  ;;  %v644_v35 = vpack.c.bf16 %v584_v30, %v583_v29  ;;  %v600_v29 = vld [vmem:[%s9811_s29 + $0xb8] sm:$0xff] }
  0x65   : > { %7505 = vmatmul.mubr.msk.bf16.gmra.mrb[24].mxu0 %vm689_vm1, %v667_v33  ;;  %7522 = vmatmul.mubr.msk.bf16.gmra.mrb[24].mxu1 %vm689_vm1, %v667_v33  ;;  %v9086_v33 = vld [vmem:[%s11615_s5 + $0xc4] ss:$16 sps:$4 sm:$0xff]  }
  0x66   : > { %853 = vmatprep.mubr.bf16.mxu0 %v9545_v0  ;;  %1046 = vmatprep.mubr.bf16.mxu1 %v9545_v0 }
  0x6d   : > { %7506 = vmatmul.mubr.msk.bf16.gmra.mrb[28].mxu0 %vm689_vm1, %v668_v36  ;;  %7523 = vmatmul.mubr.msk.bf16.gmra.mrb[28].mxu1 %vm689_vm1, %v668_v36  ;;  %v9084_v36 = vld [vmem:[%s11615_s5 + $0xc0] ss:$16 sps:$4 sm:$0xff]  }
  0x6e   : > { %863 = vmatprep.mubr.bf16.mxu0 %v9545_v0  ;;  %1056 = vmatprep.mubr.bf16.mxu1 %v9545_v0 }
  0x75   : > { %7507 = vmatmul.mubr.msk.bf16.gmra.mrb[32].mxu0 %vm689_vm1, %v669_v39  ;;  %7524 = vmatmul.mubr.msk.bf16.gmra.mrb[32].mxu1 %vm689_vm1, %v669_v39  ;;  %v9095_v39 = vld [vmem:[%s11615_s5 + $0xec] ss:$16 sps:$4 sm:$0xff]  }
  0x76   : > { %873 = vmatprep.mubr.bf16.mxu0 %v9545_v0  ;;  %1066 = vmatprep.mubr.bf16.mxu1 %v9545_v0 }
  0x7d   : > { %7508 = vmatmul.mubr.msk.bf16.gmra.mrb[36].mxu0 %vm689_vm1, %v670_v42  ;;  %7525 = vmatmul.mubr.msk.bf16.gmra.mrb[36].mxu1 %vm689_vm1, %v670_v42  ;;  %v9090_v42 = vld [vmem:[%s11615_s5 + $0xe0] ss:$16 sps:$4 sm:$0xff]  }
  0x7e   : > { %883 = vmatprep.mubr.bf16.mxu0 %v9545_v0  ;;  %1076 = vmatprep.mubr.bf16.mxu1 %v9545_v0 }
  0x85   : > { %7509 = vmatmul.mubr.msk.bf16.gmra.mrb[40].mxu0 %vm689_vm1, %v671_v45  ;;  %7526 = vmatmul.mubr.msk.bf16.gmra.mrb[40].mxu1 %vm689_vm1, %v671_v45  ;;  %v9101_v45 = vld [vmem:[%s11615_s5 + $0x10c] ss:$16 sps:$4 sm:$0xff]  }
  0x86   : > { %893 = vmatprep.mubr.bf16.mxu0 %v9545_v0  ;;  %1086 = vmatprep.mubr.bf16.mxu1 %v9545_v0 }
  0x8d   : > { %7510 = vmatmul.mubr.msk.bf16.gmra.mrb[44].mxu0 %vm689_vm1, %v672_v48  ;;  %7527 = vmatmul.mubr.msk.bf16.gmra.mrb[44].mxu1 %vm689_vm1, %v672_v48  ;;  %v9099_v48 = vld [vmem:[%s11615_s5 + $0x108] ss:$16 sps:$4 sm:$0xff]  }
  0x8e   : > { %903 = vmatprep.mubr.bf16.mxu0 %v9545_v0  ;;  %1096 = vmatprep.mubr.bf16.mxu1 %v9545_v0 }
  0x95   : > { %7511 = vmatmul.mubr.msk.bf16.gmra.mrb[48].mxu0 %vm689_vm1, %v673_v52  ;;  %7528 = vmatmul.mubr.msk.bf16.gmra.mrb[48].mxu1 %vm689_vm1, %v673_v52  ;;  %v588_v52 = vld [vmem:[%s9811_s29 + $0x58] sm:$0xff] }
  0x96   : > { %913 = vmatprep.mubr.bf16.mxu0 %v9545_v0  ;;  %1106 = vmatprep.mubr.bf16.mxu1 %v9545_v0  ;;  %v646_v57 = vpack.c.bf16 %v588_v52, %v587_v51 }
  0x9d   : > { %7512 = vmatmul.mubr.msk.bf16.gmra.mrb[52].mxu0 %vm689_vm1, %v674_v56  ;;  %7529 = vmatmul.mubr.msk.bf16.gmra.mrb[52].mxu1 %vm689_vm1, %v674_v56  ;;  %v9113_v56 = vld [vmem:[%s11615_s5 + $0x14c] ss:$16 sps:$4 sm:$0xff]  }
  0x9e   : > { %923 = vmatprep.mubr.bf16.mxu0 %v9545_v0  ;;  %1116 = vmatprep.mubr.bf16.mxu1 %v9545_v0 }
  0xa5   : > { %7513 = vmatmul.mubr.msk.bf16.gmra.mrb[56].mxu0 %vm689_vm1, %v675_v59  ;;  %7530 = vmatmul.mubr.msk.bf16.gmra.mrb[56].mxu1 %vm689_vm1, %v675_v59  ;;  %v9111_v59 = vld [vmem:[%s11615_s5 + $0x148] ss:$16 sps:$4 sm:$0xff]  }
  0xa6   : > { %933 = vmatprep.mubr.bf16.mxu0 %v9545_v0  ;;  %1126 = vmatprep.mubr.bf16.mxu1 %v9545_v0 }
  0xad   : > { %7514 = vmatmul.mubr.msk.bf16.gmra.mrb[60].mxu0 %vm689_vm1, %v676_v62  ;;  %7531 = vmatmul.mubr.msk.bf16.gmra.mrb[60].mxu1 %vm689_vm1, %v676_v62  ;;  %v589_v62 = vld [vmem:[%s9811_s29 + $0x60] sm:$0xff] }
  0xae   : > { %1238 = vmatprep.mubr.bf16.mxu0 %v9545_v0  ;;  %1431 = vmatprep.mubr.bf16.mxu1 %v9545_v0 }
  0xb5   : > { %7536 = vmatmul.mubr.msk.bf16.vlgmr.msra.gmra.mrb[0].mxu0 %vm1157_vm2, %v641_v2  ;;  %7552 = vmatmul.mubr.msk.bf16.vlgmr.msra.gmra.mrb[0].mxu1 %vm1157_vm2, %v641_v2  ;;  %v9117_v2 = vld [vmem:[%s11615_s5 + $0x168] ss:$16 sps:$4 sm:$0xff]  }
  0xb6   : > { %1248 = vmatprep.mubr.bf16.mxu0 %v9545_v0  ;;  %1441 = vmatprep.mubr.bf16.mxu1 %v9545_v0 }
  0xb7   : > { %2725 = vmatpush1.bf16.msra.mxu0 %v9048_v3  ;;  %3111 = vmatpush1.bf16.msra.mxu1 %v9051_v4  ;;  %v9122_v3 = vld [vmem:[%s11615_s5 + $0x184] ss:$16 sps:$4 sm:$0xff]   ;;  %v9125_v4 = vld [vmem:[%s11615_s5 + $0x18c] ss:$16 sps:$4 sm:$0xff]  }
  0xb8   : > { %2726 = vmatprep.subr.bf16.mxu0 %v9056_v5  ;;  %3112 = vmatprep.subr.bf16.mxu1 %v9059_v6  ;;  %v647_v5 = vpack.c.bf16 %v590_v63, %v589_v62  ;;  %v9120_v6 = vld [vmem:[%s11615_s5 + $0x180] ss:$16 sps:$4 sm:$0xff]  }
  0xbb   : > { %2727 = vmatpush1.bf16.msra.mxu0 %v9054_v9  ;;  %3113 = vmatpush1.bf16.msra.mxu1 %v9057_v10  ;;  %v9131_v9 = vld [vmem:[%s11615_s5 + $0x1ac] ss:$16 sps:$4 sm:$0xff]   ;;  %v591_v10 = vld [vmem:[%s9811_s29 + $0x70] sm:$0xff] }
  0xbc   : > { %2728 = vmatprep.subr.bf16.mxu0 %v9062_v11  ;;  %3114 = vmatprep.subr.bf16.mxu1 %v9065_v12  ;;  %v592_v11 = vld [vmem:[%s9811_s29 + $0x78] sm:$0xff]  ;;  %v9126_v12 = vld [vmem:[%s11615_s5 + $0x1a0] ss:$16 sps:$4 sm:$0xff]  }
  0xbd   : > { %7537 = vmatmul.mubr.msk.bf16.gmra.mrb[4].mxu0 %vm1157_vm2, %v642_v13  ;;  %7553 = vmatmul.mubr.msk.bf16.gmra.mrb[4].mxu1 %vm1157_vm2, %v642_v13  ;;  %v9129_v13 = vld [vmem:[%s11615_s5 + $0x1a8] ss:$16 sps:$4 sm:$0xff]  }
  0xbe   : > { %1258 = vmatprep.mubr.bf16.mxu0 %v9545_v0  ;;  %1451 = vmatprep.mubr.bf16.mxu1 %v9545_v0 }
  0xbf   : > { %2729 = vmatpush1.bf16.msra.mxu0 %v9060_v14  ;;  %3115 = vmatpush1.bf16.msra.mxu1 %v9063_v15  ;;  %v9134_v14 = vld [vmem:[%s11615_s5 + $0x1c4] ss:$16 sps:$4 sm:$0xff]   ;;  %v9137_v15 = vld [vmem:[%s11615_s5 + $0x1cc] ss:$16 sps:$4 sm:$0xff]  }
  0xc0   : > { %2730 = vmatprep.subr.bf16.mxu0 %v9068_v16  ;;  %3116 = vmatprep.subr.bf16.mxu1 %v9071_v19  ;;  %v648_v16 = vpack.c.bf16 %v592_v11, %v591_v10  ;;  %v593_v19 = vld [vmem:[%s9811_s29 + $0x80] sm:$0xff] }
  0xc3   : > { %2731 = vmatpush1.bf16.msra.mxu0 %v9066_v20  ;;  %3117 = vmatpush1.bf16.msra.mxu1 %v9069_v21  ;;  %v594_v20 = vld [vmem:[%s9811_s29 + $0x88] sm:$0xff] }
  0xc4   : > { %2732 = vmatprep.subr.bf16.mxu0 %v9074_v22  ;;  %3118 = vmatprep.subr.bf16.mxu1 %v9077_v23  ;;  %v649_v21 = vpack.c.bf16 %v594_v20, %v593_v19  ;;  %v595_v22 = vld [vmem:[%s9811_s29 + $0x90] sm:$0xff]  ;;  %v596_v23 = vld [vmem:[%s9811_s29 + $0x98] sm:$0xff] }
  0xc5   : > { %7538 = vmatmul.mubr.msk.bf16.gmra.mrb[8].mxu0 %vm1157_vm2, %v643_v24  ;;  %7554 = vmatmul.mubr.msk.bf16.gmra.mrb[8].mxu1 %vm1157_vm2, %v643_v24  ;;  %v650_v24 = vpack.c.bf16 %v596_v23, %v595_v22 }
  0xc6   : > { %1268 = vmatprep.mubr.bf16.mxu0 %v9545_v0  ;;  %1461 = vmatprep.mubr.bf16.mxu1 %v9545_v0 }
  0xc7   : > { %2733 = vmatpush1.bf16.msra.mxu0 %v9072_v25  ;;  %3119 = vmatpush1.bf16.msra.mxu1 %v9075_v26  ;;  %v597_v25 = vld [vmem:[%s9811_s29 + $0xa0] sm:$0xff]  ;;  %v598_v26 = vld [vmem:[%s9811_s29 + $0xa8] sm:$0xff] }
  0xc8   : > { %2734 = vmatprep.subr.bf16.mxu0 %v9080_v27  ;;  %3120 = vmatprep.subr.bf16.mxu1 %v9083_v28  ;;  %v651_v27 = vpack.c.bf16 %v598_v26, %v597_v25  ;;  %v599_v28 = vld [vmem:[%s9811_s29 + $0xb0] sm:$0xff] }
  0xc9   : > { %v652_v30 = vpack.c.bf16 %v600_v29, %v599_v28  ;;  %v9144_v26 = vld [vmem:[%s11615_s5 + $0x200] ss:$16 sps:$4 sm:$0xff]  }
  0xcb   : > { %2735 = vmatpush1.bf16.msra.mxu0 %v9078_v31  ;;  %3121 = vmatpush1.bf16.msra.mxu1 %v9081_v32  ;;  %v601_v31 = vld [vmem:[%s9811_s29 + $0xc0] sm:$0xff] }
  0xcc   : > { %2736 = vmatprep.subr.bf16.mxu0 %v9086_v33  ;;  %3122 = vmatprep.subr.bf16.mxu1 %v9089_v34  ;;  %v9140_v32 = vld [vmem:[%s11615_s5 + $0x1e4] ss:$16 sps:$4 sm:$0xff]   ;;  %v9143_v33 = vld [vmem:[%s11615_s5 + $0x1ec] ss:$16 sps:$4 sm:$0xff]  }
  0xcd   : > { %7539 = vmatmul.mubr.msk.bf16.gmra.mrb[12].mxu0 %vm1157_vm2, %v644_v35  ;;  %7555 = vmatmul.mubr.msk.bf16.gmra.mrb[12].mxu1 %vm1157_vm2, %v644_v35  ;;  %v602_v34 = vld [vmem:[%s9811_s29 + $0xc8] sm:$0xff]  ;;  %v9138_v35 = vld [vmem:[%s11615_s5 + $0x1e0] ss:$16 sps:$4 sm:$0xff]  }
  0xce   : > { %1278 = vmatprep.mubr.bf16.mxu0 %v9545_v0  ;;  %1471 = vmatprep.mubr.bf16.mxu1 %v9545_v0 }
  0xcf   : > { %2737 = vmatpush1.bf16.msra.mxu0 %v9084_v36  ;;  %3123 = vmatpush1.bf16.msra.mxu1 %v9087_v37  ;;  %v9141_v36 = vld [vmem:[%s11615_s5 + $0x1e8] ss:$16 sps:$4 sm:$0xff]   ;;  %v653_v37 = vpack.c.bf16 %v602_v34, %v601_v31  ;;  %v9155_v34 = vld [vmem:[%s11615_s5 + $0x22c] ss:$16 sps:$4 sm:$0xff]  }
  0xd0   : > { %2738 = vmatprep.subr.bf16.mxu0 %v9092_v38  ;;  %3124 = vmatprep.subr.bf16.mxu1 %v9095_v39  ;;  %v9146_v38 = vld [vmem:[%s11615_s5 + $0x204] ss:$16 sps:$4 sm:$0xff]   ;;  %v9149_v39 = vld [vmem:[%s11615_s5 + $0x20c] ss:$16 sps:$4 sm:$0xff]  }
  0xd3   : > { %2739 = vmatpush1.bf16.msra.mxu0 %v9090_v42  ;;  %3125 = vmatpush1.bf16.msra.mxu1 %v9093_v43  ;;  %v654_v42 = vpack.c.bf16 %v604_v41, %v603_v40  ;;  %v605_v43 = vld [vmem:[%s9811_s29 + $0xe0] sm:$0xff] }
  0xd4   : > { %2740 = vmatprep.subr.bf16.mxu0 %v9098_v44  ;;  %3126 = vmatprep.subr.bf16.mxu1 %v9101_v45  ;;  %v606_v44 = vld [vmem:[%s9811_s29 + $0xe8] sm:$0xff] }
  0xd5   : > { %7540 = vmatmul.mubr.msk.bf16.gmra.mrb[16].mxu0 %vm1157_vm2, %v645_v46  ;;  %7556 = vmatmul.mubr.msk.bf16.gmra.mrb[16].mxu1 %vm1157_vm2, %v645_v46  ;;  %v655_v45 = vpack.c.bf16 %v606_v44, %v605_v43  ;;  %v607_v46 = vld [vmem:[%s9811_s29 + $0xf0] sm:$0xff] }
  0xd6   : > { %1288 = vmatprep.mubr.bf16.mxu0 %v9545_v0  ;;  %1481 = vmatprep.mubr.bf16.mxu1 %v9545_v0 }
  0xd7   : > { %2741 = vmatpush1.bf16.msra.mxu0 %v9096_v47  ;;  %3127 = vmatpush1.bf16.msra.mxu1 %v9099_v48  ;;  %v608_v47 = vld [vmem:[%s9811_s29 + $0xf8] sm:$0xff] }
  0xd8   : > { %2742 = vmatprep.subr.bf16.mxu0 %v9104_v49  ;;  %3128 = vmatprep.subr.bf16.mxu1 %v9107_v50  ;;  %v656_v48 = vpack.c.bf16 %v608_v47, %v607_v46  ;;  %v1594_v49 = vlaneseq  ;;  %v9153_v46 = vld [vmem:[%s11615_s5 + $0x228] ss:$16 sps:$4 sm:$0xff]   ;;  %v9158_v47 = vld [vmem:[%s11615_s5 + $0x244] ss:$16 sps:$4 sm:$0xff]  }
  0xda   : > { %v1595_v50 = vshrl.u32 %v1594_v49, 7 }
  0xdb   : > { %2743 = vmatpush1.bf16.msra.mxu0 %v9102_v53  ;;  %3129 = vmatpush1.bf16.msra.mxu1 %v9105_v54  ;;  %v1592_v53 = vld [vmem:[%s11614_s4] sm:$0xf] }
  0xdc   : > { %2744 = vmatprep.subr.bf16.mxu0 %v9110_v55  ;;  %3130 = vmatprep.subr.bf16.mxu1 %v9113_v56  ;;  %v10103_v51 = vsub.s32 0, %v1595_v50  ;;  %v10105_v52 = vsub.s32 2, %v1595_v50  ;;  %v10110_v54 = vsub.s32 1, %v1595_v50  ;;  %v10112_v55 = vsub.s32 3, %v1595_v50  ;;  %v9161_v50 = vld [vmem:[%s11615_s5 + $0x24c] ss:$16 sps:$4 sm:$0xff]  }
  0xdd   : > { %7541 = vmatmul.mubr.msk.bf16.gmra.mrb[20].mxu0 %vm1157_vm2, %v646_v57  ;;  %7557 = vmatmul.mubr.msk.bf16.gmra.mrb[20].mxu1 %vm1157_vm2, %v646_v57 }
  0xde   : > { %1298 = vmatprep.mubr.bf16.mxu0 %v9545_v0  ;;  %1491 = vmatprep.mubr.bf16.mxu1 %v9545_v0  ;;  %v10115_v56 = vrot.slane %v1592_v53, %v10103_v51  ;;  %v10118_v57 = vrot.slane %v1592_v53, %v10105_v52 }
  0xdf   : > { %2745 = vmatpush1.bf16.msra.mxu0 %v9108_v58  ;;  %3131 = vmatpush1.bf16.msra.mxu1 %v9111_v59  ;;  %v10121_v58 = vrot.slane %v1592_v53, %v10110_v54  ;;  %v10124_v59 = vrot.slane %v1592_v53, %v10112_v55 }
  0xe0   : > { %2746 = vmatprep.subr.bf16.mxu0 %v9116_v60  ;;  %3132 = vmatprep.subr.bf16.mxu1 %v9119_v61 }
  0xe3   : > { %2747 = vmatpush1.bf16.msra.mxu0 %v9114_v1  ;;  %3133 = vmatpush1.bf16.msra.mxu1 %v9117_v2 }
  0xe4   : > { %2748 = vmatprep.subr.bf16.mxu0 %v9122_v3  ;;  %3134 = vmatprep.subr.bf16.mxu1 %v9125_v4 }
  0xe5   : > { %7542 = vmatmul.mubr.msk.bf16.gmra.mrb[24].mxu0 %vm1157_vm2, %v647_v5  ;;  %7558 = vmatmul.mubr.msk.bf16.gmra.mrb[24].mxu1 %vm1157_vm2, %v647_v5 }
  0xe6   : > { %1308 = vmatprep.mubr.bf16.mxu0 %v9545_v0  ;;  %1501 = vmatprep.mubr.bf16.mxu1 %v9545_v0 }
  0xe7   : > { %2749 = vmatpush1.bf16.msra.mxu0 %v9120_v6  ;;  %3135 = vmatpush1.bf16.msra.mxu1 %v9123_v7 }
  0xe8   : > { %2750 = vmatprep.subr.bf16.mxu0 %v9128_v8  ;;  %3136 = vmatprep.subr.bf16.mxu1 %v9131_v9 }
  0xeb   : > { %2751 = vmatpush1.bf16.msra.mxu0 %v9126_v12  ;;  %3137 = vmatpush1.bf16.msra.mxu1 %v9129_v13 }
  0xec   : > { %2752 = vmatprep.subr.bf16.mxu0 %v9134_v14  ;;  %3138 = vmatprep.subr.bf16.mxu1 %v9137_v15 }
  0xed   : > { %7543 = vmatmul.mubr.msk.bf16.gmra.mrb[28].mxu0 %vm1157_vm2, %v648_v16  ;;  %7559 = vmatmul.mubr.msk.bf16.gmra.mrb[28].mxu1 %vm1157_vm2, %v648_v16 }
  0xee   : > { %1318 = vmatprep.mubr.bf16.mxu0 %v9545_v0  ;;  %1511 = vmatprep.mubr.bf16.mxu1 %v9545_v0 }
  0xef   : > { %2753 = vmatpush1.bf16.msra.mxu0 %v9132_v17  ;;  %3139 = vmatpush1.bf16.msra.mxu1 %v9135_v18 }
  0xf0   : > { %2754 = vmatprep.subr.bf16.mxu0 %v9140_v32  ;;  %3140 = vmatprep.subr.bf16.mxu1 %v9143_v33  ;;  %v9152_v33 = vld [vmem:[%s11615_s5 + $0x224] ss:$16 sps:$4 sm:$0xff]  }
  0xf3   : > { %2755 = vmatpush1.bf16.msra.mxu0 %v9138_v35  ;;  %3141 = vmatpush1.bf16.msra.mxu1 %v9141_v36 }
  0xf4   : > { %2917 = vmatprep.subr.bf16.mxu0 %v9146_v38  ;;  %3303 = vmatprep.subr.bf16.mxu1 %v9149_v39 }
  0xf5   : > { %7544 = vmatmul.mubr.msk.bf16.gmra.mrb[32].mxu0 %vm1157_vm2, %v649_v21  ;;  %7560 = vmatmul.mubr.msk.bf16.gmra.mrb[32].mxu1 %vm1157_vm2, %v649_v21 }
  0xf6   : > { %1328 = vmatprep.mubr.bf16.mxu0 %v9545_v0  ;;  %1521 = vmatprep.mubr.bf16.mxu1 %v9545_v0 }
  0xfd   : > { %7545 = vmatmul.mubr.msk.bf16.gmra.mrb[36].mxu0 %vm1157_vm2, %v650_v24  ;;  %7561 = vmatmul.mubr.msk.bf16.gmra.mrb[36].mxu1 %vm1157_vm2, %v650_v24 }
  0xfe   : > { %1338 = vmatprep.mubr.bf16.mxu0 %v9545_v0  ;;  %1531 = vmatprep.mubr.bf16.mxu1 %v9545_v0 }
 0x105   : > { %7546 = vmatmul.mubr.msk.bf16.gmra.mrb[40].mxu0 %vm1157_vm2, %v651_v27  ;;  %7562 = vmatmul.mubr.msk.bf16.gmra.mrb[40].mxu1 %vm1157_vm2, %v651_v27  ;;  %v9147_v27 = vld [vmem:[%s11615_s5 + $0x208] ss:$16 sps:$4 sm:$0xff]  }
 0x106   : > { %1348 = vmatprep.mubr.bf16.mxu0 %v9545_v0  ;;  %1541 = vmatprep.mubr.bf16.mxu1 %v9545_v0 }
 0x10d   : > { %7547 = vmatmul.mubr.msk.bf16.gmra.mrb[44].mxu0 %vm1157_vm2, %v652_v30  ;;  %7563 = vmatmul.mubr.msk.bf16.gmra.mrb[44].mxu1 %vm1157_vm2, %v652_v30 }
 0x10e   : > { %1358 = vmatprep.mubr.bf16.mxu0 %v9545_v0  ;;  %1551 = vmatprep.mubr.bf16.mxu1 %v9545_v0 }
 0x115   : > { %7548 = vmatmul.mubr.msk.bf16.gmra.mrb[48].mxu0 %vm1157_vm2, %v653_v37  ;;  %7564 = vmatmul.mubr.msk.bf16.gmra.mrb[48].mxu1 %vm1157_vm2, %v653_v37 }
 0x116   : > { %1368 = vmatprep.mubr.bf16.mxu0 %v9545_v0  ;;  %1561 = vmatprep.mubr.bf16.mxu1 %v9545_v0 }
 0x11d   : > { %7549 = vmatmul.mubr.msk.bf16.gmra.mrb[52].mxu0 %vm1157_vm2, %v654_v42  ;;  %7565 = vmatmul.mubr.msk.bf16.gmra.mrb[52].mxu1 %vm1157_vm2, %v654_v42 }
 0x11e   : > { %1378 = vmatprep.mubr.bf16.mxu0 %v9545_v0  ;;  %1571 = vmatprep.mubr.bf16.mxu1 %v9545_v0 }
 0x125   : > { %7550 = vmatmul.mubr.msk.bf16.gmra.mrb[56].mxu0 %vm1157_vm2, %v655_v45  ;;  %7566 = vmatmul.mubr.msk.bf16.gmra.mrb[56].mxu1 %vm1157_vm2, %v655_v45  ;;  %v9150_v45 = vld [vmem:[%s11615_s5 + $0x220] ss:$16 sps:$4 sm:$0xff]  }
 0x126   : > { %1388 = vmatprep.mubr.bf16.mxu0 %v9545_v0  ;;  %1581 = vmatprep.mubr.bf16.mxu1 %v9545_v0 }
 0x12d   : > { %7551 = vmatmul.mubr.msk.bf16.gmra.mrb[60].mxu0 %vm1157_vm2, %v656_v48  ;;  %7567 = vmatmul.mubr.msk.bf16.gmra.mrb[60].mxu1 %vm1157_vm2, %v656_v48 }
 0x188   : > { %v1240_v60 = vpop.f32.mrb[0].mxu0  ;;  %v1433_v61 = vpop.f32.mrb[0].mxu1 }
 0x189   : > { %v1614_v62 = vadd.f32 %v10115_v56, %v1240_v60  ;;  %v1616_v63 = vadd.f32 %v10118_v57, %v1433_v61  ;;  %v1242_v1 = vpop.f32.mrb[1].mxu0  ;;  %v1435_v2 = vpop.f32.mrb[1].mxu1 }
 0x18a   : > { %v1615_v3 = vadd.f32 %v10121_v58, %v1242_v1  ;;  %v1617_v4 = vadd.f32 %v10124_v59, %v1435_v2  ;;  %v1244_v5 = vpop.f32.mrb[2].mxu0  ;;  %v1437_v6 = vpop.f32.mrb[2].mxu1 }
 0x18b   : > { %v1618_v7 = vadd.f32 %v10115_v56, %v1244_v5  ;;  %v1620_v8 = vadd.f32 %v10118_v57, %v1437_v6  ;;  %v1246_v9 = vpop.f32.mrb[3].mxu0  ;;  %v1439_v10 = vpop.f32.mrb[3].mxu1  ;;  %v1742_v13 = vmax.f32 %v1614_v62, 0.0  ;;  %v1744_v14 = vmax.f32 %v1616_v63, 0.0 }
 0x18c   : > { %v1619_v11 = vadd.f32 %v10121_v58, %v1246_v9  ;;  %v1621_v12 = vadd.f32 %v10124_v59, %v1439_v10  ;;  %v1743_v17 = vmax.f32 %v1615_v3, 0.0  ;;  %v1745_v19 = vmax.f32 %v1617_v4, 0.0 }
 0x18d   : > { %v1746_v15 = vmax.f32 %v1618_v7, 0.0  ;;  %v1748_v16 = vmax.f32 %v1620_v8, 0.0  ;;  %v9156_v7 = vld [vmem:[%s11615_s5 + $0x240] ss:$16 sps:$4 sm:$0xff]   ;;  %v9159_v8 = vld [vmem:[%s11615_s5 + $0x248] ss:$16 sps:$4 sm:$0xff]  }
 0x18e   : > { %v1747_v18 = vmax.f32 %v1619_v11, 0.0  ;;  %v1749_v20 = vmax.f32 %v1621_v12, 0.0 }
 0x18f   : > { %v1870_v21 = vpack.c.bf16 %v1746_v15, %v1742_v13  ;;  %v10134_v22 = vpack.c.bf16 %v1748_v16, %v1744_v14  ;;  %v9164_v14 = vld [vmem:[%s11615_s5 + $0x264] ss:$16 sps:$4 sm:$0xff]   ;;  %v9167_v15 = vld [vmem:[%s11615_s5 + $0x26c] ss:$16 sps:$4 sm:$0xff]  }
 0x190   : > { %v1250_v23 = vpop.f32.mrb[4].mxu0  ;;  %v1443_v24 = vpop.f32.mrb[4].mxu1  ;;  %v1871_v25 = vpack.c.bf16 %v1747_v18, %v1743_v17  ;;  %v10142_v28 = vpack.c.bf16 %v1749_v20, %v1745_v19 }
 0x191   : > { %v1622_v29 = vadd.f32 %v10115_v56, %v1250_v23  ;;  %v1624_v30 = vadd.f32 %v10118_v57, %v1443_v24  ;;  %v1252_v31 = vpop.f32.mrb[5].mxu0  ;;  %v1445_v32 = vpop.f32.mrb[5].mxu1 }
 0x192   : > { %v1623_v35 = vadd.f32 %v10121_v58, %v1252_v31  ;;  %v1625_v36 = vadd.f32 %v10124_v59, %v1445_v32  ;;  %v1254_v37 = vpop.f32.mrb[6].mxu0  ;;  %v1447_v38 = vpop.f32.mrb[6].mxu1  ;;  %2756 = vmatprep.mubr.bf16.mxu0 %v1871_v25  ;;  %3142 = vmatprep.mubr.bf16.mxu1 %v1871_v25 }
 0x193   : > { %v1626_v39 = vadd.f32 %v10115_v56, %v1254_v37  ;;  %v1628_v40 = vadd.f32 %v10118_v57, %v1447_v38  ;;  %v1256_v41 = vpop.f32.mrb[7].mxu0  ;;  %v1449_v42 = vpop.f32.mrb[7].mxu1  ;;  %2757 = vmatmul.mubr.bf16.vlgmr.msra.gmra.mrb[64].mxu0 %v1870_v21  ;;  %3143 = vmatmul.mubr.bf16.vlgmr.msra.gmra.mrb[64].mxu1 %v1870_v21  ;;  %v1750_v48 = vmax.f32 %v1622_v29, 0.0  ;;  %v1752_v53 = vmax.f32 %v1624_v30, 0.0  ;;  %v9165_v29 = vld [vmem:[%s11615_s5 + $0x268] ss:$16 sps:$4 sm:$0xff]  }
 0x194   : > { %v1627_v43 = vadd.f32 %v10121_v58, %v1256_v41  ;;  %v1629_v44 = vadd.f32 %v10124_v59, %v1449_v42  ;;  %2918 = vmatpush1.bf16.msra.mxu0 %v9144_v26  ;;  %3304 = vmatpush1.bf16.msra.mxu1 %v9147_v27  ;;  %v1751_v61 = vmax.f32 %v1623_v35, 0.0  ;;  %v1753_v63 = vmax.f32 %v1625_v36, 0.0  ;;  %v9162_v27 = vld [vmem:[%s11615_s5 + $0x260] ss:$16 sps:$4 sm:$0xff]   ;;  %v9170_v30 = vld [vmem:[%s11615_s5 + $0x284] ss:$16 sps:$4 sm:$0xff]  }
 0x195   : > { %v1754_v49 = vmax.f32 %v1626_v39, 0.0  ;;  %2919 = vmatprep.subr.bf16.mxu0 %v9152_v33  ;;  %3305 = vmatprep.subr.bf16.mxu1 %v9155_v34  ;;  %v1756_v60 = vmax.f32 %v1628_v40, 0.0  ;;  %v9173_v33 = vld [vmem:[%s11615_s5 + $0x28c] ss:$16 sps:$4 sm:$0xff]  }
 0x196   : > { %v1755_v62 = vmax.f32 %v1627_v43, 0.0  ;;  %v1757_v1 = vmax.f32 %v1629_v44, 0.0 }
 0x197   : > { %v1874_v2 = vpack.c.bf16 %v1754_v49, %v1750_v48  ;;  %v10170_v3 = vpack.c.bf16 %v1756_v60, %v1752_v53  ;;  %v9176_v60 = vld [vmem:[%s11615_s5 + $0x2a4] ss:$16 sps:$4 sm:$0xff]  }
 0x198   : > { %v1260_v4 = vpop.f32.mrb[8].mxu0  ;;  %v1453_v5 = vpop.f32.mrb[8].mxu1  ;;  %v1875_v6 = vpack.c.bf16 %v1755_v62, %v1751_v61  ;;  %2920 = vmatpush1.bf16.msra.mxu0 %v9150_v45  ;;  %3306 = vmatpush1.bf16.msra.mxu1 %v9153_v46  ;;  %v10178_v9 = vpack.c.bf16 %v1757_v1, %v1753_v63  ;;  %v9168_v45 = vld [vmem:[%s11615_s5 + $0x280] ss:$16 sps:$4 sm:$0xff]   ;;  %v9171_v46 = vld [vmem:[%s11615_s5 + $0x288] ss:$16 sps:$4 sm:$0xff]  }
 0x199   : > { %v1630_v10 = vadd.f32 %v10115_v56, %v1260_v4  ;;  %v1632_v11 = vadd.f32 %v10118_v57, %v1453_v5  ;;  %v1262_v12 = vpop.f32.mrb[9].mxu0  ;;  %v1455_v13 = vpop.f32.mrb[9].mxu1  ;;  %2921 = vmatprep.subr.bf16.mxu0 %v9158_v47  ;;  %3307 = vmatprep.subr.bf16.mxu1 %v9161_v50  ;;  %v9179_v61 = vld [vmem:[%s11615_s5 + $0x2ac] ss:$16 sps:$4 sm:$0xff]  }
 0x19a   : > { %v1631_v16 = vadd.f32 %v10121_v58, %v1262_v12  ;;  %v1633_v17 = vadd.f32 %v10124_v59, %v1455_v13  ;;  %v1264_v18 = vpop.f32.mrb[10].mxu0  ;;  %v1457_v19 = vpop.f32.mrb[10].mxu1  ;;  %2766 = vmatprep.mubr.bf16.mxu0 %v1875_v6  ;;  %3152 = vmatprep.mubr.bf16.mxu1 %v1875_v6  ;;  %v9177_v12 = vld [vmem:[%s11615_s5 + $0x2a8] ss:$16 sps:$4 sm:$0xff]   ;;  %v9182_v13 = vld [vmem:[%s11615_s5 + $0x2c4] ss:$16 sps:$4 sm:$0xff]  }
 0x19b   : > { %v1634_v20 = vadd.f32 %v10115_v56, %v1264_v18  ;;  %v1636_v21 = vadd.f32 %v10118_v57, %v1457_v19  ;;  %v1266_v23 = vpop.f32.mrb[11].mxu0  ;;  %v1459_v24 = vpop.f32.mrb[11].mxu1  ;;  %2767 = vmatmul.mubr.bf16.gmra.mrb[68].mxu0 %v1874_v2  ;;  %3153 = vmatmul.mubr.bf16.gmra.mrb[68].mxu1 %v1874_v2  ;;  %v1758_v31 = vmax.f32 %v1630_v10, 0.0  ;;  %v1760_v34 = vmax.f32 %v1632_v11, 0.0  ;;  %v9174_v11 = vld [vmem:[%s11615_s5 + $0x2a0] ss:$16 sps:$4 sm:$0xff]  }
 0x19c   : > { %v1635_v25 = vadd.f32 %v10121_v58, %v1266_v23  ;;  %v1637_v26 = vadd.f32 %v10124_v59, %v1459_v24  ;;  %2922 = vmatpush1.bf16.msra.mxu0 %v9156_v7  ;;  %3308 = vmatpush1.bf16.msra.mxu1 %v9159_v8  ;;  %v1759_v36 = vmax.f32 %v1631_v16, 0.0  ;;  %v1761_v38 = vmax.f32 %v1633_v17, 0.0  ;;  %v9185_v16 = vld [vmem:[%s11615_s5 + $0x2cc] ss:$16 sps:$4 sm:$0xff]  }
 0x19d   : > { %v1762_v32 = vmax.f32 %v1634_v20, 0.0  ;;  %2923 = vmatprep.subr.bf16.mxu0 %v9164_v14  ;;  %3309 = vmatprep.subr.bf16.mxu1 %v9167_v15  ;;  %v1764_v35 = vmax.f32 %v1636_v21, 0.0 }
 0x19e   : > { %v1763_v37 = vmax.f32 %v1635_v25, 0.0  ;;  %v1765_v39 = vmax.f32 %v1637_v26, 0.0 }
 0x19f   : > { %v1878_v40 = vpack.c.bf16 %v1762_v32, %v1758_v31  ;;  %v10206_v41 = vpack.c.bf16 %v1764_v35, %v1760_v34  ;;  %v9183_v31 = vld [vmem:[%s11615_s5 + $0x2c8] ss:$16 sps:$4 sm:$0xff]  }
 0x1a0   : > { %v1270_v42 = vpop.f32.mrb[12].mxu0  ;;  %v1463_v43 = vpop.f32.mrb[12].mxu1  ;;  %v1879_v44 = vpack.c.bf16 %v1763_v37, %v1759_v36  ;;  %2924 = vmatpush1.bf16.msra.mxu0 %v9162_v27  ;;  %3310 = vmatpush1.bf16.msra.mxu1 %v9165_v29  ;;  %v10214_v47 = vpack.c.bf16 %v1765_v39, %v1761_v38  ;;  %v9188_v37 = vld [vmem:[%s11615_s5 + $0x2e4] ss:$16 sps:$4 sm:$0xff]   ;;  %v9191_v38 = vld [vmem:[%s11615_s5 + $0x2ec] ss:$16 sps:$4 sm:$0xff]  }
 0x1a1   : > { %v1638_v48 = vadd.f32 %v10115_v56, %v1270_v42  ;;  %v1640_v49 = vadd.f32 %v10118_v57, %v1463_v43  ;;  %v1272_v50 = vpop.f32.mrb[13].mxu0  ;;  %v1465_v53 = vpop.f32.mrb[13].mxu1  ;;  %2925 = vmatprep.subr.bf16.mxu0 %v9170_v30  ;;  %3311 = vmatprep.subr.bf16.mxu1 %v9173_v33  ;;  %v9180_v30 = vld [vmem:[%s11615_s5 + $0x2c0] ss:$16 sps:$4 sm:$0xff]  }
 0x1a2   : > { %v1639_v62 = vadd.f32 %v10121_v58, %v1272_v50  ;;  %v1641_v63 = vadd.f32 %v10124_v59, %v1465_v53  ;;  %v1274_v1 = vpop.f32.mrb[14].mxu0  ;;  %v1467_v2 = vpop.f32.mrb[14].mxu1  ;;  %2776 = vmatprep.mubr.bf16.mxu0 %v1879_v44  ;;  %3162 = vmatprep.mubr.bf16.mxu1 %v1879_v44  ;;  %v9186_v53 = vld [vmem:[%s11615_s5 + $0x2e0] ss:$16 sps:$4 sm:$0xff]  }
 0x1a3   : > { %v1642_v4 = vadd.f32 %v10115_v56, %v1274_v1  ;;  %v1644_v5 = vadd.f32 %v10118_v57, %v1467_v2  ;;  %v1276_v6 = vpop.f32.mrb[15].mxu0  ;;  %v1469_v7 = vpop.f32.mrb[15].mxu1  ;;  %2777 = vmatmul.mubr.bf16.gmra.mrb[72].mxu0 %v1878_v40  ;;  %3163 = vmatmul.mubr.bf16.gmra.mrb[72].mxu1 %v1878_v40  ;;  %v1766_v14 = vmax.f32 %v1638_v48, 0.0  ;;  %v1768_v17 = vmax.f32 %v1640_v49, 0.0  ;;  %v9197_v1 = vld [vmem:[%s11615_s5 + $0x30c] ss:$16 sps:$4 sm:$0xff]  }
 0x1a4   : > { %v1643_v8 = vadd.f32 %v10121_v58, %v1276_v6  ;;  %v1645_v10 = vadd.f32 %v10124_v59, %v1469_v7  ;;  %2926 = vmatpush1.bf16.msra.mxu0 %v9168_v45  ;;  %3312 = vmatpush1.bf16.msra.mxu1 %v9171_v46  ;;  %v1767_v19 = vmax.f32 %v1639_v62, 0.0  ;;  %v1769_v21 = vmax.f32 %v1641_v63, 0.0 }
 0x1a5   : > { %v1770_v15 = vmax.f32 %v1642_v4, 0.0  ;;  %2927 = vmatprep.subr.bf16.mxu0 %v9176_v60  ;;  %3313 = vmatprep.subr.bf16.mxu1 %v9179_v61  ;;  %v1772_v18 = vmax.f32 %v1644_v5, 0.0  ;;  %v9189_v60 = vld [vmem:[%s11615_s5 + $0x2e8] ss:$16 sps:$4 sm:$0xff]   ;;  %v9194_v61 = vld [vmem:[%s11615_s5 + $0x304] ss:$16 sps:$4 sm:$0xff]  }
 0x1a6   : > { %v1771_v20 = vmax.f32 %v1643_v8, 0.0  ;;  %v1773_v23 = vmax.f32 %v1645_v10, 0.0 }
 0x1a7   : > { %v1882_v24 = vpack.c.bf16 %v1770_v15, %v1766_v14  ;;  %v10242_v25 = vpack.c.bf16 %v1772_v18, %v1768_v17  ;;  %v9192_v15 = vld [vmem:[%s11615_s5 + $0x300] ss:$16 sps:$4 sm:$0xff]  }
 0x1a8   : > { %v1280_v26 = vpop.f32.mrb[16].mxu0  ;;  %v1473_v27 = vpop.f32.mrb[16].mxu1  ;;  %v1883_v29 = vpack.c.bf16 %v1771_v20, %v1767_v19  ;;  %2928 = vmatpush1.bf16.msra.mxu0 %v9174_v11  ;;  %3314 = vmatpush1.bf16.msra.mxu1 %v9177_v12  ;;  %v10250_v32 = vpack.c.bf16 %v1773_v23, %v1769_v21  ;;  %v9200_v23 = vld [vmem:[%s11615_s5 + $0x324] ss:$16 sps:$4 sm:$0xff]  }
 0x1a9   : > { %v1646_v33 = vadd.f32 %v10115_v56, %v1280_v26  ;;  %v1648_v34 = vadd.f32 %v10118_v57, %v1473_v27  ;;  %v1282_v35 = vpop.f32.mrb[17].mxu0  ;;  %v1475_v36 = vpop.f32.mrb[17].mxu1  ;;  %2929 = vmatprep.subr.bf16.mxu0 %v9182_v13  ;;  %3315 = vmatprep.subr.bf16.mxu1 %v9185_v16  ;;  %v9195_v16 = vld [vmem:[%s11615_s5 + $0x308] ss:$16 sps:$4 sm:$0xff]  }
 0x1aa   : > { %v1647_v39 = vadd.f32 %v10121_v58, %v1282_v35  ;;  %v1649_v40 = vadd.f32 %v10124_v59, %v1475_v36  ;;  %v1284_v42 = vpop.f32.mrb[18].mxu0  ;;  %v1477_v43 = vpop.f32.mrb[18].mxu1  ;;  %2786 = vmatprep.mubr.bf16.mxu0 %v1883_v29  ;;  %3172 = vmatprep.mubr.bf16.mxu1 %v1883_v29 }
 0x1ab   : > { %v1650_v44 = vadd.f32 %v10115_v56, %v1284_v42  ;;  %v1652_v45 = vadd.f32 %v10118_v57, %v1477_v43  ;;  %v1286_v46 = vpop.f32.mrb[19].mxu0  ;;  %v1479_v48 = vpop.f32.mrb[19].mxu1  ;;  %2787 = vmatmul.mubr.bf16.gmra.mrb[76].mxu0 %v1882_v24  ;;  %3173 = vmatmul.mubr.bf16.gmra.mrb[76].mxu1 %v1882_v24  ;;  %v1774_v62 = vmax.f32 %v1646_v33, 0.0  ;;  %v1776_v2 = vmax.f32 %v1648_v34, 0.0  ;;  %v9203_v24 = vld [vmem:[%s11615_s5 + $0x32c] ss:$16 sps:$4 sm:$0xff]  }
 0x1ac   : > { %v1651_v49 = vadd.f32 %v10121_v58, %v1286_v46  ;;  %v1653_v50 = vadd.f32 %v10124_v59, %v1479_v48  ;;  %2930 = vmatpush1.bf16.msra.mxu0 %v9180_v30  ;;  %3316 = vmatpush1.bf16.msra.mxu1 %v9183_v31  ;;  %v1775_v5 = vmax.f32 %v1647_v39, 0.0  ;;  %v1777_v7 = vmax.f32 %v1649_v40, 0.0  ;;  %v9201_v39 = vld [vmem:[%s11615_s5 + $0x328] ss:$16 sps:$4 sm:$0xff]   ;;  %v9206_v40 = vld [vmem:[%s11615_s5 + $0x344] ss:$16 sps:$4 sm:$0xff]  }
 0x1ad   : > { %v1778_v63 = vmax.f32 %v1650_v44, 0.0  ;;  %2931 = vmatprep.subr.bf16.mxu0 %v9188_v37  ;;  %3317 = vmatprep.subr.bf16.mxu1 %v9191_v38  ;;  %v1780_v4 = vmax.f32 %v1652_v45, 0.0  ;;  %v9198_v38 = vld [vmem:[%s11615_s5 + $0x320] ss:$16 sps:$4 sm:$0xff]   ;;  %v9209_v44 = vld [vmem:[%s11615_s5 + $0x34c] ss:$16 sps:$4 sm:$0xff]  }
 0x1ae   : > { %v1779_v6 = vmax.f32 %v1651_v49, 0.0  ;;  %v1781_v8 = vmax.f32 %v1653_v50, 0.0 }
 0x1af   : > { %v1886_v10 = vpack.c.bf16 %v1778_v63, %v1774_v62  ;;  %v10278_v11 = vpack.c.bf16 %v1780_v4, %v1776_v2  ;;  %v9204_v2 = vld [vmem:[%s11615_s5 + $0x340] ss:$16 sps:$4 sm:$0xff]   ;;  %v9207_v4 = vld [vmem:[%s11615_s5 + $0x348] ss:$16 sps:$4 sm:$0xff]  }
 0x1b0   : > { %v1290_v12 = vpop.f32.mrb[20].mxu0  ;;  %v1483_v13 = vpop.f32.mrb[20].mxu1  ;;  %v1887_v14 = vpack.c.bf16 %v1779_v6, %v1775_v5  ;;  %2932 = vmatpush1.bf16.msra.mxu0 %v9186_v53  ;;  %3318 = vmatpush1.bf16.msra.mxu1 %v9189_v60  ;;  %v10286_v17 = vpack.c.bf16 %v1781_v8, %v1777_v7 }
 0x1b1   : > { %v1654_v18 = vadd.f32 %v10115_v56, %v1290_v12  ;;  %v1656_v19 = vadd.f32 %v10118_v57, %v1483_v13  ;;  %v1292_v20 = vpop.f32.mrb[21].mxu0  ;;  %v1485_v21 = vpop.f32.mrb[21].mxu1  ;;  %2933 = vmatprep.subr.bf16.mxu0 %v9194_v61  ;;  %3319 = vmatprep.subr.bf16.mxu1 %v9197_v1  ;;  %v9212_v12 = vld [vmem:[%s11615_s5 + $0x364] ss:$16 sps:$4 sm:$0xff]   ;;  %v9215_v13 = vld [vmem:[%s11615_s5 + $0x36c] ss:$16 sps:$4 sm:$0xff]  }
 0x1b2   : > { %v1655_v26 = vadd.f32 %v10121_v58, %v1292_v20  ;;  %v1657_v27 = vadd.f32 %v10124_v59, %v1485_v21  ;;  %v1294_v29 = vpop.f32.mrb[22].mxu0  ;;  %v1487_v30 = vpop.f32.mrb[22].mxu1  ;;  %2796 = vmatprep.mubr.bf16.mxu0 %v1887_v14  ;;  %3182 = vmatprep.mubr.bf16.mxu1 %v1887_v14 }
 0x1b3   : > { %v1658_v31 = vadd.f32 %v10115_v56, %v1294_v29  ;;  %v1660_v33 = vadd.f32 %v10118_v57, %v1487_v30  ;;  %v1296_v34 = vpop.f32.mrb[23].mxu0  ;;  %v1489_v35 = vpop.f32.mrb[23].mxu1  ;;  %2797 = vmatmul.mubr.bf16.gmra.mrb[80].mxu0 %v1886_v10  ;;  %3183 = vmatmul.mubr.bf16.gmra.mrb[80].mxu1 %v1886_v10  ;;  %v1782_v42 = vmax.f32 %v1654_v18, 0.0  ;;  %v1784_v45 = vmax.f32 %v1656_v19, 0.0  ;;  %v9213_v29 = vld [vmem:[%s11615_s5 + $0x368] ss:$16 sps:$4 sm:$0xff]  }
 0x1b4   : > { %v1659_v36 = vadd.f32 %v10121_v58, %v1296_v34  ;;  %v1661_v37 = vadd.f32 %v10124_v59, %v1489_v35  ;;  %2934 = vmatpush1.bf16.msra.mxu0 %v9192_v15  ;;  %3320 = vmatpush1.bf16.msra.mxu1 %v9195_v16  ;;  %v1783_v48 = vmax.f32 %v1655_v26, 0.0  ;;  %v1785_v50 = vmax.f32 %v1657_v27, 0.0  ;;  %v9210_v27 = vld [vmem:[%s11615_s5 + $0x360] ss:$16 sps:$4 sm:$0xff]   ;;  %v9218_v30 = vld [vmem:[%s11615_s5 + $0x384] ss:$16 sps:$4 sm:$0xff]  }
 0x1b5   : > { %v1786_v43 = vmax.f32 %v1658_v31, 0.0  ;;  %2935 = vmatprep.subr.bf16.mxu0 %v9200_v23  ;;  %3321 = vmatprep.subr.bf16.mxu1 %v9203_v24  ;;  %v1788_v46 = vmax.f32 %v1660_v33, 0.0  ;;  %v9221_v34 = vld [vmem:[%s11615_s5 + $0x38c] ss:$16 sps:$4 sm:$0xff]  }
 0x1b6   : > { %v1787_v49 = vmax.f32 %v1659_v36, 0.0  ;;  %v1789_v53 = vmax.f32 %v1661_v37, 0.0 }
 0x1b7   : > { %v1890_v60 = vpack.c.bf16 %v1786_v43, %v1782_v42  ;;  %v10314_v61 = vpack.c.bf16 %v1788_v46, %v1784_v45 }
 0x1b8   : > { %v1300_v62 = vpop.f32.mrb[24].mxu0  ;;  %v1493_v63 = vpop.f32.mrb[24].mxu1  ;;  %v1891_v1 = vpack.c.bf16 %v1787_v49, %v1783_v48  ;;  %2936 = vmatpush1.bf16.msra.mxu0 %v9198_v38  ;;  %3322 = vmatpush1.bf16.msra.mxu1 %v9201_v39  ;;  %v10322_v5 = vpack.c.bf16 %v1789_v53, %v1785_v50  ;;  %v9216_v48 = vld [vmem:[%s11615_s5 + $0x380] ss:$16 sps:$4 sm:$0xff]   ;;  %v9219_v49 = vld [vmem:[%s11615_s5 + $0x388] ss:$16 sps:$4 sm:$0xff]  }
 0x1b9   : > { %v1662_v6 = vadd.f32 %v10115_v56, %v1300_v62  ;;  %v1664_v7 = vadd.f32 %v10118_v57, %v1493_v63  ;;  %v1302_v8 = vpop.f32.mrb[25].mxu0  ;;  %v1495_v10 = vpop.f32.mrb[25].mxu1  ;;  %2937 = vmatprep.subr.bf16.mxu0 %v9206_v40  ;;  %3323 = vmatprep.subr.bf16.mxu1 %v9209_v44 }
 0x1ba   : > { %v1663_v14 = vadd.f32 %v10121_v58, %v1302_v8  ;;  %v1665_v15 = vadd.f32 %v10124_v59, %v1495_v10  ;;  %v1304_v16 = vpop.f32.mrb[26].mxu0  ;;  %v1497_v18 = vpop.f32.mrb[26].mxu1  ;;  %2806 = vmatprep.mubr.bf16.mxu0 %v1891_v1  ;;  %3192 = vmatprep.mubr.bf16.mxu1 %v1891_v1  ;;  %v9224_v1 = vld [vmem:[%s11615_s5 + $0x3a4] ss:$16 sps:$4 sm:$0xff]  }
 0x1bb   : > { %v1666_v19 = vadd.f32 %v10115_v56, %v1304_v16  ;;  %v1668_v20 = vadd.f32 %v10118_v57, %v1497_v18  ;;  %v1306_v21 = vpop.f32.mrb[27].mxu0  ;;  %v1499_v23 = vpop.f32.mrb[27].mxu1  ;;  %2807 = vmatmul.mubr.bf16.gmra.mrb[84].mxu0 %v1890_v60  ;;  %3193 = vmatmul.mubr.bf16.gmra.mrb[84].mxu1 %v1890_v60  ;;  %v1790_v31 = vmax.f32 %v1662_v6, 0.0  ;;  %v1792_v35 = vmax.f32 %v1664_v7, 0.0  ;;  %v9222_v18 = vld [vmem:[%s11615_s5 + $0x3a0] ss:$16 sps:$4 sm:$0xff]  }
 0x1bc   : > { %v1667_v24 = vadd.f32 %v10121_v58, %v1306_v21  ;;  %v1669_v26 = vadd.f32 %v10124_v59, %v1499_v23  ;;  %2938 = vmatpush1.bf16.msra.mxu0 %v9204_v2  ;;  %3324 = vmatpush1.bf16.msra.mxu1 %v9207_v4  ;;  %v1791_v37 = vmax.f32 %v1663_v14, 0.0  ;;  %v1793_v39 = vmax.f32 %v1665_v15, 0.0  ;;  %v9227_v2 = vld [vmem:[%s11615_s5 + $0x3ac] ss:$16 sps:$4 sm:$0xff]  }
 0x1bd   : > { %v1794_v33 = vmax.f32 %v1666_v19, 0.0  ;;  %2939 = vmatprep.subr.bf16.mxu0 %v9212_v12  ;;  %3325 = vmatprep.subr.bf16.mxu1 %v9215_v13  ;;  %v1796_v36 = vmax.f32 %v1668_v20, 0.0  ;;  %v9225_v19 = vld [vmem:[%s11615_s5 + $0x3a8] ss:$16 sps:$4 sm:$0xff]   ;;  %v9230_v20 = vld [vmem:[%s11615_s5 + $0x3c4] ss:$16 sps:$4 sm:$0xff]  }
 0x1be   : > { %v1795_v38 = vmax.f32 %v1667_v24, 0.0  ;;  %v1797_v40 = vmax.f32 %v1669_v26, 0.0  ;;  %v9233_v24 = vld [vmem:[%s11615_s5 + $0x3cc] ss:$16 sps:$4 sm:$0xff]  }
 0x1bf   : > { %v1894_v42 = vpack.c.bf16 %v1794_v33, %v1790_v31  ;;  %v10350_v43 = vpack.c.bf16 %v1796_v36, %v1792_v35 }
 0x1c0   : > { %v1310_v44 = vpop.f32.mrb[28].mxu0  ;;  %v1503_v45 = vpop.f32.mrb[28].mxu1  ;;  %v1895_v46 = vpack.c.bf16 %v1795_v38, %v1791_v37  ;;  %2940 = vmatpush1.bf16.msra.mxu0 %v9210_v27  ;;  %3326 = vmatpush1.bf16.msra.mxu1 %v9213_v29  ;;  %v10358_v50 = vpack.c.bf16 %v1797_v40, %v1793_v39  ;;  %v9228_v39 = vld [vmem:[%s11615_s5 + $0x3c0] ss:$16 sps:$4 sm:$0xff]   ;;  %v9231_v40 = vld [vmem:[%s11615_s5 + $0x3c8] ss:$16 sps:$4 sm:$0xff]  }
 0x1c1   : > { %v1670_v53 = vadd.f32 %v10115_v56, %v1310_v44  ;;  %v1672_v60 = vadd.f32 %v10118_v57, %v1503_v45  ;;  %v1312_v62 = vpop.f32.mrb[29].mxu0  ;;  %v1505_v63 = vpop.f32.mrb[29].mxu1  ;;  %2941 = vmatprep.subr.bf16.mxu0 %v9218_v30  ;;  %3327 = vmatprep.subr.bf16.mxu1 %v9221_v34 }
 0x1c2   : > { %v1671_v4 = vadd.f32 %v10121_v58, %v1312_v62  ;;  %v1673_v6 = vadd.f32 %v10124_v59, %v1505_v63  ;;  %v1314_v7 = vpop.f32.mrb[30].mxu0  ;;  %v1507_v8 = vpop.f32.mrb[30].mxu1  ;;  %2816 = vmatprep.mubr.bf16.mxu0 %v1895_v46  ;;  %3202 = vmatprep.mubr.bf16.mxu1 %v1895_v46 }
 0x1c3   : > { %v1674_v10 = vadd.f32 %v10115_v56, %v1314_v7  ;;  %v1676_v12 = vadd.f32 %v10118_v57, %v1507_v8  ;;  %v1316_v13 = vpop.f32.mrb[31].mxu0  ;;  %v1509_v14 = vpop.f32.mrb[31].mxu1  ;;  %2817 = vmatmul.mubr.bf16.gmra.mrb[88].mxu0 %v1894_v42  ;;  %3203 = vmatmul.mubr.bf16.gmra.mrb[88].mxu1 %v1894_v42  ;;  %v1798_v21 = vmax.f32 %v1670_v53, 0.0  ;;  %v1800_v26 = vmax.f32 %v1672_v60, 0.0  ;;  %v9239_v53 = vld [vmem:[%s11615_s5 + $0x3ec] ss:$16 sps:$4 sm:$0xff]  }
 0x1c4   : > { %v1675_v15 = vadd.f32 %v10121_v58, %v1316_v13  ;;  %v1677_v16 = vadd.f32 %v10124_v59, %v1509_v14  ;;  %2942 = vmatpush1.bf16.msra.mxu0 %v9216_v48  ;;  %3328 = vmatpush1.bf16.msra.mxu1 %v9219_v49  ;;  %v1799_v29 = vmax.f32 %v1671_v4, 0.0  ;;  %v1801_v31 = vmax.f32 %v1673_v6, 0.0  ;;  %v9236_v49 = vld [vmem:[%s11615_s5 + $0x3e4] ss:$16 sps:$4 sm:$0xff]   ;;  %v9237_v13 = vld [vmem:[%s11615_s5 + $0x3e8] ss:$16 sps:$4 sm:$0xff]  }
 0x1c5   : > { %v1802_v23 = vmax.f32 %v1674_v10, 0.0  ;;  %2943 = vmatprep.subr.bf16.mxu0 %v9224_v1  ;;  %3329 = vmatprep.subr.bf16.mxu1 %v9227_v2  ;;  %v1804_v27 = vmax.f32 %v1676_v12, 0.0  ;;  %v9234_v12 = vld [vmem:[%s11615_s5 + $0x3e0] ss:$16 sps:$4 sm:$0xff]  }
 0x1c6   : > { %v1803_v30 = vmax.f32 %v1675_v15, 0.0  ;;  %v1805_v33 = vmax.f32 %v1677_v16, 0.0 }
 0x1c7   : > { %v1898_v34 = vpack.c.bf16 %v1802_v23, %v1798_v21  ;;  %v10386_v35 = vpack.c.bf16 %v1804_v27, %v1800_v26 }
 0x1c8   : > { %v1320_v36 = vpop.f32.mrb[32].mxu0  ;;  %v1513_v37 = vpop.f32.mrb[32].mxu1  ;;  %v1899_v38 = vpack.c.bf16 %v1803_v30, %v1799_v29  ;;  %2944 = vmatpush1.bf16.msra.mxu0 %v9222_v18  ;;  %3330 = vmatpush1.bf16.msra.mxu1 %v9225_v19  ;;  %v10394_v42 = vpack.c.bf16 %v1805_v33, %v1801_v31 }
 0x1c9   : > { %v1678_v44 = vadd.f32 %v10115_v56, %v1320_v36  ;;  %v1680_v45 = vadd.f32 %v10118_v57, %v1513_v37  ;;  %v1322_v46 = vpop.f32.mrb[33].mxu0  ;;  %v1515_v48 = vpop.f32.mrb[33].mxu1  ;;  %2945 = vmatprep.subr.bf16.mxu0 %v9230_v20  ;;  %3331 = vmatprep.subr.bf16.mxu1 %v9233_v24 }
 0x1ca   : > { %v1679_v60 = vadd.f32 %v10121_v58, %v1322_v46  ;;  %v1681_v62 = vadd.f32 %v10124_v59, %v1515_v48  ;;  %v1324_v63 = vpop.f32.mrb[34].mxu0  ;;  %v1517_v1 = vpop.f32.mrb[34].mxu1  ;;  %2826 = vmatprep.mubr.bf16.mxu0 %v1899_v38  ;;  %3212 = vmatprep.mubr.bf16.mxu1 %v1899_v38 }
 0x1cb   : > { %v1682_v2 = vadd.f32 %v10115_v56, %v1324_v63  ;;  %v1684_v4 = vadd.f32 %v10118_v57, %v1517_v1  ;;  %v1326_v6 = vpop.f32.mrb[35].mxu0  ;;  %v1519_v7 = vpop.f32.mrb[35].mxu1  ;;  %2827 = vmatmul.mubr.bf16.gmra.mrb[92].mxu0 %v1898_v34  ;;  %3213 = vmatmul.mubr.bf16.gmra.mrb[92].mxu1 %v1898_v34  ;;  %v1806_v14 = vmax.f32 %v1678_v44, 0.0  ;;  %v1808_v16 = vmax.f32 %v1680_v45, 0.0 }
 0x1cc   : > { %v1683_v8 = vadd.f32 %v10121_v58, %v1326_v6  ;;  %v1685_v10 = vadd.f32 %v10124_v59, %v1519_v7  ;;  %2946 = vmatpush1.bf16.msra.mxu0 %v9228_v39  ;;  %3332 = vmatpush1.bf16.msra.mxu1 %v9231_v40  ;;  %v1807_v19 = vmax.f32 %v1679_v60, 0.0  ;;  %v1809_v21 = vmax.f32 %v1681_v62, 0.0 }
 0x1cd   : > { %v1810_v15 = vmax.f32 %v1682_v2, 0.0  ;;  %2947 = vmatprep.subr.bf16.mxu0 %v9236_v49  ;;  %3333 = vmatprep.subr.bf16.mxu1 %v9239_v53  ;;  %v1812_v18 = vmax.f32 %v1684_v4, 0.0 }
 0x1ce   : > { %v1811_v20 = vmax.f32 %v1683_v8, 0.0  ;;  %v1813_v23 = vmax.f32 %v1685_v10, 0.0 }
 0x1cf   : > { %v1902_v24 = vpack.c.bf16 %v1810_v15, %v1806_v14  ;;  %v10416_v26 = vpack.c.bf16 %v1812_v18, %v1808_v16 }
 0x1d0   : > { %v1330_v27 = vpop.f32.mrb[36].mxu0  ;;  %v1523_v29 = vpop.f32.mrb[36].mxu1  ;;  %v1903_v30 = vpack.c.bf16 %v1811_v20, %v1807_v19  ;;  %2948 = vmatpush1.bf16.msra.mxu0 %v9234_v12  ;;  %3334 = vmatpush1.bf16.msra.mxu1 %v9237_v13  ;;  %v10418_v31 = vpack.c.bf16 %v1813_v23, %v1809_v21 }
 0x1d1   : > { %v1686_v33 = vadd.f32 %v10115_v56, %v1330_v27  ;;  %v1688_v34 = vadd.f32 %v10118_v57, %v1523_v29  ;;  %v1332_v36 = vpop.f32.mrb[37].mxu0  ;;  %v1525_v37 = vpop.f32.mrb[37].mxu1 }
 0x1d2   : > { %v1687_v38 = vadd.f32 %v10121_v58, %v1332_v36  ;;  %v1689_v39 = vadd.f32 %v10124_v59, %v1525_v37  ;;  %v1334_v40 = vpop.f32.mrb[38].mxu0  ;;  %v1527_v44 = vpop.f32.mrb[38].mxu1  ;;  %2836 = vmatprep.mubr.bf16.mxu0 %v1903_v30  ;;  %3222 = vmatprep.mubr.bf16.mxu1 %v1903_v30 }
 0x1d3   : > { %v1690_v45 = vadd.f32 %v10115_v56, %v1334_v40  ;;  %v1692_v46 = vadd.f32 %v10118_v57, %v1527_v44  ;;  %v1336_v48 = vpop.f32.mrb[39].mxu0  ;;  %v1529_v49 = vpop.f32.mrb[39].mxu1  ;;  %2837 = vmatmul.mubr.bf16.gmra.mrb[96].mxu0 %v1902_v24  ;;  %3223 = vmatmul.mubr.bf16.gmra.mrb[96].mxu1 %v1902_v24  ;;  %v1814_v62 = vmax.f32 %v1686_v33, 0.0  ;;  %v1816_v1 = vmax.f32 %v1688_v34, 0.0 }
 0x1d4   : > { %v1691_v53 = vadd.f32 %v10121_v58, %v1336_v48  ;;  %v1693_v60 = vadd.f32 %v10124_v59, %v1529_v49  ;;  %v1815_v4 = vmax.f32 %v1687_v38, 0.0  ;;  %v1817_v7 = vmax.f32 %v1689_v39, 0.0 }
 0x1d5   : > { %v1818_v63 = vmax.f32 %v1690_v45, 0.0  ;;  %v1820_v2 = vmax.f32 %v1692_v46, 0.0 }
 0x1d6   : > { %v1819_v6 = vmax.f32 %v1691_v53, 0.0  ;;  %v1821_v8 = vmax.f32 %v1693_v60, 0.0 }
 0x1d7   : > { %v1906_v10 = vpack.c.bf16 %v1818_v63, %v1814_v62  ;;  %v10428_v12 = vpack.c.bf16 %v1820_v2, %v1816_v1 }
 0x1d8   : > { %v1340_v13 = vpop.f32.mrb[40].mxu0  ;;  %v1533_v14 = vpop.f32.mrb[40].mxu1  ;;  %v1907_v15 = vpack.c.bf16 %v1819_v6, %v1815_v4  ;;  %v10430_v16 = vpack.c.bf16 %v1821_v8, %v1817_v7 }
 0x1d9   : > { %v1694_v18 = vadd.f32 %v10115_v56, %v1340_v13  ;;  %v1696_v19 = vadd.f32 %v10118_v57, %v1533_v14  ;;  %v1342_v20 = vpop.f32.mrb[41].mxu0  ;;  %v1535_v21 = vpop.f32.mrb[41].mxu1 }
 0x1da   : > { %v1695_v23 = vadd.f32 %v10121_v58, %v1342_v20  ;;  %v1697_v24 = vadd.f32 %v10124_v59, %v1535_v21  ;;  %v1344_v27 = vpop.f32.mrb[42].mxu0  ;;  %v1537_v29 = vpop.f32.mrb[42].mxu1  ;;  %2846 = vmatprep.mubr.bf16.mxu0 %v1907_v15  ;;  %3232 = vmatprep.mubr.bf16.mxu1 %v1907_v15 }
 0x1db   : > { %v1698_v30 = vadd.f32 %v10115_v56, %v1344_v27  ;;  %v1700_v33 = vadd.f32 %v10118_v57, %v1537_v29  ;;  %v1346_v34 = vpop.f32.mrb[43].mxu0  ;;  %v1539_v36 = vpop.f32.mrb[43].mxu1  ;;  %2847 = vmatmul.mubr.bf16.gmra.mrb[100].mxu0 %v1906_v10  ;;  %3233 = vmatmul.mubr.bf16.gmra.mrb[100].mxu1 %v1906_v10  ;;  %v1822_v39 = vmax.f32 %v1694_v18, 0.0  ;;  %v1824_v44 = vmax.f32 %v1696_v19, 0.0 }
 0x1dc   : > { %v1699_v37 = vadd.f32 %v10121_v58, %v1346_v34  ;;  %v1701_v38 = vadd.f32 %v10124_v59, %v1539_v36  ;;  %v1823_v46 = vmax.f32 %v1695_v23, 0.0  ;;  %v1825_v49 = vmax.f32 %v1697_v24, 0.0 }
 0x1dd   : > { %v1826_v40 = vmax.f32 %v1698_v30, 0.0  ;;  %v1828_v45 = vmax.f32 %v1700_v33, 0.0 }
 0x1de   : > { %v1827_v48 = vmax.f32 %v1699_v37, 0.0  ;;  %v1829_v53 = vmax.f32 %v1701_v38, 0.0 }
 0x1df   : > { %v1910_v60 = vpack.c.bf16 %v1826_v40, %v1822_v39  ;;  %v10440_v62 = vpack.c.bf16 %v1828_v45, %v1824_v44 }
 0x1e0   : > { %v1350_v63 = vpop.f32.mrb[44].mxu0  ;;  %v1543_v1 = vpop.f32.mrb[44].mxu1  ;;  %v1911_v2 = vpack.c.bf16 %v1827_v48, %v1823_v46  ;;  %v10442_v4 = vpack.c.bf16 %v1829_v53, %v1825_v49 }
 0x1e1   : > { %v1702_v6 = vadd.f32 %v10115_v56, %v1350_v63  ;;  %v1704_v7 = vadd.f32 %v10118_v57, %v1543_v1  ;;  %v1352_v8 = vpop.f32.mrb[45].mxu0  ;;  %v1545_v10 = vpop.f32.mrb[45].mxu1 }
 0x1e2   : > { %v1703_v13 = vadd.f32 %v10121_v58, %v1352_v8  ;;  %v1705_v14 = vadd.f32 %v10124_v59, %v1545_v10  ;;  %v1354_v15 = vpop.f32.mrb[46].mxu0  ;;  %v1547_v18 = vpop.f32.mrb[46].mxu1  ;;  %2856 = vmatprep.mubr.bf16.mxu0 %v1911_v2  ;;  %3242 = vmatprep.mubr.bf16.mxu1 %v1911_v2 }
 0x1e3   : > { %v1706_v19 = vadd.f32 %v10115_v56, %v1354_v15  ;;  %v1708_v20 = vadd.f32 %v10118_v57, %v1547_v18  ;;  %v1356_v21 = vpop.f32.mrb[47].mxu0  ;;  %v1549_v23 = vpop.f32.mrb[47].mxu1  ;;  %2857 = vmatmul.mubr.bf16.gmra.mrb[104].mxu0 %v1910_v60  ;;  %3243 = vmatmul.mubr.bf16.gmra.mrb[104].mxu1 %v1910_v60  ;;  %v1830_v29 = vmax.f32 %v1702_v6, 0.0  ;;  %v1832_v33 = vmax.f32 %v1704_v7, 0.0 }
 0x1e4   : > { %v1707_v24 = vadd.f32 %v10121_v58, %v1356_v21  ;;  %v1709_v27 = vadd.f32 %v10124_v59, %v1549_v23  ;;  %v1831_v36 = vmax.f32 %v1703_v13, 0.0  ;;  %v1833_v38 = vmax.f32 %v1705_v14, 0.0 }
 0x1e5   : > { %v1834_v30 = vmax.f32 %v1706_v19, 0.0  ;;  %v1836_v34 = vmax.f32 %v1708_v20, 0.0  ;;  %v9240_v20 = vld [vmem:[%s11617_s7 + $0x40] sm:$0xff]  }
 0x1e6   : > { %v1835_v37 = vmax.f32 %v1707_v24, 0.0  ;;  %v1837_v39 = vmax.f32 %v1709_v27, 0.0  ;;  %7928 = vmatprep.subr.bf16.mxu0 %v9240_v20 }
 0x1e7   : > { %v1914_v40 = vpack.c.bf16 %v1834_v30, %v1830_v29  ;;  %v10452_v44 = vpack.c.bf16 %v1836_v34, %v1832_v33 }
 0x1e8   : > { %v1360_v45 = vpop.f32.mrb[48].mxu0  ;;  %v1553_v46 = vpop.f32.mrb[48].mxu1  ;;  %v1915_v48 = vpack.c.bf16 %v1835_v37, %v1831_v36  ;;  %v10454_v49 = vpack.c.bf16 %v1837_v39, %v1833_v38 }
 0x1e9   : > { %v1710_v53 = vadd.f32 %v10115_v56, %v1360_v45  ;;  %v1712_v60 = vadd.f32 %v10118_v57, %v1553_v46  ;;  %v1362_v63 = vpop.f32.mrb[49].mxu0  ;;  %v1555_v1 = vpop.f32.mrb[49].mxu1 }
 0x1ea   : > { %v1711_v2 = vadd.f32 %v10121_v58, %v1362_v63  ;;  %v1713_v6 = vadd.f32 %v10124_v59, %v1555_v1  ;;  %v1364_v7 = vpop.f32.mrb[50].mxu0  ;;  %v1557_v8 = vpop.f32.mrb[50].mxu1  ;;  %2866 = vmatprep.mubr.bf16.mxu0 %v1915_v48  ;;  %3252 = vmatprep.mubr.bf16.mxu1 %v1915_v48 }
 0x1eb   : > { %v1714_v10 = vadd.f32 %v10115_v56, %v1364_v7  ;;  %v1716_v13 = vadd.f32 %v10118_v57, %v1557_v8  ;;  %v1366_v14 = vpop.f32.mrb[51].mxu0  ;;  %v1559_v15 = vpop.f32.mrb[51].mxu1  ;;  %2867 = vmatmul.mubr.bf16.gmra.mrb[108].mxu0 %v1914_v40  ;;  %3253 = vmatmul.mubr.bf16.gmra.mrb[108].mxu1 %v1914_v40  ;;  %v1838_v21 = vmax.f32 %v1710_v53, 0.0  ;;  %v1840_v24 = vmax.f32 %v1712_v60, 0.0 }
 0x1ec   : > { %v1715_v18 = vadd.f32 %v10121_v58, %v1366_v14  ;;  %v1717_v19 = vadd.f32 %v10124_v59, %v1559_v15  ;;  %v1839_v29 = vmax.f32 %v1711_v2, 0.0  ;;  %v1841_v33 = vmax.f32 %v1713_v6, 0.0  ;;  %v9242_v14 = vld [vmem:[%s11617_s7 + $0xc0] sm:$0xff]  }
 0x1ed   : > { %v1842_v23 = vmax.f32 %v1714_v10, 0.0  ;;  %v1844_v27 = vmax.f32 %v1716_v13, 0.0  ;;  %8040 = vmatprep.subr.bf16.mxu1 %v9242_v14 }
 0x1ee   : > { %v1843_v30 = vmax.f32 %v1715_v18, 0.0  ;;  %v1845_v34 = vmax.f32 %v1717_v19, 0.0 }
 0x1ef   : > { %v1918_v36 = vpack.c.bf16 %v1842_v23, %v1838_v21  ;;  %v10467_v37 = vpack.c.bf16 %v1844_v27, %v1840_v24 }
 0x1f0   : > { %v1370_v38 = vpop.f32.mrb[52].mxu0  ;;  %v1563_v39 = vpop.f32.mrb[52].mxu1  ;;  %v1919_v40 = vpack.c.bf16 %v1843_v30, %v1839_v29  ;;  %v10469_v45 = vpack.c.bf16 %v1845_v34, %v1841_v33 }
 0x1f1   : > { %v1718_v46 = vadd.f32 %v10115_v56, %v1370_v38  ;;  %v1720_v48 = vadd.f32 %v10118_v57, %v1563_v39  ;;  %v1372_v53 = vpop.f32.mrb[53].mxu0  ;;  %v1565_v60 = vpop.f32.mrb[53].mxu1 }
 0x1f2   : > { %v1719_v63 = vadd.f32 %v10121_v58, %v1372_v53  ;;  %v1721_v1 = vadd.f32 %v10124_v59, %v1565_v60  ;;  %v1374_v2 = vpop.f32.mrb[54].mxu0  ;;  %v1567_v6 = vpop.f32.mrb[54].mxu1  ;;  %2876 = vmatprep.mubr.bf16.mxu0 %v1919_v40  ;;  %3262 = vmatprep.mubr.bf16.mxu1 %v1919_v40 }
 0x1f3   : > { %v1722_v7 = vadd.f32 %v10115_v56, %v1374_v2  ;;  %v1724_v8 = vadd.f32 %v10118_v57, %v1567_v6  ;;  %v1376_v10 = vpop.f32.mrb[55].mxu0  ;;  %v1569_v13 = vpop.f32.mrb[55].mxu1  ;;  %2877 = vmatmul.mubr.bf16.gmra.mrb[112].mxu0 %v1918_v36  ;;  %3263 = vmatmul.mubr.bf16.gmra.mrb[112].mxu1 %v1918_v36  ;;  %v1846_v19 = vmax.f32 %v1718_v46, 0.0  ;;  %v1848_v21 = vmax.f32 %v1720_v48, 0.0 }
 0x1f4   : > { %v1723_v15 = vadd.f32 %v10121_v58, %v1376_v10  ;;  %v1725_v18 = vadd.f32 %v10124_v59, %v1569_v13  ;;  %v1847_v24 = vmax.f32 %v1719_v63, 0.0  ;;  %v1849_v29 = vmax.f32 %v1721_v1, 0.0 }
 0x1f5   : > { %v1850_v20 = vmax.f32 %v1722_v7, 0.0  ;;  %v1852_v23 = vmax.f32 %v1724_v8, 0.0 }
 0x1f6   : > { %v1851_v27 = vmax.f32 %v1723_v15, 0.0  ;;  %v1853_v30 = vmax.f32 %v1725_v18, 0.0 }
 0x1f7   : > { %v1922_v33 = vpack.c.bf16 %v1850_v20, %v1846_v19  ;;  %v10482_v34 = vpack.c.bf16 %v1852_v23, %v1848_v21 }
 0x1f8   : > { %v1380_v36 = vpop.f32.mrb[56].mxu0  ;;  %v1573_v38 = vpop.f32.mrb[56].mxu1  ;;  %v1923_v39 = vpack.c.bf16 %v1851_v27, %v1847_v24  ;;  %v10484_v40 = vpack.c.bf16 %v1853_v30, %v1849_v29 }
 0x1f9   : > { %v1726_v53 = vadd.f32 %v10115_v56, %v1380_v36  ;;  %v1728_v46 = vadd.f32 %v10118_v57, %v1573_v38  ;;  %v1382_v60 = vpop.f32.mrb[57].mxu0  ;;  %v1575_v2 = vpop.f32.mrb[57].mxu1 }
 0x1fa   : > { %v1727_v48 = vadd.f32 %v10121_v58, %v1382_v60  ;;  %v1729_v63 = vadd.f32 %v10124_v59, %v1575_v2  ;;  %v1384_v1 = vpop.f32.mrb[58].mxu0  ;;  %v1577_v6 = vpop.f32.mrb[58].mxu1  ;;  %2886 = vmatprep.mubr.bf16.mxu0 %v1923_v39  ;;  %3272 = vmatprep.mubr.bf16.mxu1 %v1923_v39 }
 0x1fb   : > { %v1730_v7 = vadd.f32 %v10115_v56, %v1384_v1  ;;  %v1732_v8 = vadd.f32 %v10118_v57, %v1577_v6  ;;  %v1386_v10 = vpop.f32.mrb[59].mxu0  ;;  %v1579_v13 = vpop.f32.mrb[59].mxu1  ;;  %2887 = vmatmul.mubr.bf16.gmra.mrb[116].mxu0 %v1922_v33  ;;  %3273 = vmatmul.mubr.bf16.gmra.mrb[116].mxu1 %v1922_v33  ;;  %v1854_v18 = vmax.f32 %v1726_v53, 0.0  ;;  %v1856_v20 = vmax.f32 %v1728_v46, 0.0 }
 0x1fc   : > { %v1731_v14 = vadd.f32 %v10121_v58, %v1386_v10  ;;  %v1733_v15 = vadd.f32 %v10124_v59, %v1579_v13  ;;  %v1855_v23 = vmax.f32 %v1727_v48, 0.0  ;;  %v1857_v27 = vmax.f32 %v1729_v63, 0.0 }
 0x1fd   : > { %v1858_v19 = vmax.f32 %v1730_v7, 0.0  ;;  %v1860_v21 = vmax.f32 %v1732_v8, 0.0 }
 0x1fe   : > { %v1859_v24 = vmax.f32 %v1731_v14, 0.0  ;;  %v1861_v29 = vmax.f32 %v1733_v15, 0.0 }
 0x1ff   : > { %v1926_v30 = vpack.c.bf16 %v1858_v19, %v1854_v18  ;;  %v10494_v36 = vpack.c.bf16 %v1860_v21, %v1856_v20 }
 0x200   : > { %v1390_v38 = vpop.f32.mrb[60].mxu0  ;;  %v1583_v39 = vpop.f32.mrb[60].mxu1  ;;  %v1927_v60 = vpack.c.bf16 %v1859_v24, %v1855_v23  ;;  %v10496_v2 = vpack.c.bf16 %v1861_v29, %v1857_v27 }
 0x201   : > { %v1734_v33 = vadd.f32 %v10115_v56, %v1390_v38  ;;  %v1736_v1 = vadd.f32 %v10118_v57, %v1583_v39  ;;  %v1392_v53 = vpop.f32.mrb[61].mxu0  ;;  %v1585_v6 = vpop.f32.mrb[61].mxu1 }
 0x202   : > { %v1735_v46 = vadd.f32 %v10121_v58, %v1392_v53  ;;  %v1737_v48 = vadd.f32 %v10124_v59, %v1585_v6  ;;  %v1394_v63 = vpop.f32.mrb[62].mxu0  ;;  %v1587_v7 = vpop.f32.mrb[62].mxu1  ;;  %2896 = vmatprep.mubr.bf16.mxu0 %v1927_v60  ;;  %3282 = vmatprep.mubr.bf16.mxu1 %v1927_v60  ;;  %v9249_v53 = vld [vmem:[%s11617_s7 + $0x10] sm:$0xff]  }
 0x203   : > { %v1738_v8 = vadd.f32 %v10115_v56, %v1394_v63  ;;  %v1740_v10 = vadd.f32 %v10118_v57, %v1587_v7  ;;  %v1396_v13 = vpop.f32.mrb[63].mxu0  ;;  %v1589_v14 = vpop.f32.mrb[63].mxu1  ;;  %2897 = vmatmul.mubr.bf16.gmra.mrb[120].mxu0 %v1926_v30  ;;  %3283 = vmatmul.mubr.bf16.gmra.mrb[120].mxu1 %v1926_v30  ;;  %v1862_v19 = vmax.f32 %v1734_v33, 0.0  ;;  %v1864_v21 = vmax.f32 %v1736_v1, 0.0  ;;  %v9244_v30 = vld [vmem:[%s11617_s7 + $0x48] sm:$0xff]   ;;  %v9251_v6 = vld [vmem:[%s11617_s7 + $0x90] sm:$0xff]  }
 0x204   : > { %v1739_v15 = vadd.f32 %v10121_v58, %v1396_v13  ;;  %v1741_v18 = vadd.f32 %v10124_v59, %v1589_v14  ;;  %v1863_v24 = vmax.f32 %v1735_v46, 0.0  ;;  %v1865_v29 = vmax.f32 %v1737_v48, 0.0  ;;  %v9241_v58 = vld [vmem:[%s11617_s7] sm:$0xff]   ;;  %v9246_v33 = vld [vmem:[%s11617_s7 + $0xc8] sm:$0xff]   ;;  %v9252_v46 = vld [vmem:[%s11617_s7 + $0x58] sm:$0xff]  }
 0x205   : > { %v1866_v20 = vmax.f32 %v1738_v8, 0.0  ;;  %v1868_v23 = vmax.f32 %v1740_v10, 0.0  ;;  %v9243_v59 = vld [vmem:[%s11617_s7 + $0x80] sm:$0xff]   ;;  %v9247_v1 = vld [vmem:[%s11617_s7 + $0x88] sm:$0xff]   ;;  %v9254_v48 = vld [vmem:[%s11617_s7 + $0xd8] sm:$0xff]  }
 0x206   : > { %v1867_v27 = vmax.f32 %v1739_v15, 0.0  ;;  %v1869_v38 = vmax.f32 %v1741_v18, 0.0  ;;  %v9253_v63 = vld [vmem:[%s11617_s7 + $0x18] sm:$0xff]   ;;  %v9257_v8 = vld [vmem:[%s11617_s7 + $0x20] sm:$0xff]   ;;  %v9260_v13 = vld [vmem:[%s11617_s7 + $0x68] sm:$0xff]  }
 0x207   : > { %v1930_v39 = vpack.c.bf16 %v1866_v20, %v1862_v19  ;;  %v10506_v56 = vpack.c.bf16 %v1868_v23, %v1864_v21  ;;  %v9255_v7 = vld [vmem:[%s11617_s7 + $0x98] sm:$0xff]   ;;  %v9259_v10 = vld [vmem:[%s11617_s7 + $0xa0] sm:$0xff]   ;;  %v9262_v14 = vld [vmem:[%s11617_s7 + $0xe8] sm:$0xff]  }
 0x208   : > { %v1931_v57 = vpack.c.bf16 %v1867_v27, %v1863_v24  ;;  %v10508_v60 = vpack.c.bf16 %v1869_v38, %v1865_v29  ;;  %v9261_v15 = vld [vmem:[%s11617_s7 + $0x28] sm:$0xff]   ;;  %v9265_v19 = vld [vmem:[%s11617_s7 + $0x30] sm:$0xff]   ;;  %v9268_v21 = vld [vmem:[%s11617_s7 + $0x78] sm:$0xff]  }
 0x209   : > { %v9263_v18 = vld [vmem:[%s11617_s7 + $0xa8] sm:$0xff]   ;;  %v9267_v20 = vld [vmem:[%s11617_s7 + $0xb0] sm:$0xff]   ;;  %v9270_v23 = vld [vmem:[%s11617_s7 + $0xf8] sm:$0xff]  }
 0x20a   : > { %2906 = vmatprep.mubr.bf16.mxu0 %v1931_v57  ;;  %3292 = vmatprep.mubr.bf16.mxu1 %v1931_v57  ;;  %v9269_v24 = vld [vmem:[%s11617_s7 + $0x38] sm:$0xff]  }
 0x20b   : > { %2907 = vmatmul.mubr.bf16.gmra.mrb[124].mxu0 %v1930_v39  ;;  %3293 = vmatmul.mubr.bf16.gmra.mrb[124].mxu1 %v1930_v39  ;;  %v9271_v27 = vld [vmem:[%s11617_s7 + $0xb8] sm:$0xff]  }
 0x20c   : > { %2949 = vmatprep.mubr.bf16.mxu0 %v10142_v28  ;;  %3335 = vmatprep.mubr.bf16.mxu1 %v10142_v28  ;;  %v9245_v28 = vld [vmem:[%s11617_s7 + $0x8] sm:$0xff]  }
 0x213   : > { %2950 = vmatmul.mubr.bf16.vlgmr.msra.gmra.mrb[64].mxu0 %v10134_v22  ;;  %3336 = vmatmul.mubr.bf16.vlgmr.msra.gmra.mrb[64].mxu1 %v10134_v22  ;;  %v9248_v22 = vld [vmem:[%s11617_s7 + $0x50] sm:$0xff]  }
 0x214   : > { %2959 = vmatprep.mubr.bf16.mxu0 %v10178_v9  ;;  %3345 = vmatprep.mubr.bf16.mxu1 %v10178_v9  ;;  %v9250_v9 = vld [vmem:[%s11617_s7 + $0xd0] sm:$0xff]  }
 0x215   : > { %7929 = vmatpush3.bf16.msra.mxu0 %v9241_v58  ;;  %8041 = vmatpush3.bf16.msra.mxu1 %v9243_v59 }
 0x216   : > { %7930 = vmatprep.subr.bf16.mxu0 %v9244_v30  ;;  %8042 = vmatprep.subr.bf16.mxu1 %v9246_v33 }
 0x219   : > { %7931 = vmatpush3.bf16.msra.mxu0 %v9245_v28  ;;  %8043 = vmatpush3.bf16.msra.mxu1 %v9247_v1 }
 0x21a   : > { %7932 = vmatprep.subr.bf16.mxu0 %v9248_v22  ;;  %8044 = vmatprep.subr.bf16.mxu1 %v9250_v9 }
 0x21b   : > { %2960 = vmatmul.mubr.bf16.gmra.mrb[68].mxu0 %v10170_v3  ;;  %3346 = vmatmul.mubr.bf16.gmra.mrb[68].mxu1 %v10170_v3  ;;  %v9256_v3 = vld [vmem:[%s11617_s7 + $0x60] sm:$0xff]  }
 0x21c   : > { %2969 = vmatprep.mubr.bf16.mxu0 %v10214_v47  ;;  %3355 = vmatprep.mubr.bf16.mxu1 %v10214_v47  ;;  %v9258_v47 = vld [vmem:[%s11617_s7 + $0xe0] sm:$0xff]  }
 0x21d   : > { %7933 = vmatpush3.bf16.msra.mxu0 %v9249_v53  ;;  %8045 = vmatpush3.bf16.msra.mxu1 %v9251_v6  ;;  %v9272_v53 = vld [vmem:[%s11619_s9] ss:$16 sps:$4 sm:$0xff]   ;;  %v9275_v6 = vld [vmem:[%s11619_s9 + $0x8] ss:$16 sps:$4 sm:$0xff]  }
 0x21e   : > { %7934 = vmatprep.subr.bf16.mxu0 %v9252_v46  ;;  %8046 = vmatprep.subr.bf16.mxu1 %v9254_v48 }
 0x221   : > { %7935 = vmatpush3.bf16.msra.mxu0 %v9253_v63  ;;  %8047 = vmatpush3.bf16.msra.mxu1 %v9255_v7 }
 0x222   : > { %7936 = vmatprep.subr.bf16.mxu0 %v9256_v3  ;;  %8048 = vmatprep.subr.bf16.mxu1 %v9258_v47 }
 0x223   : > { %2970 = vmatmul.mubr.bf16.gmra.mrb[72].mxu0 %v10206_v41  ;;  %3356 = vmatmul.mubr.bf16.gmra.mrb[72].mxu1 %v10206_v41  ;;  %v9264_v41 = vld [vmem:[%s11617_s7 + $0x70] sm:$0xff]  }
 0x224   : > { %2979 = vmatprep.mubr.bf16.mxu0 %v10250_v32  ;;  %3365 = vmatprep.mubr.bf16.mxu1 %v10250_v32  ;;  %v9266_v32 = vld [vmem:[%s11617_s7 + $0xf0] sm:$0xff]  }
 0x225   : > { %7937 = vmatpush3.bf16.msra.mxu0 %v9257_v8  ;;  %8049 = vmatpush3.bf16.msra.mxu1 %v9259_v10 }
 0x226   : > { %7938 = vmatprep.subr.bf16.mxu0 %v9260_v13  ;;  %8050 = vmatprep.subr.bf16.mxu1 %v9262_v14 }
 0x229   : > { %7939 = vmatpush3.bf16.msra.mxu0 %v9261_v15  ;;  %8051 = vmatpush3.bf16.msra.mxu1 %v9263_v18 }
 0x22a   : > { %7940 = vmatprep.subr.bf16.mxu0 %v9264_v41  ;;  %8052 = vmatprep.subr.bf16.mxu1 %v9266_v32 }
 0x22b   : > { %2980 = vmatmul.mubr.bf16.gmra.mrb[76].mxu0 %v10242_v25  ;;  %3366 = vmatmul.mubr.bf16.gmra.mrb[76].mxu1 %v10242_v25  ;;  %v9274_v25 = vld [vmem:[%s11619_s9 + $0x4] ss:$16 sps:$4 sm:$0xff]  }
 0x22c   : > { %2989 = vmatprep.mubr.bf16.mxu0 %v10286_v17  ;;  %3375 = vmatprep.mubr.bf16.mxu1 %v10286_v17 }
 0x22d   : > { %7941 = vmatpush3.bf16.msra.mxu0 %v9265_v19  ;;  %8053 = vmatpush3.bf16.msra.mxu1 %v9267_v20 }
 0x22e   : > { %7942 = vmatprep.subr.bf16.mxu0 %v9268_v21  ;;  %8054 = vmatprep.subr.bf16.mxu1 %v9270_v23 }
 0x231   : > { %7943 = vmatpush3.bf16.msra.mxu0 %v9269_v24  ;;  %8055 = vmatpush3.bf16.msra.mxu1 %v9271_v27 }
 0x232   : > { %4383 = vmatprep.subr.bf16.mxu0 %v9274_v25 }
 0x233   : > { %2990 = vmatmul.mubr.bf16.gmra.mrb[80].mxu0 %v10278_v11  ;;  %3376 = vmatmul.mubr.bf16.gmra.mrb[80].mxu1 %v10278_v11  ;;  %v2062_v11 = vld [vmem:[%s11616_s6] sm:$0xf] }
 0x234   : > { %2999 = vmatprep.mubr.bf16.mxu0 %v10322_v5  ;;  %3385 = vmatprep.mubr.bf16.mxu1 %v10322_v5  ;;  %v10671_v17 = vrot.slane %v2062_v11, %v10103_v51  ;;  %v10677_v5 = vrot.slane %v2062_v11, %v10110_v54 }
 0x23b   : > { %3000 = vmatmul.mubr.bf16.gmra.mrb[84].mxu0 %v10314_v61  ;;  %3386 = vmatmul.mubr.bf16.gmra.mrb[84].mxu1 %v10314_v61  ;;  %v10674_v61 = vrot.slane %v2062_v11, %v10105_v52 }
 0x23c   : > { %3009 = vmatprep.mubr.bf16.mxu0 %v10358_v50  ;;  %3395 = vmatprep.mubr.bf16.mxu1 %v10358_v50 }
 0x243   : > { %3010 = vmatmul.mubr.bf16.gmra.mrb[88].mxu0 %v10350_v43  ;;  %3396 = vmatmul.mubr.bf16.gmra.mrb[88].mxu1 %v10350_v43  ;;  %v10680_v43 = vrot.slane %v2062_v11, %v10112_v55 }
 0x244   : > { %3019 = vmatprep.mubr.bf16.mxu0 %v10394_v42  ;;  %3405 = vmatprep.mubr.bf16.mxu1 %v10394_v42 }
 0x24b   : > { %3020 = vmatmul.mubr.bf16.gmra.mrb[92].mxu0 %v10386_v35  ;;  %3406 = vmatmul.mubr.bf16.gmra.mrb[92].mxu1 %v10386_v35 }
 0x24c   : > { %3029 = vmatprep.mubr.bf16.mxu0 %v10418_v31  ;;  %3415 = vmatprep.mubr.bf16.mxu1 %v10418_v31 }
 0x253   : > { %3030 = vmatmul.mubr.bf16.gmra.mrb[96].mxu0 %v10416_v26  ;;  %3416 = vmatmul.mubr.bf16.gmra.mrb[96].mxu1 %v10416_v26 }
 0x254   : > { %3039 = vmatprep.mubr.bf16.mxu0 %v10430_v16  ;;  %3425 = vmatprep.mubr.bf16.mxu1 %v10430_v16 }
 0x25b   : > { %3040 = vmatmul.mubr.bf16.gmra.mrb[100].mxu0 %v10428_v12  ;;  %3426 = vmatmul.mubr.bf16.gmra.mrb[100].mxu1 %v10428_v12 }
 0x25c   : > { %3049 = vmatprep.mubr.bf16.mxu0 %v10442_v4  ;;  %3435 = vmatprep.mubr.bf16.mxu1 %v10442_v4 }
 0x263   : > { %3050 = vmatmul.mubr.bf16.gmra.mrb[104].mxu0 %v10440_v62  ;;  %3436 = vmatmul.mubr.bf16.gmra.mrb[104].mxu1 %v10440_v62 }
 0x264   : > { %3059 = vmatprep.mubr.bf16.mxu0 %v10454_v49  ;;  %3445 = vmatprep.mubr.bf16.mxu1 %v10454_v49 }
 0x26b   : > { %3060 = vmatmul.mubr.bf16.gmra.mrb[108].mxu0 %v10452_v44  ;;  %3446 = vmatmul.mubr.bf16.gmra.mrb[108].mxu1 %v10452_v44 }
 0x26c   : > { %3069 = vmatprep.mubr.bf16.mxu0 %v10469_v45  ;;  %3455 = vmatprep.mubr.bf16.mxu1 %v10469_v45 }
 0x273   : > { %3070 = vmatmul.mubr.bf16.gmra.mrb[112].mxu0 %v10467_v37  ;;  %3456 = vmatmul.mubr.bf16.gmra.mrb[112].mxu1 %v10467_v37 }
 0x274   : > { %3079 = vmatprep.mubr.bf16.mxu0 %v10484_v40  ;;  %3465 = vmatprep.mubr.bf16.mxu1 %v10484_v40 }
 0x27b   : > { %3080 = vmatmul.mubr.bf16.gmra.mrb[116].mxu0 %v10482_v34  ;;  %3466 = vmatmul.mubr.bf16.gmra.mrb[116].mxu1 %v10482_v34 }
 0x27c   : > { %3089 = vmatprep.mubr.bf16.mxu0 %v10496_v2  ;;  %3475 = vmatprep.mubr.bf16.mxu1 %v10496_v2  ;;  %v9277_v2 = vld [vmem:[%s11619_s9 + $0xc] ss:$16 sps:$4 sm:$0xff]  }
 0x27d   : > { %4576 = vmatprep.subr.bf16.mxu1 %v9277_v2 }
 0x283   : > { %3090 = vmatmul.mubr.bf16.gmra.mrb[120].mxu0 %v10494_v36  ;;  %3476 = vmatmul.mubr.bf16.gmra.mrb[120].mxu1 %v10494_v36 }
 0x284   : > { %3099 = vmatprep.mubr.bf16.mxu0 %v10508_v60  ;;  %3485 = vmatprep.mubr.bf16.mxu1 %v10508_v60 }
 0x28b   : > { %3100 = vmatmul.mubr.bf16.gmra.mrb[124].mxu0 %v10506_v56  ;;  %3486 = vmatmul.mubr.bf16.gmra.mrb[124].mxu1 %v10506_v56 }
 0x2e6   : > { %v2951_v50 = vpop.f32.mrb[64].mxu0  ;;  %v3337_v35 = vpop.f32.mrb[64].mxu1 }
 0x2e7   : > { %v8376_v42 = vadd.f32 %v2951_v50, %v10671_v17  ;;  %v8440_v26 = vadd.f32 %v3337_v35, %v10674_v61  ;;  %v2953_v31 = vpop.f32.mrb[65].mxu0  ;;  %v3339_v12 = vpop.f32.mrb[65].mxu1 }
 0x2e8   : > { %v8377_v16 = vadd.f32 %v2953_v31, %v10677_v5  ;;  %v8441_v62 = vadd.f32 %v3339_v12, %v10680_v43  ;;  %v2955_v4 = vpop.f32.mrb[66].mxu0  ;;  %v3341_v44 = vpop.f32.mrb[66].mxu1 }
 0x2e9   : > { %v8378_v49 = vadd.f32 %v2955_v4, %v10671_v17  ;;  %v8442_v37 = vadd.f32 %v3341_v44, %v10674_v61  ;;  %v2957_v45 = vpop.f32.mrb[67].mxu0  ;;  %v3343_v34 = vpop.f32.mrb[67].mxu1  ;;  %v3496_v29 = vmax.f32 %v8376_v42, 0.0  ;;  %v3498_v38 = vmax.f32 %v8440_v26, 0.0 }
 0x2ea   : > { %v8379_v40 = vadd.f32 %v2957_v45, %v10677_v5  ;;  %v8443_v36 = vadd.f32 %v3343_v34, %v10680_v43  ;;  %v3497_v57 = vmax.f32 %v8377_v16, 0.0  ;;  %v3499_v60 = vmax.f32 %v8441_v62, 0.0 }
 0x2eb   : > { %v3500_v39 = vmax.f32 %v8378_v49, 0.0  ;;  %v3502_v56 = vmax.f32 %v8442_v37, 0.0 }
 0x2ec   : > { %v3501_v58 = vmax.f32 %v8379_v40, 0.0  ;;  %v3503_v59 = vmax.f32 %v8443_v36, 0.0 }
 0x2ed   : > { %v3624_v30 = vpack.c.bf16 %v3500_v39, %v3496_v29  ;;  %v3626_v33 = vpack.c.bf16 %v3502_v56, %v3498_v38 }
 0x2ee   : > { %v2961_v28 = vpop.f32.mrb[68].mxu0  ;;  %v3347_v1 = vpop.f32.mrb[68].mxu1  ;;  %v3625_v22 = vpack.c.bf16 %v3501_v58, %v3497_v57  ;;  %v3627_v9 = vpack.c.bf16 %v3503_v59, %v3499_v60 }
 0x2ef   : > { %v8380_v46 = vadd.f32 %v2961_v28, %v10671_v17  ;;  %v8444_v48 = vadd.f32 %v3347_v1, %v10674_v61  ;;  %v2963_v63 = vpop.f32.mrb[69].mxu0  ;;  %v3349_v7 = vpop.f32.mrb[69].mxu1 }
 0x2f0   : > { %v8381_v3 = vadd.f32 %v2963_v63, %v10677_v5  ;;  %v8445_v47 = vadd.f32 %v3349_v7, %v10680_v43  ;;  %v2965_v8 = vpop.f32.mrb[70].mxu0  ;;  %v3351_v10 = vpop.f32.mrb[70].mxu1  ;;  %3983 = vmatprep.mubr.bf16.mxu0 %v3625_v22  ;;  %4144 = vmatprep.mubr.bf16.mxu1 %v3627_v9 }
 0x2f1   : > { %v8382_v13 = vadd.f32 %v2965_v8, %v10671_v17  ;;  %v8446_v14 = vadd.f32 %v3351_v10, %v10674_v61  ;;  %v2967_v15 = vpop.f32.mrb[71].mxu0  ;;  %v3353_v18 = vpop.f32.mrb[71].mxu1  ;;  %3984 = vmatmul.mubr.bf16.vlgmr.msra.gmra.mrb[128].mxu0 %v3624_v30  ;;  %4145 = vmatmul.mubr.bf16.vlgmr.msra.gmra.mrb[128].mxu1 %v3626_v33  ;;  %v3504_v19 = vmax.f32 %v8380_v46, 0.0  ;;  %v3506_v20 = vmax.f32 %v8444_v48, 0.0 }
 0x2f2   : > { %v8383_v41 = vadd.f32 %v2967_v15, %v10677_v5  ;;  %v8447_v32 = vadd.f32 %v3353_v18, %v10680_v43  ;;  %4384 = vmatpush1.bf16.msra.mxu0 %v9272_v53  ;;  %4577 = vmatpush1.bf16.msra.mxu1 %v9275_v6  ;;  %v3505_v24 = vmax.f32 %v8381_v3, 0.0  ;;  %v3507_v27 = vmax.f32 %v8445_v47, 0.0 }
 0x2f3   : > { %v3508_v21 = vmax.f32 %v8382_v13, 0.0  ;;  %v3510_v23 = vmax.f32 %v8446_v14, 0.0 }
 0x2f4   : > { %v3509_v25 = vmax.f32 %v8383_v41, 0.0  ;;  %v3511_v11 = vmax.f32 %v8447_v32, 0.0 }
 0x2f5   : > { %v3628_v50 = vpack.c.bf16 %v3508_v21, %v3504_v19  ;;  %v3630_v35 = vpack.c.bf16 %v3510_v23, %v3506_v20 }
 0x2f6   : > { %v2971_v42 = vpop.f32.mrb[72].mxu0  ;;  %v3357_v26 = vpop.f32.mrb[72].mxu1  ;;  %v3629_v31 = vpack.c.bf16 %v3509_v25, %v3505_v24  ;;  %v3631_v12 = vpack.c.bf16 %v3511_v11, %v3507_v27 }
 0x2f7   : > { %v8384_v16 = vadd.f32 %v2971_v42, %v10671_v17  ;;  %v8448_v62 = vadd.f32 %v3357_v26, %v10674_v61  ;;  %v2973_v4 = vpop.f32.mrb[73].mxu0  ;;  %v3359_v44 = vpop.f32.mrb[73].mxu1 }
 0x2f8   : > { %v8385_v49 = vadd.f32 %v2973_v4, %v10677_v5  ;;  %v8449_v37 = vadd.f32 %v3359_v44, %v10680_v43  ;;  %v2975_v45 = vpop.f32.mrb[74].mxu0  ;;  %v3361_v34 = vpop.f32.mrb[74].mxu1  ;;  %3991 = vmatprep.mubr.bf16.mxu0 %v3629_v31  ;;  %4152 = vmatprep.mubr.bf16.mxu1 %v3631_v12 }
 0x2f9   : > { %v8386_v40 = vadd.f32 %v2975_v45, %v10671_v17  ;;  %v8450_v36 = vadd.f32 %v3361_v34, %v10674_v61  ;;  %v2977_v2 = vpop.f32.mrb[75].mxu0  ;;  %v3363_v29 = vpop.f32.mrb[75].mxu1  ;;  %3992 = vmatmul.mubr.bf16.gmra.mrb[132].mxu0 %v3628_v50  ;;  %4153 = vmatmul.mubr.bf16.gmra.mrb[132].mxu1 %v3630_v35  ;;  %v3512_v56 = vmax.f32 %v8384_v16, 0.0  ;;  %v3514_v57 = vmax.f32 %v8448_v62, 0.0 }
 0x2fa   : > { %v8387_v38 = vadd.f32 %v2977_v2, %v10677_v5  ;;  %v8451_v39 = vadd.f32 %v3363_v29, %v10680_v43  ;;  %v3513_v59 = vmax.f32 %v8385_v49, 0.0  ;;  %v3515_v30 = vmax.f32 %v8449_v37, 0.0 }
 0x2fb   : > { %v3516_v60 = vmax.f32 %v8386_v40, 0.0  ;;  %v3518_v58 = vmax.f32 %v8450_v36, 0.0 }
 0x2fc   : > { %v3517_v33 = vmax.f32 %v8387_v38, 0.0  ;;  %v3519_v28 = vmax.f32 %v8451_v39, 0.0 }
 0x2fd   : > { %v3632_v1 = vpack.c.bf16 %v3516_v60, %v3512_v56  ;;  %v3634_v22 = vpack.c.bf16 %v3518_v58, %v3514_v57 }
 0x2fe   : > { %v2981_v9 = vpop.f32.mrb[76].mxu0  ;;  %v3367_v53 = vpop.f32.mrb[76].mxu1  ;;  %v3633_v6 = vpack.c.bf16 %v3517_v33, %v3513_v59  ;;  %v3635_v46 = vpack.c.bf16 %v3519_v28, %v3515_v30 }
 0x2ff   : > { %v8388_v48 = vadd.f32 %v2981_v9, %v10671_v17  ;;  %v8452_v63 = vadd.f32 %v3367_v53, %v10674_v61  ;;  %v2983_v7 = vpop.f32.mrb[77].mxu0  ;;  %v3369_v3 = vpop.f32.mrb[77].mxu1 }
 0x300   : > { %v8389_v47 = vadd.f32 %v2983_v7, %v10677_v5  ;;  %v8453_v8 = vadd.f32 %v3369_v3, %v10680_v43  ;;  %v2985_v10 = vpop.f32.mrb[78].mxu0  ;;  %v3371_v13 = vpop.f32.mrb[78].mxu1  ;;  %3999 = vmatprep.mubr.bf16.mxu0 %v3633_v6  ;;  %4160 = vmatprep.mubr.bf16.mxu1 %v3635_v46 }
 0x301   : > { %v8390_v14 = vadd.f32 %v2985_v10, %v10671_v17  ;;  %v8454_v15 = vadd.f32 %v3371_v13, %v10674_v61  ;;  %v2987_v18 = vpop.f32.mrb[79].mxu0  ;;  %v3373_v41 = vpop.f32.mrb[79].mxu1  ;;  %4000 = vmatmul.mubr.bf16.gmra.mrb[136].mxu0 %v3632_v1  ;;  %4161 = vmatmul.mubr.bf16.gmra.mrb[136].mxu1 %v3634_v22  ;;  %v3520_v20 = vmax.f32 %v8388_v48, 0.0  ;;  %v3522_v21 = vmax.f32 %v8452_v63, 0.0 }
 0x302   : > { %v8391_v32 = vadd.f32 %v2987_v18, %v10677_v5  ;;  %v8455_v19 = vadd.f32 %v3373_v41, %v10680_v43  ;;  %v3521_v27 = vmax.f32 %v8389_v47, 0.0  ;;  %v3523_v25 = vmax.f32 %v8453_v8, 0.0 }
 0x303   : > { %v3524_v23 = vmax.f32 %v8390_v14, 0.0  ;;  %v3526_v24 = vmax.f32 %v8454_v15, 0.0 }
 0x304   : > { %v3525_v11 = vmax.f32 %v8391_v32, 0.0  ;;  %v3527_v50 = vmax.f32 %v8455_v19, 0.0 }
 0x305   : > { %v3636_v35 = vpack.c.bf16 %v3524_v23, %v3520_v20  ;;  %v3638_v42 = vpack.c.bf16 %v3526_v24, %v3522_v21 }
 0x306   : > { %v2991_v26 = vpop.f32.mrb[80].mxu0  ;;  %v3377_v31 = vpop.f32.mrb[80].mxu1  ;;  %v3637_v12 = vpack.c.bf16 %v3525_v11, %v3521_v27  ;;  %v3639_v16 = vpack.c.bf16 %v3527_v50, %v3523_v25 }
 0x307   : > { %v8392_v62 = vadd.f32 %v2991_v26, %v10671_v17  ;;  %v8456_v4 = vadd.f32 %v3377_v31, %v10674_v61  ;;  %v2993_v44 = vpop.f32.mrb[81].mxu0  ;;  %v3379_v49 = vpop.f32.mrb[81].mxu1 }
 0x308   : > { %v8393_v37 = vadd.f32 %v2993_v44, %v10677_v5  ;;  %v8457_v45 = vadd.f32 %v3379_v49, %v10680_v43  ;;  %v2995_v34 = vpop.f32.mrb[82].mxu0  ;;  %v3381_v40 = vpop.f32.mrb[82].mxu1  ;;  %4007 = vmatprep.mubr.bf16.mxu0 %v3637_v12  ;;  %4168 = vmatprep.mubr.bf16.mxu1 %v3639_v16 }
 0x309   : > { %v8394_v36 = vadd.f32 %v2995_v34, %v10671_v17  ;;  %v8458_v2 = vadd.f32 %v3381_v40, %v10674_v61  ;;  %v2997_v29 = vpop.f32.mrb[83].mxu0  ;;  %v3383_v38 = vpop.f32.mrb[83].mxu1  ;;  %4008 = vmatmul.mubr.bf16.gmra.mrb[140].mxu0 %v3636_v35  ;;  %4169 = vmatmul.mubr.bf16.gmra.mrb[140].mxu1 %v3638_v42  ;;  %v3528_v57 = vmax.f32 %v8392_v62, 0.0  ;;  %v3530_v60 = vmax.f32 %v8456_v4, 0.0 }
 0x30a   : > { %v8395_v39 = vadd.f32 %v2997_v29, %v10677_v5  ;;  %v8459_v56 = vadd.f32 %v3383_v38, %v10680_v43  ;;  %v3529_v30 = vmax.f32 %v8393_v37, 0.0  ;;  %v3531_v33 = vmax.f32 %v8457_v45, 0.0 }
 0x30b   : > { %v3532_v58 = vmax.f32 %v8394_v36, 0.0  ;;  %v3534_v59 = vmax.f32 %v8458_v2, 0.0 }
 0x30c   : > { %v3533_v28 = vmax.f32 %v8395_v39, 0.0  ;;  %v3535_v1 = vmax.f32 %v8459_v56, 0.0 }
 0x30d   : > { %v3640_v22 = vpack.c.bf16 %v3532_v58, %v3528_v57  ;;  %v3642_v9 = vpack.c.bf16 %v3534_v59, %v3530_v60 }
 0x30e   : > { %v3001_v53 = vpop.f32.mrb[84].mxu0  ;;  %v3387_v6 = vpop.f32.mrb[84].mxu1  ;;  %v3641_v46 = vpack.c.bf16 %v3533_v28, %v3529_v30  ;;  %v3643_v48 = vpack.c.bf16 %v3535_v1, %v3531_v33 }
 0x30f   : > { %v8396_v63 = vadd.f32 %v3001_v53, %v10671_v17  ;;  %v8460_v7 = vadd.f32 %v3387_v6, %v10674_v61  ;;  %v3003_v3 = vpop.f32.mrb[85].mxu0  ;;  %v3389_v47 = vpop.f32.mrb[85].mxu1 }
 0x310   : > { %v8397_v8 = vadd.f32 %v3003_v3, %v10677_v5  ;;  %v8461_v10 = vadd.f32 %v3389_v47, %v10680_v43  ;;  %v3005_v13 = vpop.f32.mrb[86].mxu0  ;;  %v3391_v14 = vpop.f32.mrb[86].mxu1  ;;  %4015 = vmatprep.mubr.bf16.mxu0 %v3641_v46  ;;  %4176 = vmatprep.mubr.bf16.mxu1 %v3643_v48 }
 0x311   : > { %v8398_v15 = vadd.f32 %v3005_v13, %v10671_v17  ;;  %v8462_v18 = vadd.f32 %v3391_v14, %v10674_v61  ;;  %v3007_v41 = vpop.f32.mrb[87].mxu0  ;;  %v3393_v32 = vpop.f32.mrb[87].mxu1  ;;  %4016 = vmatmul.mubr.bf16.gmra.mrb[144].mxu0 %v3640_v22  ;;  %4177 = vmatmul.mubr.bf16.gmra.mrb[144].mxu1 %v3642_v9  ;;  %v3536_v21 = vmax.f32 %v8396_v63, 0.0  ;;  %v3538_v23 = vmax.f32 %v8460_v7, 0.0 }
 0x312   : > { %v8399_v19 = vadd.f32 %v3007_v41, %v10677_v5  ;;  %v8463_v20 = vadd.f32 %v3393_v32, %v10680_v43  ;;  %v3537_v25 = vmax.f32 %v8397_v8, 0.0  ;;  %v3539_v11 = vmax.f32 %v8461_v10, 0.0 }
 0x313   : > { %v3540_v24 = vmax.f32 %v8398_v15, 0.0  ;;  %v3542_v27 = vmax.f32 %v8462_v18, 0.0 }
 0x314   : > { %v3541_v50 = vmax.f32 %v8399_v19, 0.0  ;;  %v3543_v35 = vmax.f32 %v8463_v20, 0.0 }
 0x315   : > { %v3644_v42 = vpack.c.bf16 %v3540_v24, %v3536_v21  ;;  %v3646_v26 = vpack.c.bf16 %v3542_v27, %v3538_v23 }
 0x316   : > { %v3011_v31 = vpop.f32.mrb[88].mxu0  ;;  %v3397_v12 = vpop.f32.mrb[88].mxu1  ;;  %v3645_v16 = vpack.c.bf16 %v3541_v50, %v3537_v25  ;;  %v3647_v62 = vpack.c.bf16 %v3543_v35, %v3539_v11 }
 0x317   : > { %v8400_v4 = vadd.f32 %v3011_v31, %v10671_v17  ;;  %v8464_v44 = vadd.f32 %v3397_v12, %v10674_v61  ;;  %v3013_v49 = vpop.f32.mrb[89].mxu0  ;;  %v3399_v37 = vpop.f32.mrb[89].mxu1 }
 0x318   : > { %v8401_v45 = vadd.f32 %v3013_v49, %v10677_v5  ;;  %v8465_v34 = vadd.f32 %v3399_v37, %v10680_v43  ;;  %v3015_v40 = vpop.f32.mrb[90].mxu0  ;;  %v3401_v36 = vpop.f32.mrb[90].mxu1  ;;  %4023 = vmatprep.mubr.bf16.mxu0 %v3645_v16  ;;  %4184 = vmatprep.mubr.bf16.mxu1 %v3647_v62 }
 0x319   : > { %v8402_v2 = vadd.f32 %v3015_v40, %v10671_v17  ;;  %v8466_v29 = vadd.f32 %v3401_v36, %v10674_v61  ;;  %v3017_v38 = vpop.f32.mrb[91].mxu0  ;;  %v3403_v39 = vpop.f32.mrb[91].mxu1  ;;  %4024 = vmatmul.mubr.bf16.gmra.mrb[148].mxu0 %v3644_v42  ;;  %4185 = vmatmul.mubr.bf16.gmra.mrb[148].mxu1 %v3646_v26  ;;  %v3544_v60 = vmax.f32 %v8400_v4, 0.0  ;;  %v3546_v58 = vmax.f32 %v8464_v44, 0.0 }
 0x31a   : > { %v8403_v56 = vadd.f32 %v3017_v38, %v10677_v5  ;;  %v8467_v57 = vadd.f32 %v3403_v39, %v10680_v43  ;;  %v3545_v33 = vmax.f32 %v8401_v45, 0.0  ;;  %v3547_v28 = vmax.f32 %v8465_v34, 0.0 }
 0x31b   : > { %v3548_v59 = vmax.f32 %v8402_v2, 0.0  ;;  %v3550_v30 = vmax.f32 %v8466_v29, 0.0 }
 0x31c   : > { %v3549_v1 = vmax.f32 %v8403_v56, 0.0  ;;  %v3551_v22 = vmax.f32 %v8467_v57, 0.0 }
 0x31d   : > { %v3648_v9 = vpack.c.bf16 %v3548_v59, %v3544_v60  ;;  %v3650_v53 = vpack.c.bf16 %v3550_v30, %v3546_v58 }
 0x31e   : > { %v3021_v6 = vpop.f32.mrb[92].mxu0  ;;  %v3407_v46 = vpop.f32.mrb[92].mxu1  ;;  %v3649_v48 = vpack.c.bf16 %v3549_v1, %v3545_v33  ;;  %v3651_v63 = vpack.c.bf16 %v3551_v22, %v3547_v28 }
 0x31f   : > { %v8404_v7 = vadd.f32 %v3021_v6, %v10671_v17  ;;  %v8468_v3 = vadd.f32 %v3407_v46, %v10674_v61  ;;  %v3023_v47 = vpop.f32.mrb[93].mxu0  ;;  %v3409_v8 = vpop.f32.mrb[93].mxu1 }
 0x320   : > { %v8405_v10 = vadd.f32 %v3023_v47, %v10677_v5  ;;  %v8469_v13 = vadd.f32 %v3409_v8, %v10680_v43  ;;  %v3025_v14 = vpop.f32.mrb[94].mxu0  ;;  %v3411_v15 = vpop.f32.mrb[94].mxu1  ;;  %4031 = vmatprep.mubr.bf16.mxu0 %v3649_v48  ;;  %4192 = vmatprep.mubr.bf16.mxu1 %v3651_v63 }
 0x321   : > { %v8406_v18 = vadd.f32 %v3025_v14, %v10671_v17  ;;  %v8470_v41 = vadd.f32 %v3411_v15, %v10674_v61  ;;  %v3027_v32 = vpop.f32.mrb[95].mxu0  ;;  %v3413_v19 = vpop.f32.mrb[95].mxu1  ;;  %4032 = vmatmul.mubr.bf16.gmra.mrb[152].mxu0 %v3648_v9  ;;  %4193 = vmatmul.mubr.bf16.gmra.mrb[152].mxu1 %v3650_v53  ;;  %v3552_v23 = vmax.f32 %v8404_v7, 0.0  ;;  %v3554_v24 = vmax.f32 %v8468_v3, 0.0 }
 0x322   : > { %v8407_v20 = vadd.f32 %v3027_v32, %v10677_v5  ;;  %v8471_v21 = vadd.f32 %v3413_v19, %v10680_v43  ;;  %v3553_v11 = vmax.f32 %v8405_v10, 0.0  ;;  %v3555_v50 = vmax.f32 %v8469_v13, 0.0 }
 0x323   : > { %v3556_v27 = vmax.f32 %v8406_v18, 0.0  ;;  %v3558_v25 = vmax.f32 %v8470_v41, 0.0 }
 0x324   : > { %v3557_v35 = vmax.f32 %v8407_v20, 0.0  ;;  %v3559_v42 = vmax.f32 %v8471_v21, 0.0 }
 0x325   : > { %v3652_v26 = vpack.c.bf16 %v3556_v27, %v3552_v23  ;;  %v3654_v31 = vpack.c.bf16 %v3558_v25, %v3554_v24 }
 0x326   : > { %v3031_v12 = vpop.f32.mrb[96].mxu0  ;;  %v3417_v16 = vpop.f32.mrb[96].mxu1  ;;  %v3653_v62 = vpack.c.bf16 %v3557_v35, %v3553_v11  ;;  %v3655_v4 = vpack.c.bf16 %v3559_v42, %v3555_v50 }
 0x327   : > { %v8408_v44 = vadd.f32 %v3031_v12, %v10671_v17  ;;  %v8472_v49 = vadd.f32 %v3417_v16, %v10674_v61  ;;  %v3033_v37 = vpop.f32.mrb[97].mxu0  ;;  %v3419_v45 = vpop.f32.mrb[97].mxu1 }
 0x328   : > { %v8409_v34 = vadd.f32 %v3033_v37, %v10677_v5  ;;  %v8473_v40 = vadd.f32 %v3419_v45, %v10680_v43  ;;  %v3035_v36 = vpop.f32.mrb[98].mxu0  ;;  %v3421_v2 = vpop.f32.mrb[98].mxu1  ;;  %4039 = vmatprep.mubr.bf16.mxu0 %v3653_v62  ;;  %4200 = vmatprep.mubr.bf16.mxu1 %v3655_v4 }
 0x329   : > { %v8410_v29 = vadd.f32 %v3035_v36, %v10671_v17  ;;  %v8474_v38 = vadd.f32 %v3421_v2, %v10674_v61  ;;  %v3037_v39 = vpop.f32.mrb[99].mxu0  ;;  %v3423_v56 = vpop.f32.mrb[99].mxu1  ;;  %4040 = vmatmul.mubr.bf16.gmra.mrb[156].mxu0 %v3652_v26  ;;  %4201 = vmatmul.mubr.bf16.gmra.mrb[156].mxu1 %v3654_v31  ;;  %v3560_v58 = vmax.f32 %v8408_v44, 0.0  ;;  %v3562_v59 = vmax.f32 %v8472_v49, 0.0 }
 0x32a   : > { %v8411_v57 = vadd.f32 %v3037_v39, %v10677_v5  ;;  %v8475_v60 = vadd.f32 %v3423_v56, %v10680_v43  ;;  %v3561_v28 = vmax.f32 %v8409_v34, 0.0  ;;  %v3563_v1 = vmax.f32 %v8473_v40, 0.0 }
 0x32b   : > { %v3564_v30 = vmax.f32 %v8410_v29, 0.0  ;;  %v3566_v33 = vmax.f32 %v8474_v38, 0.0 }
 0x32c   : > { %v3565_v22 = vmax.f32 %v8411_v57, 0.0  ;;  %v3567_v9 = vmax.f32 %v8475_v60, 0.0 }
 0x32d   : > { %v3656_v53 = vpack.c.bf16 %v3564_v30, %v3560_v58  ;;  %v3658_v6 = vpack.c.bf16 %v3566_v33, %v3562_v59 }
 0x32e   : > { %v3041_v46 = vpop.f32.mrb[100].mxu0  ;;  %v3427_v48 = vpop.f32.mrb[100].mxu1  ;;  %v3657_v63 = vpack.c.bf16 %v3565_v22, %v3561_v28  ;;  %v3659_v7 = vpack.c.bf16 %v3567_v9, %v3563_v1 }
 0x32f   : > { %v8412_v3 = vadd.f32 %v3041_v46, %v10671_v17  ;;  %v8476_v47 = vadd.f32 %v3427_v48, %v10674_v61  ;;  %v3043_v8 = vpop.f32.mrb[101].mxu0  ;;  %v3429_v10 = vpop.f32.mrb[101].mxu1 }
 0x330   : > { %v8413_v13 = vadd.f32 %v3043_v8, %v10677_v5  ;;  %v8477_v14 = vadd.f32 %v3429_v10, %v10680_v43  ;;  %v3045_v15 = vpop.f32.mrb[102].mxu0  ;;  %v3431_v18 = vpop.f32.mrb[102].mxu1  ;;  %4047 = vmatprep.mubr.bf16.mxu0 %v3657_v63  ;;  %4208 = vmatprep.mubr.bf16.mxu1 %v3659_v7 }
 0x331   : > { %v8414_v41 = vadd.f32 %v3045_v15, %v10671_v17  ;;  %v8478_v32 = vadd.f32 %v3431_v18, %v10674_v61  ;;  %v3047_v19 = vpop.f32.mrb[103].mxu0  ;;  %v3433_v20 = vpop.f32.mrb[103].mxu1  ;;  %4048 = vmatmul.mubr.bf16.gmra.mrb[160].mxu0 %v3656_v53  ;;  %4209 = vmatmul.mubr.bf16.gmra.mrb[160].mxu1 %v3658_v6  ;;  %v3568_v24 = vmax.f32 %v8412_v3, 0.0  ;;  %v3570_v27 = vmax.f32 %v8476_v47, 0.0 }
 0x332   : > { %v8415_v21 = vadd.f32 %v3047_v19, %v10677_v5  ;;  %v8479_v23 = vadd.f32 %v3433_v20, %v10680_v43  ;;  %v3569_v50 = vmax.f32 %v8413_v13, 0.0  ;;  %v3571_v35 = vmax.f32 %v8477_v14, 0.0 }
 0x333   : > { %v3572_v25 = vmax.f32 %v8414_v41, 0.0  ;;  %v3574_v11 = vmax.f32 %v8478_v32, 0.0 }
 0x334   : > { %v3573_v42 = vmax.f32 %v8415_v21, 0.0  ;;  %v3575_v26 = vmax.f32 %v8479_v23, 0.0 }
 0x335   : > { %v3660_v31 = vpack.c.bf16 %v3572_v25, %v3568_v24  ;;  %v3662_v12 = vpack.c.bf16 %v3574_v11, %v3570_v27 }
 0x336   : > { %v3051_v16 = vpop.f32.mrb[104].mxu0  ;;  %v3437_v62 = vpop.f32.mrb[104].mxu1  ;;  %v3661_v4 = vpack.c.bf16 %v3573_v42, %v3569_v50  ;;  %v3663_v44 = vpack.c.bf16 %v3575_v26, %v3571_v35 }
 0x337   : > { %v8416_v49 = vadd.f32 %v3051_v16, %v10671_v17  ;;  %v8480_v37 = vadd.f32 %v3437_v62, %v10674_v61  ;;  %v3053_v45 = vpop.f32.mrb[105].mxu0  ;;  %v3439_v34 = vpop.f32.mrb[105].mxu1 }
 0x338   : > { %v8417_v40 = vadd.f32 %v3053_v45, %v10677_v5  ;;  %v8481_v36 = vadd.f32 %v3439_v34, %v10680_v43  ;;  %v3055_v2 = vpop.f32.mrb[106].mxu0  ;;  %v3441_v29 = vpop.f32.mrb[106].mxu1  ;;  %4055 = vmatprep.mubr.bf16.mxu0 %v3661_v4  ;;  %4216 = vmatprep.mubr.bf16.mxu1 %v3663_v44 }
 0x339   : > { %v8418_v38 = vadd.f32 %v3055_v2, %v10671_v17  ;;  %v8482_v39 = vadd.f32 %v3441_v29, %v10674_v61  ;;  %v3057_v56 = vpop.f32.mrb[107].mxu0  ;;  %v3443_v57 = vpop.f32.mrb[107].mxu1  ;;  %4056 = vmatmul.mubr.bf16.gmra.mrb[164].mxu0 %v3660_v31  ;;  %4217 = vmatmul.mubr.bf16.gmra.mrb[164].mxu1 %v3662_v12  ;;  %v3576_v59 = vmax.f32 %v8416_v49, 0.0  ;;  %v3578_v30 = vmax.f32 %v8480_v37, 0.0 }
 0x33a   : > { %v8419_v60 = vadd.f32 %v3057_v56, %v10677_v5  ;;  %v8483_v58 = vadd.f32 %v3443_v57, %v10680_v43  ;;  %v3577_v1 = vmax.f32 %v8417_v40, 0.0  ;;  %v3579_v22 = vmax.f32 %v8481_v36, 0.0 }
 0x33b   : > { %v3580_v33 = vmax.f32 %v8418_v38, 0.0  ;;  %v3582_v28 = vmax.f32 %v8482_v39, 0.0 }
 0x33c   : > { %v3581_v9 = vmax.f32 %v8419_v60, 0.0  ;;  %v3583_v53 = vmax.f32 %v8483_v58, 0.0 }
 0x33d   : > { %v3664_v6 = vpack.c.bf16 %v3580_v33, %v3576_v59  ;;  %v3666_v46 = vpack.c.bf16 %v3582_v28, %v3578_v30 }
 0x33e   : > { %v3061_v48 = vpop.f32.mrb[108].mxu0  ;;  %v3447_v63 = vpop.f32.mrb[108].mxu1  ;;  %v3665_v7 = vpack.c.bf16 %v3581_v9, %v3577_v1  ;;  %v3667_v3 = vpack.c.bf16 %v3583_v53, %v3579_v22 }
 0x33f   : > { %v8420_v47 = vadd.f32 %v3061_v48, %v10671_v17  ;;  %v8484_v8 = vadd.f32 %v3447_v63, %v10674_v61  ;;  %v3063_v10 = vpop.f32.mrb[109].mxu0  ;;  %v3449_v13 = vpop.f32.mrb[109].mxu1 }
 0x340   : > { %v8421_v14 = vadd.f32 %v3063_v10, %v10677_v5  ;;  %v8485_v15 = vadd.f32 %v3449_v13, %v10680_v43  ;;  %v3065_v18 = vpop.f32.mrb[110].mxu0  ;;  %v3451_v41 = vpop.f32.mrb[110].mxu1  ;;  %4063 = vmatprep.mubr.bf16.mxu0 %v3665_v7  ;;  %4224 = vmatprep.mubr.bf16.mxu1 %v3667_v3 }
 0x341   : > { %v8422_v32 = vadd.f32 %v3065_v18, %v10671_v17  ;;  %v8486_v19 = vadd.f32 %v3451_v41, %v10674_v61  ;;  %v3067_v20 = vpop.f32.mrb[111].mxu0  ;;  %v3453_v21 = vpop.f32.mrb[111].mxu1  ;;  %4064 = vmatmul.mubr.bf16.gmra.mrb[168].mxu0 %v3664_v6  ;;  %4225 = vmatmul.mubr.bf16.gmra.mrb[168].mxu1 %v3666_v46  ;;  %v3584_v27 = vmax.f32 %v8420_v47, 0.0  ;;  %v3586_v25 = vmax.f32 %v8484_v8, 0.0 }
 0x342   : > { %v8423_v23 = vadd.f32 %v3067_v20, %v10677_v5  ;;  %v8487_v24 = vadd.f32 %v3453_v21, %v10680_v43  ;;  %v3585_v35 = vmax.f32 %v8421_v14, 0.0  ;;  %v3587_v42 = vmax.f32 %v8485_v15, 0.0 }
 0x343   : > { %v3588_v11 = vmax.f32 %v8422_v32, 0.0  ;;  %v3590_v50 = vmax.f32 %v8486_v19, 0.0 }
 0x344   : > { %v3589_v26 = vmax.f32 %v8423_v23, 0.0  ;;  %v3591_v31 = vmax.f32 %v8487_v24, 0.0 }
 0x345   : > { %v3668_v12 = vpack.c.bf16 %v3588_v11, %v3584_v27  ;;  %v3670_v16 = vpack.c.bf16 %v3590_v50, %v3586_v25 }
 0x346   : > { %v3071_v62 = vpop.f32.mrb[112].mxu0  ;;  %v3457_v4 = vpop.f32.mrb[112].mxu1  ;;  %v3669_v44 = vpack.c.bf16 %v3589_v26, %v3585_v35  ;;  %v3671_v49 = vpack.c.bf16 %v3591_v31, %v3587_v42 }
 0x347   : > { %v8424_v37 = vadd.f32 %v3071_v62, %v10671_v17  ;;  %v8488_v45 = vadd.f32 %v3457_v4, %v10674_v61  ;;  %v3073_v34 = vpop.f32.mrb[113].mxu0  ;;  %v3459_v40 = vpop.f32.mrb[113].mxu1 }
 0x348   : > { %v8425_v36 = vadd.f32 %v3073_v34, %v10677_v5  ;;  %v8489_v2 = vadd.f32 %v3459_v40, %v10680_v43  ;;  %v3075_v29 = vpop.f32.mrb[114].mxu0  ;;  %v3461_v38 = vpop.f32.mrb[114].mxu1  ;;  %4071 = vmatprep.mubr.bf16.mxu0 %v3669_v44  ;;  %4232 = vmatprep.mubr.bf16.mxu1 %v3671_v49 }
 0x349   : > { %v8426_v39 = vadd.f32 %v3075_v29, %v10671_v17  ;;  %v8490_v56 = vadd.f32 %v3461_v38, %v10674_v61  ;;  %v3077_v57 = vpop.f32.mrb[115].mxu0  ;;  %v3463_v60 = vpop.f32.mrb[115].mxu1  ;;  %4072 = vmatmul.mubr.bf16.gmra.mrb[172].mxu0 %v3668_v12  ;;  %4233 = vmatmul.mubr.bf16.gmra.mrb[172].mxu1 %v3670_v16  ;;  %v3592_v30 = vmax.f32 %v8424_v37, 0.0  ;;  %v3594_v33 = vmax.f32 %v8488_v45, 0.0 }
 0x34a   : > { %v8427_v58 = vadd.f32 %v3077_v57, %v10677_v5  ;;  %v8491_v59 = vadd.f32 %v3463_v60, %v10680_v43  ;;  %v3593_v22 = vmax.f32 %v8425_v36, 0.0  ;;  %v3595_v9 = vmax.f32 %v8489_v2, 0.0 }
 0x34b   : > { %v3596_v28 = vmax.f32 %v8426_v39, 0.0  ;;  %v3598_v1 = vmax.f32 %v8490_v56, 0.0 }
 0x34c   : > { %v3597_v53 = vmax.f32 %v8427_v58, 0.0  ;;  %v3599_v6 = vmax.f32 %v8491_v59, 0.0 }
 0x34d   : > { %v3672_v46 = vpack.c.bf16 %v3596_v28, %v3592_v30  ;;  %v3674_v48 = vpack.c.bf16 %v3598_v1, %v3594_v33 }
 0x34e   : > { %v3081_v63 = vpop.f32.mrb[116].mxu0  ;;  %v3467_v7 = vpop.f32.mrb[116].mxu1  ;;  %v3673_v3 = vpack.c.bf16 %v3597_v53, %v3593_v22  ;;  %v3675_v47 = vpack.c.bf16 %v3599_v6, %v3595_v9 }
 0x34f   : > { %v8428_v8 = vadd.f32 %v3081_v63, %v10671_v17  ;;  %v8492_v10 = vadd.f32 %v3467_v7, %v10674_v61  ;;  %v3083_v13 = vpop.f32.mrb[117].mxu0  ;;  %v3469_v14 = vpop.f32.mrb[117].mxu1 }
 0x350   : > { %v8429_v15 = vadd.f32 %v3083_v13, %v10677_v5  ;;  %v8493_v18 = vadd.f32 %v3469_v14, %v10680_v43  ;;  %v3085_v41 = vpop.f32.mrb[118].mxu0  ;;  %v3471_v32 = vpop.f32.mrb[118].mxu1  ;;  %4079 = vmatprep.mubr.bf16.mxu0 %v3673_v3  ;;  %4240 = vmatprep.mubr.bf16.mxu1 %v3675_v47 }
 0x351   : > { %v8430_v19 = vadd.f32 %v3085_v41, %v10671_v17  ;;  %v8494_v20 = vadd.f32 %v3471_v32, %v10674_v61  ;;  %v3087_v21 = vpop.f32.mrb[119].mxu0  ;;  %v3473_v23 = vpop.f32.mrb[119].mxu1  ;;  %4080 = vmatmul.mubr.bf16.gmra.mrb[176].mxu0 %v3672_v46  ;;  %4241 = vmatmul.mubr.bf16.gmra.mrb[176].mxu1 %v3674_v48  ;;  %v3600_v25 = vmax.f32 %v8428_v8, 0.0  ;;  %v3602_v11 = vmax.f32 %v8492_v10, 0.0 }
 0x352   : > { %v8431_v24 = vadd.f32 %v3087_v21, %v10677_v5  ;;  %v8495_v27 = vadd.f32 %v3473_v23, %v10680_v43  ;;  %v3601_v42 = vmax.f32 %v8429_v15, 0.0  ;;  %v3603_v26 = vmax.f32 %v8493_v18, 0.0 }
 0x353   : > { %v3604_v50 = vmax.f32 %v8430_v19, 0.0  ;;  %v3606_v35 = vmax.f32 %v8494_v20, 0.0 }
 0x354   : > { %v3605_v31 = vmax.f32 %v8431_v24, 0.0  ;;  %v3607_v12 = vmax.f32 %v8495_v27, 0.0 }
 0x355   : > { %v3676_v16 = vpack.c.bf16 %v3604_v50, %v3600_v25  ;;  %v3678_v62 = vpack.c.bf16 %v3606_v35, %v3602_v11 }
 0x356   : > { %v3091_v4 = vpop.f32.mrb[120].mxu0  ;;  %v3477_v44 = vpop.f32.mrb[120].mxu1  ;;  %v3677_v49 = vpack.c.bf16 %v3605_v31, %v3601_v42  ;;  %v3679_v37 = vpack.c.bf16 %v3607_v12, %v3603_v26 }
 0x357   : > { %v8432_v45 = vadd.f32 %v3091_v4, %v10671_v17  ;;  %v8496_v34 = vadd.f32 %v3477_v44, %v10674_v61  ;;  %v3093_v40 = vpop.f32.mrb[121].mxu0  ;;  %v3479_v36 = vpop.f32.mrb[121].mxu1 }
 0x358   : > { %v8433_v2 = vadd.f32 %v3093_v40, %v10677_v5  ;;  %v8497_v29 = vadd.f32 %v3479_v36, %v10680_v43  ;;  %v3095_v38 = vpop.f32.mrb[122].mxu0  ;;  %v3481_v39 = vpop.f32.mrb[122].mxu1  ;;  %4087 = vmatprep.mubr.bf16.mxu0 %v3677_v49  ;;  %4248 = vmatprep.mubr.bf16.mxu1 %v3679_v37  ;;  %v10824_v37 = vld [vmem:[%s11618_s8] ss:$0 sm:$0xff] }
 0x359   : > { %v8434_v56 = vadd.f32 %v3095_v38, %v10671_v17  ;;  %v8498_v57 = vadd.f32 %v3481_v39, %v10674_v61  ;;  %v3097_v60 = vpop.f32.mrb[123].mxu0  ;;  %v3483_v58 = vpop.f32.mrb[123].mxu1  ;;  %4088 = vmatmul.mubr.bf16.gmra.mrb[180].mxu0 %v3676_v16  ;;  %4249 = vmatmul.mubr.bf16.gmra.mrb[180].mxu1 %v3678_v62  ;;  %v3608_v33 = vmax.f32 %v8432_v45, 0.0  ;;  %v3610_v28 = vmax.f32 %v8496_v34, 0.0 }
 0x35a   : > { %v8435_v59 = vadd.f32 %v3097_v60, %v10677_v5  ;;  %v8499_v30 = vadd.f32 %v3483_v58, %v10680_v43  ;;  %v3609_v9 = vmax.f32 %v8433_v2, 0.0  ;;  %v3611_v53 = vmax.f32 %v8497_v29, 0.0 }
 0x35b   : > { %v3612_v1 = vmax.f32 %v8434_v56, 0.0  ;;  %v3614_v22 = vmax.f32 %v8498_v57, 0.0 }
 0x35c   : > { %v3613_v6 = vmax.f32 %v8435_v59, 0.0  ;;  %v3615_v46 = vmax.f32 %v8499_v30, 0.0 }
 0x35d   : > { %v3680_v48 = vpack.c.bf16 %v3612_v1, %v3608_v33  ;;  %v3682_v63 = vpack.c.bf16 %v3614_v22, %v3610_v28 }
 0x35e   : > { %v3101_v7 = vpop.f32.mrb[124].mxu0  ;;  %v3487_v3 = vpop.f32.mrb[124].mxu1  ;;  %v3681_v47 = vpack.c.bf16 %v3613_v6, %v3609_v9  ;;  %v3683_v8 = vpack.c.bf16 %v3615_v46, %v3611_v53 }
 0x35f   : > { %v8436_v10 = vadd.f32 %v3101_v7, %v10671_v17  ;;  %v8500_v13 = vadd.f32 %v3487_v3, %v10674_v61  ;;  %v3103_v14 = vpop.f32.mrb[125].mxu0  ;;  %v3489_v15 = vpop.f32.mrb[125].mxu1  ;;  %v9281_v7 = vld [vmem:[#allocation2 + $0x8] ss:$16 sps:$4 sm:$0xff]  }
 0x360   : > { %v8437_v18 = vadd.f32 %v3103_v14, %v10677_v5  ;;  %v8501_v41 = vadd.f32 %v3489_v15, %v10680_v43  ;;  %v3105_v32 = vpop.f32.mrb[126].mxu0  ;;  %v3491_v19 = vpop.f32.mrb[126].mxu1  ;;  %4095 = vmatprep.mubr.bf16.mxu0 %v3681_v47  ;;  %4256 = vmatprep.mubr.bf16.mxu1 %v3683_v8  ;;  %v9286_v8 = vld [vmem:[#allocation2 + $0x24] ss:$16 sps:$4 sm:$0xff]  }
 0x361   : > { %v8438_v20 = vadd.f32 %v3105_v32, %v10671_v17  ;;  %v8502_v21 = vadd.f32 %v3491_v19, %v10674_v61  ;;  %v3107_v23 = vpop.f32.mrb[127].mxu0  ;;  %v3493_v24 = vpop.f32.mrb[127].mxu1  ;;  %4096 = vmatmul.mubr.bf16.gmra.mrb[184].mxu0 %v3680_v48  ;;  %4257 = vmatmul.mubr.bf16.gmra.mrb[184].mxu1 %v3682_v63  ;;  %v3616_v11 = vmax.f32 %v8436_v10, 0.0  ;;  %v3618_v50 = vmax.f32 %v8500_v13, 0.0  ;;  %v9278_v63 = vld [vmem:[#allocation2] ss:$16 sps:$4 sm:$0xff]  }
 0x362   : > { %v8439_v27 = vadd.f32 %v3107_v23, %v10677_v5  ;;  %v8503_v25 = vadd.f32 %v3493_v24, %v10680_v43  ;;  %v3617_v26 = vmax.f32 %v8437_v18, 0.0  ;;  %v3619_v31 = vmax.f32 %v8501_v41, 0.0  ;;  %v9280_v5 = vld [vmem:[#allocation2 + $0x4] ss:$16 sps:$4 sm:$0xff]   ;;  %v9283_v43 = vld [vmem:[#allocation2 + $0xc] ss:$16 sps:$4 sm:$0xff]  }
 0x363   : > { %v3620_v35 = vmax.f32 %v8438_v20, 0.0  ;;  %v3622_v42 = vmax.f32 %v8502_v21, 0.0  ;;  %5751 = vmatprep.subr.bf16.mxu0 %v9280_v5  ;;  %6137 = vmatprep.subr.bf16.mxu1 %v9283_v43  ;;  %v9289_v10 = vld [vmem:[#allocation2 + $0x2c] ss:$16 sps:$4 sm:$0xff]   ;;  %v9284_v32 = vld [vmem:[#allocation2 + $0x20] ss:$16 sps:$4 sm:$0xff]  }
 0x364   : > { %v3621_v12 = vmax.f32 %v8439_v27, 0.0  ;;  %v3623_v16 = vmax.f32 %v8503_v25, 0.0  ;;  %v9287_v19 = vld [vmem:[#allocation2 + $0x28] ss:$16 sps:$4 sm:$0xff]   ;;  %v9292_v20 = vld [vmem:[#allocation2 + $0x44] ss:$16 sps:$4 sm:$0xff]  }
 0x365   : > { %v3684_v62 = vpack.c.bf16 %v3620_v35, %v3616_v11  ;;  %v3686_v17 = vpack.c.bf16 %v3622_v42, %v3618_v50  ;;  %v9295_v21 = vld [vmem:[#allocation2 + $0x4c] ss:$16 sps:$4 sm:$0xff]  }
 0x366   : > { %v3685_v4 = vpack.c.bf16 %v3621_v12, %v3617_v26  ;;  %v3687_v61 = vpack.c.bf16 %v3623_v16, %v3619_v31  ;;  %v9290_v12 = vld [vmem:[#allocation2 + $0x40] ss:$16 sps:$4 sm:$0xff]   ;;  %v9293_v16 = vld [vmem:[#allocation2 + $0x48] ss:$16 sps:$4 sm:$0xff]  }
 0x368   : > { %4103 = vmatprep.mubr.bf16.mxu0 %v3685_v4  ;;  %4264 = vmatprep.mubr.bf16.mxu1 %v3687_v61  ;;  %v9298_v4 = vld [vmem:[#allocation2 + $0x64] ss:$16 sps:$4 sm:$0xff]   ;;  %v9301_v61 = vld [vmem:[#allocation2 + $0x6c] ss:$16 sps:$4 sm:$0xff]  }
 0x369   : > { %4104 = vmatmul.mubr.bf16.gmra.mrb[188].mxu0 %v3684_v62  ;;  %4265 = vmatmul.mubr.bf16.gmra.mrb[188].mxu1 %v3686_v17 }
 0x36a   : > { %4415 = vmatprep.mubr.bf16.mxu0 %v9545_v0  ;;  %4608 = vmatprep.mubr.bf16.mxu1 %v9545_v0 }
 0x3c4   : > { %v7944_v44 = vpop.f32.mrb[128].mxu0  ;;  %v8056_v49 = vpop.f32.mrb[128].mxu1 }
 0x3c5   : > { %v7945_v45 = vpop.f32.mrb[129].mxu0  ;;  %v8057_v34 = vpop.f32.mrb[129].mxu1 }
 0x3c6   : > { %v7946_v40 = vadd.f32 %v7945_v45, %v7944_v44  ;;  %v8058_v36 = vadd.f32 %v8057_v34, %v8056_v49  ;;  %v7947_v2 = vpop.f32.mrb[130].mxu0  ;;  %v8059_v29 = vpop.f32.mrb[130].mxu1  ;;  %v9296_v34 = vld [vmem:[#allocation2 + $0x60] ss:$16 sps:$4 sm:$0xff]  }
 0x3c7   : > { %v7948_v38 = vpop.f32.mrb[131].mxu0  ;;  %v8060_v39 = vpop.f32.mrb[131].mxu1 }
 0x3c8   : > { %v3986_v56 = vadd.f32 %v7946_v40, %v10824_v37  ;;  %v7949_v57 = vadd.f32 %v7948_v38, %v7947_v2  ;;  %v8061_v60 = vadd.f32 %v8060_v39, %v8059_v29  ;;  %v9299_v40 = vld [vmem:[#allocation2 + $0x68] ss:$16 sps:$4 sm:$0xff]   ;;  %v9307_v2 = vld [vmem:[#allocation2 + $0x8c] ss:$16 sps:$4 sm:$0xff]  }
 0x3ca   : > { %v4147_v58 = vadd.f32 %v8058_v36, %v3986_v56  ;;  %v3989_v59 = vadd.f32 %v7949_v57, %v10824_v37  ;;  %v9304_v36 = vld [vmem:[#allocation2 + $0x84] ss:$16 sps:$4 sm:$0xff]  }
 0x3cc   : > { %7300 = vst.msk [vmem:[%s10831_s27] sm:$0xff] %vm1157_vm2, %v4147_v58  ;;  %v4150_v30 = vadd.f32 %v8061_v60, %v3989_v59  ;;  %v7950_v33 = vpop.f32.mrb[132].mxu0  ;;  %v8062_v28 = vpop.f32.mrb[132].mxu1 }
 0x3cd   : > { %v7951_v1 = vpop.f32.mrb[133].mxu0  ;;  %v8063_v22 = vpop.f32.mrb[133].mxu1 }
 0x3ce   : > { %v4273_v9 = vpack.c.bf16 %v4150_v30, %v4147_v58  ;;  %7301 = vst.msk [vmem:[%s10831_s27 + $0x8] sm:$0xff] %vm1157_vm2, %v4150_v30  ;;  %v7952_v53 = vadd.f32 %v7951_v1, %v7950_v33  ;;  %v8064_v6 = vadd.f32 %v8063_v22, %v8062_v28  ;;  %v7953_v46 = vpop.f32.mrb[134].mxu0  ;;  %v8065_v48 = vpop.f32.mrb[134].mxu1  ;;  %v9302_v28 = vld [vmem:[#allocation2 + $0x80] ss:$16 sps:$4 sm:$0xff]  }
 0x3cf   : > { %v7954_v3 = vpop.f32.mrb[135].mxu0  ;;  %v8066_v47 = vpop.f32.mrb[135].mxu1  ;;  %v9305_v1 = vld [vmem:[#allocation2 + $0x88] ss:$16 sps:$4 sm:$0xff]  }
 0x3d0   : > { %v3994_v13 = vadd.f32 %v7952_v53, %v10824_v37  ;;  %v7955_v14 = vadd.f32 %v7954_v3, %v7953_v46  ;;  %v8067_v15 = vadd.f32 %v8066_v47, %v8065_v48  ;;  %7733 = vmatmul.mubr.msk.bf16.vlgmr.msra.gmra.mrb[192].mxu0 %vm1157_vm2, %v4273_v9  ;;  %7749 = vmatmul.mubr.msk.bf16.vlgmr.msra.gmra.mrb[192].mxu1 %vm1157_vm2, %v4273_v9  ;;  %v9310_v53 = vld [vmem:[#allocation2 + $0xa4] ss:$16 sps:$4 sm:$0xff]   ;;  %v9308_v47 = vld [vmem:[#allocation2 + $0xa0] ss:$16 sps:$4 sm:$0xff]  }
 0x3d1   : > { %4425 = vmatprep.mubr.bf16.mxu0 %v9545_v0  ;;  %4618 = vmatprep.mubr.bf16.mxu1 %v9545_v0 }
 0x3d2   : > { %v4155_v18 = vadd.f32 %v8064_v6, %v3994_v13  ;;  %v3997_v41 = vadd.f32 %v7955_v14, %v10824_v37  ;;  %5752 = vmatpush1.bf16.msra.mxu0 %v9278_v63  ;;  %6138 = vmatpush1.bf16.msra.mxu1 %v9281_v7  ;;  %v9313_v6 = vld [vmem:[#allocation2 + $0xac] ss:$16 sps:$4 sm:$0xff]  }
 0x3d3   : > { %5753 = vmatprep.subr.bf16.mxu0 %v9286_v8  ;;  %6139 = vmatprep.subr.bf16.mxu1 %v9289_v10  ;;  %v9311_v8 = vld [vmem:[#allocation2 + $0xa8] ss:$16 sps:$4 sm:$0xff]   ;;  %v9316_v10 = vld [vmem:[#allocation2 + $0xc4] ss:$16 sps:$4 sm:$0xff]   ;;  %v9319_v13 = vld [vmem:[#allocation2 + $0xcc] ss:$16 sps:$4 sm:$0xff]  }
 0x3d4   : > { %7302 = vst.msk [vmem:[%s10831_s27 + $0x10] sm:$0xff] %vm1157_vm2, %v4155_v18  ;;  %v4158_v23 = vadd.f32 %v8067_v15, %v3997_v41  ;;  %v7956_v24 = vpop.f32.mrb[136].mxu0  ;;  %v8068_v27 = vpop.f32.mrb[136].mxu1 }
 0x3d5   : > { %v7957_v25 = vpop.f32.mrb[137].mxu0  ;;  %v8069_v11 = vpop.f32.mrb[137].mxu1 }
 0x3d6   : > { %v4274_v50 = vpack.c.bf16 %v4158_v23, %v4155_v18  ;;  %7303 = vst.msk [vmem:[%s10831_s27 + $0x18] sm:$0xff] %vm1157_vm2, %v4158_v23  ;;  %v7958_v35 = vadd.f32 %v7957_v25, %v7956_v24  ;;  %v8070_v42 = vadd.f32 %v8069_v11, %v8068_v27  ;;  %v7959_v26 = vpop.f32.mrb[138].mxu0  ;;  %v8071_v31 = vpop.f32.mrb[138].mxu1  ;;  %5754 = vmatpush1.bf16.msra.mxu0 %v9284_v32  ;;  %v9314_v27 = vld [vmem:[#allocation2 + $0xc0] ss:$16 sps:$4 sm:$0xff]  }
 0x3d7   : > { %6140 = vmatpush1.bf16.msra.mxu1 %v9287_v19  ;;  %v7960_v62 = vpop.f32.mrb[139].mxu0  ;;  %v8072_v17 = vpop.f32.mrb[139].mxu1  ;;  %5755 = vmatprep.subr.bf16.mxu0 %v9292_v20  ;;  %v9317_v25 = vld [vmem:[#allocation2 + $0xc8] ss:$16 sps:$4 sm:$0xff]  }
 0x3d8   : > { %6141 = vmatprep.subr.bf16.mxu1 %v9295_v21  ;;  %v4002_v5 = vadd.f32 %v7958_v35, %v10824_v37  ;;  %v7961_v43 = vadd.f32 %v7960_v62, %v7959_v26  ;;  %v8073_v44 = vadd.f32 %v8072_v17, %v8071_v31  ;;  %7734 = vmatmul.mubr.msk.bf16.gmra.mrb[196].mxu0 %vm1157_vm2, %v4274_v50  ;;  %v9322_v35 = vld [vmem:[#allocation2 + $0xe4] ss:$16 sps:$4 sm:$0xff]   ;;  %v9320_v17 = vld [vmem:[#allocation2 + $0xe0] ss:$16 sps:$4 sm:$0xff]  }
 0x3d9   : > { %7750 = vmatmul.mubr.msk.bf16.gmra.mrb[196].mxu1 %vm1157_vm2, %v4274_v50  ;;  %4435 = vmatprep.mubr.bf16.mxu0 %v9545_v0 }
 0x3da   : > { %4628 = vmatprep.mubr.bf16.mxu1 %v9545_v0  ;;  %v4163_v49 = vadd.f32 %v8070_v42, %v4002_v5  ;;  %v4005_v45 = vadd.f32 %v7961_v43, %v10824_v37  ;;  %5756 = vmatpush1.bf16.msra.mxu0 %v9290_v12  ;;  %v9325_v42 = vld [vmem:[#allocation2 + $0xec] ss:$16 sps:$4 sm:$0xff]  }
 0x3db   : > { %6142 = vmatpush1.bf16.msra.mxu1 %v9293_v16  ;;  %5757 = vmatprep.subr.bf16.mxu0 %v9298_v4  ;;  %v9323_v4 = vld [vmem:[#allocation2 + $0xe8] ss:$16 sps:$4 sm:$0xff]   ;;  %v9331_v5 = vld [vmem:[#allocation2 + $0x10c] ss:$16 sps:$4 sm:$0xff]  }
 0x3dc   : > { %6143 = vmatprep.subr.bf16.mxu1 %v9301_v61  ;;  %7304 = vst.msk [vmem:[%s10831_s27 + $0x20] sm:$0xff] %vm1157_vm2, %v4163_v49  ;;  %v4166_v29 = vadd.f32 %v8073_v44, %v4005_v45  ;;  %v7962_v38 = vpop.f32.mrb[140].mxu0  ;;  %v8074_v39 = vpop.f32.mrb[140].mxu1  ;;  %v9328_v61 = vld [vmem:[#allocation2 + $0x104] ss:$16 sps:$4 sm:$0xff]  }
 0x3dd   : > { %v7963_v56 = vpop.f32.mrb[141].mxu0  ;;  %v8075_v57 = vpop.f32.mrb[141].mxu1 }
 0x3de   : > { %v4275_v60 = vpack.c.bf16 %v4166_v29, %v4163_v49  ;;  %7305 = vst.msk [vmem:[%s10831_s27 + $0x28] sm:$0xff] %vm1157_vm2, %v4166_v29  ;;  %v7964_v58 = vadd.f32 %v7963_v56, %v7962_v38  ;;  %v8076_v59 = vadd.f32 %v8075_v57, %v8074_v39  ;;  %v7965_v30 = vpop.f32.mrb[142].mxu0  ;;  %v8077_v33 = vpop.f32.mrb[142].mxu1  ;;  %5758 = vmatpush1.bf16.msra.mxu0 %v9296_v34  ;;  %v9326_v39 = vld [vmem:[#allocation2 + $0x100] ss:$16 sps:$4 sm:$0xff]  }
 0x3df   : > { %6144 = vmatpush1.bf16.msra.mxu1 %v9299_v40  ;;  %v7966_v22 = vpop.f32.mrb[143].mxu0  ;;  %v8078_v9 = vpop.f32.mrb[143].mxu1  ;;  %5759 = vmatprep.subr.bf16.mxu0 %v9304_v36  ;;  %v9329_v56 = vld [vmem:[#allocation2 + $0x108] ss:$16 sps:$4 sm:$0xff]  }
 0x3e0   : > { %6145 = vmatprep.subr.bf16.mxu1 %v9307_v2  ;;  %v4010_v46 = vadd.f32 %v7964_v58, %v10824_v37  ;;  %v7967_v48 = vadd.f32 %v7966_v22, %v7965_v30  ;;  %v8079_v63 = vadd.f32 %v8078_v9, %v8077_v33  ;;  %7735 = vmatmul.mubr.msk.bf16.gmra.mrb[200].mxu0 %vm1157_vm2, %v4275_v60  ;;  %v9334_v58 = vld [vmem:[#allocation2 + $0x124] ss:$16 sps:$4 sm:$0xff]   ;;  %v9332_v9 = vld [vmem:[#allocation2 + $0x120] ss:$16 sps:$4 sm:$0xff]  }
 0x3e1   : > { %7751 = vmatmul.mubr.msk.bf16.gmra.mrb[200].mxu1 %vm1157_vm2, %v4275_v60  ;;  %4445 = vmatprep.mubr.bf16.mxu0 %v9545_v0 }
 0x3e2   : > { %4638 = vmatprep.mubr.bf16.mxu1 %v9545_v0  ;;  %v4171_v7 = vadd.f32 %v8076_v59, %v4010_v46  ;;  %v4013_v3 = vadd.f32 %v7967_v48, %v10824_v37  ;;  %5760 = vmatpush1.bf16.msra.mxu0 %v9302_v28  ;;  %v9337_v59 = vld [vmem:[#allocation2 + $0x12c] ss:$16 sps:$4 sm:$0xff]  }
 0x3e3   : > { %6146 = vmatpush1.bf16.msra.mxu1 %v9305_v1  ;;  %5761 = vmatprep.subr.bf16.mxu0 %v9310_v53  ;;  %v9335_v53 = vld [vmem:[#allocation2 + $0x128] ss:$16 sps:$4 sm:$0xff]   ;;  %v9343_v46 = vld [vmem:[#allocation2 + $0x14c] ss:$16 sps:$4 sm:$0xff]  }
 0x3e4   : > { %6147 = vmatprep.subr.bf16.mxu1 %v9313_v6  ;;  %7306 = vst.msk [vmem:[%s10831_s27 + $0x30] sm:$0xff] %vm1157_vm2, %v4171_v7  ;;  %v4174_v14 = vadd.f32 %v8079_v63, %v4013_v3  ;;  %v7968_v15 = vpop.f32.mrb[144].mxu0  ;;  %v8080_v18 = vpop.f32.mrb[144].mxu1  ;;  %v9340_v6 = vld [vmem:[#allocation2 + $0x144] ss:$16 sps:$4 sm:$0xff]  }
 0x3e5   : > { %v7969_v41 = vpop.f32.mrb[145].mxu0  ;;  %v8081_v32 = vpop.f32.mrb[145].mxu1 }
 0x3e6   : > { %v4276_v19 = vpack.c.bf16 %v4174_v14, %v4171_v7  ;;  %7307 = vst.msk [vmem:[%s10831_s27 + $0x38] sm:$0xff] %vm1157_vm2, %v4174_v14  ;;  %v7970_v20 = vadd.f32 %v7969_v41, %v7968_v15  ;;  %v8082_v21 = vadd.f32 %v8081_v32, %v8080_v18  ;;  %v7971_v23 = vpop.f32.mrb[146].mxu0  ;;  %v8083_v24 = vpop.f32.mrb[146].mxu1  ;;  %5762 = vmatpush1.bf16.msra.mxu0 %v9308_v47  ;;  %v9338_v18 = vld [vmem:[#allocation2 + $0x140] ss:$16 sps:$4 sm:$0xff]  }
 0x3e7   : > { %6148 = vmatpush1.bf16.msra.mxu1 %v9311_v8  ;;  %v7972_v11 = vpop.f32.mrb[147].mxu0  ;;  %v8084_v50 = vpop.f32.mrb[147].mxu1  ;;  %5763 = vmatprep.subr.bf16.mxu0 %v9316_v10  ;;  %v9341_v41 = vld [vmem:[#allocation2 + $0x148] ss:$16 sps:$4 sm:$0xff]  }
 0x3e8   : > { %6149 = vmatprep.subr.bf16.mxu1 %v9319_v13  ;;  %v4018_v26 = vadd.f32 %v7970_v20, %v10824_v37  ;;  %v7973_v31 = vadd.f32 %v7972_v11, %v7971_v23  ;;  %v8085_v12 = vadd.f32 %v8084_v50, %v8083_v24  ;;  %7736 = vmatmul.mubr.msk.bf16.gmra.mrb[204].mxu0 %vm1157_vm2, %v4276_v19  ;;  %v9346_v20 = vld [vmem:[#allocation2 + $0x164] ss:$16 sps:$4 sm:$0xff]   ;;  %v9344_v50 = vld [vmem:[#allocation2 + $0x160] ss:$16 sps:$4 sm:$0xff]  }
 0x3e9   : > { %7752 = vmatmul.mubr.msk.bf16.gmra.mrb[204].mxu1 %vm1157_vm2, %v4276_v19  ;;  %4455 = vmatprep.mubr.bf16.mxu0 %v9545_v0 }
 0x3ea   : > { %4648 = vmatprep.mubr.bf16.mxu1 %v9545_v0  ;;  %v4179_v16 = vadd.f32 %v8082_v21, %v4018_v26  ;;  %v4021_v62 = vadd.f32 %v7973_v31, %v10824_v37  ;;  %5764 = vmatpush1.bf16.msra.mxu0 %v9314_v27  ;;  %v9349_v21 = vld [vmem:[#allocation2 + $0x16c] ss:$16 sps:$4 sm:$0xff]  }
 0x3eb   : > { %6150 = vmatpush1.bf16.msra.mxu1 %v9317_v25  ;;  %5765 = vmatprep.subr.bf16.mxu0 %v9322_v35  ;;  %v9347_v35 = vld [vmem:[#allocation2 + $0x168] ss:$16 sps:$4 sm:$0xff]   ;;  %v9355_v26 = vld [vmem:[#allocation2 + $0x18c] ss:$16 sps:$4 sm:$0xff]  }
 0x3ec   : > { %6151 = vmatprep.subr.bf16.mxu1 %v9325_v42  ;;  %7308 = vst.msk [vmem:[%s10831_s27 + $0x40] sm:$0xff] %vm1157_vm2, %v4179_v16  ;;  %v4182_v43 = vadd.f32 %v8085_v12, %v4021_v62  ;;  %v7974_v44 = vpop.f32.mrb[148].mxu0  ;;  %v8086_v49 = vpop.f32.mrb[148].mxu1  ;;  %v9352_v42 = vld [vmem:[#allocation2 + $0x184] ss:$16 sps:$4 sm:$0xff]  }
 0x3ed   : > { %v7975_v45 = vpop.f32.mrb[149].mxu0  ;;  %v8087_v34 = vpop.f32.mrb[149].mxu1 }
 0x3ee   : > { %v4277_v40 = vpack.c.bf16 %v4182_v43, %v4179_v16  ;;  %7309 = vst.msk [vmem:[%s10831_s27 + $0x48] sm:$0xff] %vm1157_vm2, %v4182_v43  ;;  %v7976_v36 = vadd.f32 %v7975_v45, %v7974_v44  ;;  %v8088_v2 = vadd.f32 %v8087_v34, %v8086_v49  ;;  %v7977_v29 = vpop.f32.mrb[150].mxu0  ;;  %v8089_v38 = vpop.f32.mrb[150].mxu1  ;;  %5766 = vmatpush1.bf16.msra.mxu0 %v9320_v17  ;;  %v9350_v49 = vld [vmem:[#allocation2 + $0x180] ss:$16 sps:$4 sm:$0xff]  }
 0x3ef   : > { %6152 = vmatpush1.bf16.msra.mxu1 %v9323_v4  ;;  %v7978_v57 = vpop.f32.mrb[151].mxu0  ;;  %v8090_v60 = vpop.f32.mrb[151].mxu1  ;;  %5767 = vmatprep.subr.bf16.mxu0 %v9328_v61  ;;  %v9353_v45 = vld [vmem:[#allocation2 + $0x188] ss:$16 sps:$4 sm:$0xff]  }
 0x3f0   : > { %6153 = vmatprep.subr.bf16.mxu1 %v9331_v5  ;;  %v4026_v30 = vadd.f32 %v7976_v36, %v10824_v37  ;;  %v7979_v33 = vadd.f32 %v7978_v57, %v7977_v29  ;;  %v8091_v28 = vadd.f32 %v8090_v60, %v8089_v38  ;;  %7737 = vmatmul.mubr.msk.bf16.gmra.mrb[208].mxu0 %vm1157_vm2, %v4277_v40  ;;  %v9358_v36 = vld [vmem:[#allocation2 + $0x1a4] ss:$16 sps:$4 sm:$0xff]   ;;  %v9356_v60 = vld [vmem:[#allocation2 + $0x1a0] ss:$16 sps:$4 sm:$0xff]  }
 0x3f1   : > { %7753 = vmatmul.mubr.msk.bf16.gmra.mrb[208].mxu1 %vm1157_vm2, %v4277_v40  ;;  %4465 = vmatprep.mubr.bf16.mxu0 %v9545_v0 }
 0x3f2   : > { %4658 = vmatprep.mubr.bf16.mxu1 %v9545_v0  ;;  %v4187_v1 = vadd.f32 %v8088_v2, %v4026_v30  ;;  %v4029_v22 = vadd.f32 %v7979_v33, %v10824_v37  ;;  %5768 = vmatpush1.bf16.msra.mxu0 %v9326_v39  ;;  %v9361_v2 = vld [vmem:[#allocation2 + $0x1ac] ss:$16 sps:$4 sm:$0xff]  }
 0x3f3   : > { %6154 = vmatpush1.bf16.msra.mxu1 %v9329_v56  ;;  %5769 = vmatprep.subr.bf16.mxu0 %v9334_v58  ;;  %v9359_v58 = vld [vmem:[#allocation2 + $0x1a8] ss:$16 sps:$4 sm:$0xff]   ;;  %v9367_v30 = vld [vmem:[#allocation2 + $0x1cc] ss:$16 sps:$4 sm:$0xff]  }
 0x3f4   : > { %6155 = vmatprep.subr.bf16.mxu1 %v9337_v59  ;;  %7310 = vst.msk [vmem:[%s10831_s27 + $0x50] sm:$0xff] %vm1157_vm2, %v4187_v1  ;;  %v4190_v48 = vadd.f32 %v8091_v28, %v4029_v22  ;;  %v7980_v63 = vpop.f32.mrb[152].mxu0  ;;  %v8092_v7 = vpop.f32.mrb[152].mxu1  ;;  %v9364_v59 = vld [vmem:[#allocation2 + $0x1c4] ss:$16 sps:$4 sm:$0xff]  }
 0x3f5   : > { %v7981_v3 = vpop.f32.mrb[153].mxu0  ;;  %v8093_v47 = vpop.f32.mrb[153].mxu1 }
 0x3f6   : > { %v4278_v8 = vpack.c.bf16 %v4190_v48, %v4187_v1  ;;  %7311 = vst.msk [vmem:[%s10831_s27 + $0x58] sm:$0xff] %vm1157_vm2, %v4190_v48  ;;  %v7982_v10 = vadd.f32 %v7981_v3, %v7980_v63  ;;  %v8094_v13 = vadd.f32 %v8093_v47, %v8092_v7  ;;  %v7983_v14 = vpop.f32.mrb[154].mxu0  ;;  %v8095_v15 = vpop.f32.mrb[154].mxu1  ;;  %5770 = vmatpush1.bf16.msra.mxu0 %v9332_v9  ;;  %v9362_v7 = vld [vmem:[#allocation2 + $0x1c0] ss:$16 sps:$4 sm:$0xff]  }
 0x3f7   : > { %6156 = vmatpush1.bf16.msra.mxu1 %v9335_v53  ;;  %v7984_v32 = vpop.f32.mrb[155].mxu0  ;;  %v8096_v19 = vpop.f32.mrb[155].mxu1  ;;  %5771 = vmatprep.subr.bf16.mxu0 %v9340_v6  ;;  %v9365_v3 = vld [vmem:[#allocation2 + $0x1c8] ss:$16 sps:$4 sm:$0xff]  }
 0x3f8   : > { %6157 = vmatprep.subr.bf16.mxu1 %v9343_v46  ;;  %v4034_v23 = vadd.f32 %v7982_v10, %v10824_v37  ;;  %v7985_v24 = vadd.f32 %v7984_v32, %v7983_v14  ;;  %v8097_v27 = vadd.f32 %v8096_v19, %v8095_v15  ;;  %7738 = vmatmul.mubr.msk.bf16.gmra.mrb[212].mxu0 %vm1157_vm2, %v4278_v8 }
 0x3f9   : > { %7754 = vmatmul.mubr.msk.bf16.gmra.mrb[212].mxu1 %vm1157_vm2, %v4278_v8  ;;  %4475 = vmatprep.mubr.bf16.mxu0 %v9545_v0 }
 0x3fa   : > { %4668 = vmatprep.mubr.bf16.mxu1 %v9545_v0  ;;  %v4195_v25 = vadd.f32 %v8094_v13, %v4034_v23  ;;  %v4037_v11 = vadd.f32 %v7985_v24, %v10824_v37  ;;  %5772 = vmatpush1.bf16.msra.mxu0 %v9338_v18 }
 0x3fb   : > { %6158 = vmatpush1.bf16.msra.mxu1 %v9341_v41  ;;  %5773 = vmatprep.subr.bf16.mxu0 %v9346_v20 }
 0x3fc   : > { %6159 = vmatprep.subr.bf16.mxu1 %v9349_v21  ;;  %7312 = vst.msk [vmem:[%s10831_s27 + $0x60] sm:$0xff] %vm1157_vm2, %v4195_v25  ;;  %v4198_v31 = vadd.f32 %v8097_v27, %v4037_v11  ;;  %v7986_v12 = vpop.f32.mrb[156].mxu0  ;;  %v8098_v16 = vpop.f32.mrb[156].mxu1 }
 0x3fd   : > { %v7987_v62 = vpop.f32.mrb[157].mxu0  ;;  %v8099_v17 = vpop.f32.mrb[157].mxu1 }
 0x3fe   : > { %v4279_v4 = vpack.c.bf16 %v4198_v31, %v4195_v25  ;;  %7313 = vst.msk [vmem:[%s10831_s27 + $0x68] sm:$0xff] %vm1157_vm2, %v4198_v31  ;;  %v7988_v61 = vadd.f32 %v7987_v62, %v7986_v12  ;;  %v8100_v5 = vadd.f32 %v8099_v17, %v8098_v16  ;;  %v7989_v43 = vpop.f32.mrb[158].mxu0  ;;  %v8101_v44 = vpop.f32.mrb[158].mxu1  ;;  %5774 = vmatpush1.bf16.msra.mxu0 %v9344_v50 }
 0x3ff   : > { %6160 = vmatpush1.bf16.msra.mxu1 %v9347_v35  ;;  %v7990_v34 = vpop.f32.mrb[159].mxu0  ;;  %v8102_v40 = vpop.f32.mrb[159].mxu1  ;;  %5775 = vmatprep.subr.bf16.mxu0 %v9352_v42 }
 0x400   : > { %6161 = vmatprep.subr.bf16.mxu1 %v9355_v26  ;;  %v4042_v29 = vadd.f32 %v7988_v61, %v10824_v37  ;;  %v7991_v38 = vadd.f32 %v7990_v34, %v7989_v43  ;;  %v8103_v39 = vadd.f32 %v8102_v40, %v8101_v44  ;;  %7739 = vmatmul.mubr.msk.bf16.gmra.mrb[216].mxu0 %vm1157_vm2, %v4279_v4 }
 0x401   : > { %7755 = vmatmul.mubr.msk.bf16.gmra.mrb[216].mxu1 %vm1157_vm2, %v4279_v4  ;;  %4485 = vmatprep.mubr.bf16.mxu0 %v9545_v0 }
 0x402   : > { %4678 = vmatprep.mubr.bf16.mxu1 %v9545_v0  ;;  %v4203_v56 = vadd.f32 %v8100_v5, %v4042_v29  ;;  %v4045_v57 = vadd.f32 %v7991_v38, %v10824_v37  ;;  %5776 = vmatpush1.bf16.msra.mxu0 %v9350_v49 }
 0x403   : > { %6162 = vmatpush1.bf16.msra.mxu1 %v9353_v45  ;;  %5777 = vmatprep.subr.bf16.mxu0 %v9358_v36 }
 0x404   : > { %6163 = vmatprep.subr.bf16.mxu1 %v9361_v2  ;;  %7314 = vst.msk [vmem:[%s10831_s27 + $0x70] sm:$0xff] %vm1157_vm2, %v4203_v56  ;;  %v4206_v33 = vadd.f32 %v8103_v39, %v4045_v57  ;;  %v7992_v28 = vpop.f32.mrb[160].mxu0  ;;  %v8104_v1 = vpop.f32.mrb[160].mxu1 }
 0x405   : > { %v7993_v22 = vpop.f32.mrb[161].mxu0  ;;  %v8105_v9 = vpop.f32.mrb[161].mxu1 }
 0x406   : > { %v4280_v53 = vpack.c.bf16 %v4206_v33, %v4203_v56  ;;  %7315 = vst.msk [vmem:[%s10831_s27 + $0x78] sm:$0xff] %vm1157_vm2, %v4206_v33  ;;  %v7994_v6 = vadd.f32 %v7993_v22, %v7992_v28  ;;  %v8106_v46 = vadd.f32 %v8105_v9, %v8104_v1  ;;  %v7995_v48 = vpop.f32.mrb[162].mxu0  ;;  %v8107_v63 = vpop.f32.mrb[162].mxu1  ;;  %5778 = vmatpush1.bf16.msra.mxu0 %v9356_v60 }
 0x407   : > { %6164 = vmatpush1.bf16.msra.mxu1 %v9359_v58  ;;  %v7996_v47 = vpop.f32.mrb[163].mxu0  ;;  %v8108_v8 = vpop.f32.mrb[163].mxu1  ;;  %5779 = vmatprep.subr.bf16.mxu0 %v9364_v59 }
 0x408   : > { %6165 = vmatprep.subr.bf16.mxu1 %v9367_v30  ;;  %v4050_v10 = vadd.f32 %v7994_v6, %v10824_v37  ;;  %v7997_v13 = vadd.f32 %v7996_v47, %v7995_v48  ;;  %v8109_v14 = vadd.f32 %v8108_v8, %v8107_v63  ;;  %7740 = vmatmul.mubr.msk.bf16.gmra.mrb[220].mxu0 %vm1157_vm2, %v4280_v53 }
 0x409   : > { %7756 = vmatmul.mubr.msk.bf16.gmra.mrb[220].mxu1 %vm1157_vm2, %v4280_v53  ;;  %4495 = vmatprep.mubr.bf16.mxu0 %v9545_v0 }
 0x40a   : > { %4688 = vmatprep.mubr.bf16.mxu1 %v9545_v0  ;;  %v4211_v15 = vadd.f32 %v8106_v46, %v4050_v10  ;;  %v4053_v18 = vadd.f32 %v7997_v13, %v10824_v37  ;;  %5780 = vmatpush1.bf16.msra.mxu0 %v9362_v7 }
 0x40b   : > { %6166 = vmatpush1.bf16.msra.mxu1 %v9365_v3 }
 0x40c   : > { %7316 = vst.msk [vmem:[%s10831_s27 + $0x80] sm:$0xff] %vm1157_vm2, %v4211_v15  ;;  %v4214_v41 = vadd.f32 %v8109_v14, %v4053_v18  ;;  %v7998_v32 = vpop.f32.mrb[164].mxu0  ;;  %v8110_v19 = vpop.f32.mrb[164].mxu1 }
 0x40d   : > { %v7999_v20 = vpop.f32.mrb[165].mxu0  ;;  %v8111_v21 = vpop.f32.mrb[165].mxu1 }
 0x40e   : > { %v4281_v23 = vpack.c.bf16 %v4214_v41, %v4211_v15  ;;  %7317 = vst.msk [vmem:[%s10831_s27 + $0x88] sm:$0xff] %vm1157_vm2, %v4214_v41  ;;  %v8000_v24 = vadd.f32 %v7999_v20, %v7998_v32  ;;  %v8112_v27 = vadd.f32 %v8111_v21, %v8110_v19  ;;  %v8001_v25 = vpop.f32.mrb[166].mxu0  ;;  %v8113_v11 = vpop.f32.mrb[166].mxu1 }
 0x40f   : > { %v8002_v50 = vpop.f32.mrb[167].mxu0  ;;  %v8114_v35 = vpop.f32.mrb[167].mxu1 }
 0x410   : > { %v4058_v42 = vadd.f32 %v8000_v24, %v10824_v37  ;;  %v8003_v26 = vadd.f32 %v8002_v50, %v8001_v25  ;;  %v8115_v31 = vadd.f32 %v8114_v35, %v8113_v11  ;;  %7741 = vmatmul.mubr.msk.bf16.gmra.mrb[224].mxu0 %vm1157_vm2, %v4281_v23  ;;  %v9370_v25 = vld [vmem:[#allocation2 + $0x1e4] ss:$16 sps:$4 sm:$0xff]   ;;  %v9373_v11 = vld [vmem:[#allocation2 + $0x1ec] ss:$16 sps:$4 sm:$0xff]   ;;  %v9368_v50 = vld [vmem:[#allocation2 + $0x1e0] ss:$16 sps:$4 sm:$0xff]  }
 0x411   : > { %7757 = vmatmul.mubr.msk.bf16.gmra.mrb[224].mxu1 %vm1157_vm2, %v4281_v23  ;;  %4505 = vmatprep.mubr.bf16.mxu0 %v9545_v0  ;;  %v9371_v35 = vld [vmem:[#allocation2 + $0x1e8] ss:$16 sps:$4 sm:$0xff]  }
 0x412   : > { %4698 = vmatprep.mubr.bf16.mxu1 %v9545_v0  ;;  %v4219_v12 = vadd.f32 %v8112_v27, %v4058_v42  ;;  %v4061_v16 = vadd.f32 %v8003_v26, %v10824_v37  ;;  %5781 = vmatprep.subr.bf16.mxu0 %v9370_v25 }
 0x413   : > { %6167 = vmatprep.subr.bf16.mxu1 %v9373_v11  ;;  %5782 = vmatpush1.bf16.msra.mxu0 %v9368_v50 }
 0x414   : > { %7318 = vst.msk [vmem:[%s10831_s27 + $0x90] sm:$0xff] %vm1157_vm2, %v4219_v12  ;;  %v4222_v62 = vadd.f32 %v8115_v31, %v4061_v16  ;;  %v8004_v17 = vpop.f32.mrb[168].mxu0  ;;  %v8116_v4 = vpop.f32.mrb[168].mxu1  ;;  %6168 = vmatpush1.bf16.msra.mxu1 %v9371_v35  ;;  %v4293_v35 = vld [vmem:[%s11620_s10] sm:$0xf] }
 0x415   : > { %v8005_v61 = vpop.f32.mrb[169].mxu0  ;;  %v8117_v5 = vpop.f32.mrb[169].mxu1 }
 0x416   : > { %v4282_v43 = vpack.c.bf16 %v4222_v62, %v4219_v12  ;;  %7319 = vst.msk [vmem:[%s10831_s27 + $0x98] sm:$0xff] %vm1157_vm2, %v4222_v62  ;;  %v8006_v44 = vadd.f32 %v8005_v61, %v8004_v17  ;;  %v8118_v49 = vadd.f32 %v8117_v5, %v8116_v4  ;;  %v8007_v45 = vpop.f32.mrb[170].mxu0  ;;  %v8119_v34 = vpop.f32.mrb[170].mxu1 }
 0x417   : > { %v8008_v40 = vpop.f32.mrb[171].mxu0  ;;  %v8120_v36 = vpop.f32.mrb[171].mxu1 }
 0x418   : > { %v4066_v2 = vadd.f32 %v8006_v44, %v10824_v37  ;;  %v8009_v29 = vadd.f32 %v8008_v40, %v8007_v45  ;;  %v8121_v38 = vadd.f32 %v8120_v36, %v8119_v34  ;;  %7742 = vmatmul.mubr.msk.bf16.gmra.mrb[228].mxu0 %vm1157_vm2, %v4282_v43 }
 0x419   : > { %7758 = vmatmul.mubr.msk.bf16.gmra.mrb[228].mxu1 %vm1157_vm2, %v4282_v43  ;;  %4515 = vmatprep.mubr.bf16.mxu0 %v9545_v0 }
 0x41a   : > { %4708 = vmatprep.mubr.bf16.mxu1 %v9545_v0  ;;  %v4227_v39 = vadd.f32 %v8118_v49, %v4066_v2  ;;  %v4069_v56 = vadd.f32 %v8009_v29, %v10824_v37 }
 0x41c   : > { %7320 = vst.msk [vmem:[%s10831_s27 + $0xa0] sm:$0xff] %vm1157_vm2, %v4227_v39  ;;  %v4230_v57 = vadd.f32 %v8121_v38, %v4069_v56  ;;  %v8010_v60 = vpop.f32.mrb[172].mxu0  ;;  %v8122_v58 = vpop.f32.mrb[172].mxu1  ;;  %v9376_v38 = vld [vmem:[#allocation2 + $0x204] ss:$16 sps:$4 sm:$0xff]  }
 0x41d   : > { %v8011_v59 = vpop.f32.mrb[173].mxu0  ;;  %v8123_v30 = vpop.f32.mrb[173].mxu1  ;;  %5944 = vmatprep.subr.bf16.mxu0 %v9376_v38 }
 0x41e   : > { %v4283_v33 = vpack.c.bf16 %v4230_v57, %v4227_v39  ;;  %7321 = vst.msk [vmem:[%s10831_s27 + $0xa8] sm:$0xff] %vm1157_vm2, %v4230_v57  ;;  %v8012_v28 = vadd.f32 %v8011_v59, %v8010_v60  ;;  %v8124_v1 = vadd.f32 %v8123_v30, %v8122_v58  ;;  %v8013_v22 = vpop.f32.mrb[174].mxu0  ;;  %v8125_v9 = vpop.f32.mrb[174].mxu1  ;;  %v9379_v60 = vld [vmem:[#allocation2 + $0x20c] ss:$16 sps:$4 sm:$0xff]  }
 0x41f   : > { %v8014_v53 = vpop.f32.mrb[175].mxu0  ;;  %v8126_v6 = vpop.f32.mrb[175].mxu1  ;;  %6330 = vmatprep.subr.bf16.mxu1 %v9379_v60 }
 0x420   : > { %v4074_v46 = vadd.f32 %v8012_v28, %v10824_v37  ;;  %v8015_v48 = vadd.f32 %v8014_v53, %v8013_v22  ;;  %v8127_v63 = vadd.f32 %v8126_v6, %v8125_v9  ;;  %7743 = vmatmul.mubr.msk.bf16.gmra.mrb[232].mxu0 %vm1157_vm2, %v4283_v33 }
 0x421   : > { %7759 = vmatmul.mubr.msk.bf16.gmra.mrb[232].mxu1 %vm1157_vm2, %v4283_v33  ;;  %4525 = vmatprep.mubr.bf16.mxu0 %v9545_v0 }
 0x422   : > { %4718 = vmatprep.mubr.bf16.mxu1 %v9545_v0  ;;  %v4235_v7 = vadd.f32 %v8124_v1, %v4074_v46  ;;  %v4077_v3 = vadd.f32 %v8015_v48, %v10824_v37 }
 0x424   : > { %7322 = vst.msk [vmem:[%s10831_s27 + $0xb0] sm:$0xff] %vm1157_vm2, %v4235_v7  ;;  %v4238_v47 = vadd.f32 %v8127_v63, %v4077_v3  ;;  %v8016_v8 = vpop.f32.mrb[176].mxu0  ;;  %v8128_v10 = vpop.f32.mrb[176].mxu1 }
 0x425   : > { %v8017_v13 = vpop.f32.mrb[177].mxu0  ;;  %v8129_v14 = vpop.f32.mrb[177].mxu1 }
 0x426   : > { %v4284_v15 = vpack.c.bf16 %v4238_v47, %v4235_v7  ;;  %7323 = vst.msk [vmem:[%s10831_s27 + $0xb8] sm:$0xff] %vm1157_vm2, %v4238_v47  ;;  %v8018_v18 = vadd.f32 %v8017_v13, %v8016_v8  ;;  %v8130_v41 = vadd.f32 %v8129_v14, %v8128_v10  ;;  %v8019_v32 = vpop.f32.mrb[178].mxu0  ;;  %v8131_v19 = vpop.f32.mrb[178].mxu1 }
 0x427   : > { %v8020_v20 = vpop.f32.mrb[179].mxu0  ;;  %v8132_v21 = vpop.f32.mrb[179].mxu1 }
 0x428   : > { %v4082_v23 = vadd.f32 %v8018_v18, %v10824_v37  ;;  %v8021_v24 = vadd.f32 %v8020_v20, %v8019_v32  ;;  %v8133_v27 = vadd.f32 %v8132_v21, %v8131_v19  ;;  %7744 = vmatmul.mubr.msk.bf16.gmra.mrb[236].mxu0 %vm1157_vm2, %v4284_v15 }
 0x429   : > { %7760 = vmatmul.mubr.msk.bf16.gmra.mrb[236].mxu1 %vm1157_vm2, %v4284_v15  ;;  %4535 = vmatprep.mubr.bf16.mxu0 %v9545_v0 }
 0x42a   : > { %4728 = vmatprep.mubr.bf16.mxu1 %v9545_v0  ;;  %v4243_v42 = vadd.f32 %v8130_v41, %v4082_v23  ;;  %v4085_v26 = vadd.f32 %v8021_v24, %v10824_v37 }
 0x42c   : > { %7324 = vst.msk [vmem:[%s10831_s27 + $0xc0] sm:$0xff] %vm1157_vm2, %v4243_v42  ;;  %v4246_v31 = vadd.f32 %v8133_v27, %v4085_v26  ;;  %v8022_v12 = vpop.f32.mrb[180].mxu0  ;;  %v8134_v16 = vpop.f32.mrb[180].mxu1  ;;  %v11003_v26 = vrot.slane %v4293_v35, %v10112_v55 }
 0x42d   : > { %v8023_v62 = vpop.f32.mrb[181].mxu0  ;;  %v8135_v17 = vpop.f32.mrb[181].mxu1 }
 0x42e   : > { %v4285_v4 = vpack.c.bf16 %v4246_v31, %v4243_v42  ;;  %7325 = vst.msk [vmem:[%s10831_s27 + $0xc8] sm:$0xff] %vm1157_vm2, %v4246_v31  ;;  %v8024_v61 = vadd.f32 %v8023_v62, %v8022_v12  ;;  %v8136_v5 = vadd.f32 %v8135_v17, %v8134_v16  ;;  %v8025_v43 = vpop.f32.mrb[182].mxu0  ;;  %v8137_v44 = vpop.f32.mrb[182].mxu1  ;;  %v10994_v42 = vrot.slane %v4293_v35, %v10103_v51 }
 0x42f   : > { %v8026_v49 = vpop.f32.mrb[183].mxu0  ;;  %v8138_v45 = vpop.f32.mrb[183].mxu1 }
 0x430   : > { %v4090_v34 = vadd.f32 %v8024_v61, %v10824_v37  ;;  %v8027_v40 = vadd.f32 %v8026_v49, %v8025_v43  ;;  %v8139_v36 = vadd.f32 %v8138_v45, %v8137_v44  ;;  %7745 = vmatmul.mubr.msk.bf16.gmra.mrb[240].mxu0 %vm1157_vm2, %v4285_v4 }
 0x431   : > { %7761 = vmatmul.mubr.msk.bf16.gmra.mrb[240].mxu1 %vm1157_vm2, %v4285_v4  ;;  %4545 = vmatprep.mubr.bf16.mxu0 %v9545_v0 }
 0x432   : > { %4738 = vmatprep.mubr.bf16.mxu1 %v9545_v0  ;;  %v4251_v2 = vadd.f32 %v8136_v5, %v4090_v34  ;;  %v4093_v29 = vadd.f32 %v8027_v40, %v10824_v37 }
 0x434   : > { %7326 = vst.msk [vmem:[%s10831_s27 + $0xd0] sm:$0xff] %vm1157_vm2, %v4251_v2  ;;  %v4254_v39 = vadd.f32 %v8139_v36, %v4093_v29  ;;  %v8028_v56 = vpop.f32.mrb[184].mxu0  ;;  %v8140_v57 = vpop.f32.mrb[184].mxu1 }
 0x435   : > { %v8029_v58 = vpop.f32.mrb[185].mxu0  ;;  %v8141_v59 = vpop.f32.mrb[185].mxu1 }
 0x436   : > { %v4286_v30 = vpack.c.bf16 %v4254_v39, %v4251_v2  ;;  %7327 = vst.msk [vmem:[%s10831_s27 + $0xd8] sm:$0xff] %vm1157_vm2, %v4254_v39  ;;  %v8030_v33 = vadd.f32 %v8029_v58, %v8028_v56  ;;  %v8142_v28 = vadd.f32 %v8141_v59, %v8140_v57  ;;  %v8031_v1 = vpop.f32.mrb[186].mxu0  ;;  %v8143_v22 = vpop.f32.mrb[186].mxu1 }
 0x437   : > { %v8032_v9 = vpop.f32.mrb[187].mxu0  ;;  %v8144_v53 = vpop.f32.mrb[187].mxu1 }
 0x438   : > { %v4098_v6 = vadd.f32 %v8030_v33, %v10824_v37  ;;  %v8033_v46 = vadd.f32 %v8032_v9, %v8031_v1  ;;  %v8145_v48 = vadd.f32 %v8144_v53, %v8143_v22  ;;  %7746 = vmatmul.mubr.msk.bf16.gmra.mrb[244].mxu0 %vm1157_vm2, %v4286_v30  ;;  %v9374_v53 = vld [vmem:[#allocation2 + $0x200] ss:$16 sps:$4 sm:$0xff]  }
 0x439   : > { %7762 = vmatmul.mubr.msk.bf16.gmra.mrb[244].mxu1 %vm1157_vm2, %v4286_v30  ;;  %4555 = vmatprep.mubr.bf16.mxu0 %v9545_v0 }
 0x43a   : > { %4748 = vmatprep.mubr.bf16.mxu1 %v9545_v0  ;;  %v4259_v63 = vadd.f32 %v8142_v28, %v4098_v6  ;;  %v4101_v7 = vadd.f32 %v8033_v46, %v10824_v37  ;;  %v9377_v6 = vld [vmem:[#allocation2 + $0x208] ss:$16 sps:$4 sm:$0xff]  }
 0x43c   : > { %7328 = vst.msk [vmem:[%s10831_s27 + $0xe0] sm:$0xff] %vm1157_vm2, %v4259_v63  ;;  %v4262_v3 = vadd.f32 %v8145_v48, %v4101_v7  ;;  %v8034_v47 = vpop.f32.mrb[188].mxu0  ;;  %v8146_v8 = vpop.f32.mrb[188].mxu1 }
 0x43d   : > { %v8035_v10 = vpop.f32.mrb[189].mxu0  ;;  %v8147_v13 = vpop.f32.mrb[189].mxu1 }
 0x43e   : > { %v4287_v14 = vpack.c.bf16 %v4262_v3, %v4259_v63  ;;  %7329 = vst.msk [vmem:[%s10831_s27 + $0xe8] sm:$0xff] %vm1157_vm2, %v4262_v3  ;;  %v8036_v15 = vadd.f32 %v8035_v10, %v8034_v47  ;;  %v8148_v18 = vadd.f32 %v8147_v13, %v8146_v8  ;;  %v8037_v41 = vpop.f32.mrb[190].mxu0  ;;  %v8149_v32 = vpop.f32.mrb[190].mxu1  ;;  %v9382_v3 = vld [vmem:[#allocation2 + $0x224] ss:$16 sps:$4 sm:$0xff]  }
 0x43f   : > { %v8038_v19 = vpop.f32.mrb[191].mxu0  ;;  %v8150_v20 = vpop.f32.mrb[191].mxu1  ;;  %v9385_v47 = vld [vmem:[#allocation2 + $0x22c] ss:$16 sps:$4 sm:$0xff]  }
 0x440   : > { %v4106_v21 = vadd.f32 %v8036_v15, %v10824_v37  ;;  %v8039_v23 = vadd.f32 %v8038_v19, %v8037_v41  ;;  %v8151_v24 = vadd.f32 %v8150_v20, %v8149_v32  ;;  %7747 = vmatmul.mubr.msk.bf16.gmra.mrb[248].mxu0 %vm1157_vm2, %v4287_v14 }
 0x441   : > { %7763 = vmatmul.mubr.msk.bf16.gmra.mrb[248].mxu1 %vm1157_vm2, %v4287_v14  ;;  %4565 = vmatprep.mubr.bf16.mxu0 %v9545_v0 }
 0x442   : > { %4758 = vmatprep.mubr.bf16.mxu1 %v9545_v0  ;;  %v4267_v27 = vadd.f32 %v8148_v18, %v4106_v21  ;;  %v4109_v25 = vadd.f32 %v8039_v23, %v10824_v37  ;;  %v10997_v0 = vrot.slane %v4293_v35, %v10105_v52  ;;  %v11000_v37 = vrot.slane %v4293_v35, %v10110_v54  ;;  %v9380_v21 = vld [vmem:[#allocation2 + $0x220] ss:$16 sps:$4 sm:$0xff]   ;;  %v9383_v23 = vld [vmem:[#allocation2 + $0x228] ss:$16 sps:$4 sm:$0xff]   ;;  %v9391_v35 = vld [vmem:[#allocation2 + $0x24c] ss:$16 sps:$4 sm:$0xff]  }
 0x444   : > { %7330 = vst.msk [vmem:[%s10831_s27 + $0xf0] sm:$0xff] %vm1157_vm2, %v4267_v27  ;;  %v4270_v11 = vadd.f32 %v8151_v24, %v4109_v25  ;;  %v9388_v24 = vld [vmem:[#allocation2 + $0x244] ss:$16 sps:$4 sm:$0xff]  }
 0x446   : > { %v4288_v50 = vpack.c.bf16 %v4270_v11, %v4267_v27  ;;  %7331 = vst.msk [vmem:[%s10831_s27 + $0xf8] sm:$0xff] %vm1157_vm2, %v4270_v11 }
 0x448   : > { %7748 = vmatmul.mubr.msk.bf16.gmra.mrb[252].mxu0 %vm1157_vm2, %v4288_v50 }
 0x449   : > { %7764 = vmatmul.mubr.msk.bf16.gmra.mrb[252].mxu1 %vm1157_vm2, %v4288_v50 }
 0x4a3   : > { %v4417_v31 = vpop.f32.mrb[192].mxu0  ;;  %v4610_v12 = vpop.f32.mrb[192].mxu1 }
 0x4a4   : > { %v4418_v16 = vadd.f32 %v4417_v31, %v10994_v42  ;;  %v4611_v62 = vadd.f32 %v4610_v12, %v10997_v0  ;;  %v4419_v17 = vpop.f32.mrb[193].mxu0  ;;  %v4612_v4 = vpop.f32.mrb[193].mxu1 }
 0x4a5   : > { %v4420_v61 = vadd.f32 %v4419_v17, %v11000_v37  ;;  %v4613_v5 = vadd.f32 %v4612_v4, %v11003_v26  ;;  %v4421_v43 = vpop.f32.mrb[194].mxu0  ;;  %v4614_v44 = vpop.f32.mrb[194].mxu1 }
 0x4a6   : > { %v4422_v49 = vadd.f32 %v4421_v43, %v10994_v42  ;;  %v4615_v45 = vadd.f32 %v4614_v44, %v10997_v0  ;;  %v4423_v34 = vpop.f32.mrb[195].mxu0  ;;  %v4616_v40 = vpop.f32.mrb[195].mxu1  ;;  %v4769_v29 = vmax.f32 %v4418_v16, 0.0  ;;  %v4771_v38 = vmax.f32 %v4611_v62, 0.0 }
 0x4a7   : > { %v4424_v36 = vadd.f32 %v4423_v34, %v11000_v37  ;;  %v4617_v2 = vadd.f32 %v4616_v40, %v11003_v26  ;;  %v4770_v57 = vmax.f32 %v4420_v61, 0.0  ;;  %v4772_v60 = vmax.f32 %v4613_v5, 0.0 }
 0x4a8   : > { %v4773_v39 = vmax.f32 %v4422_v49, 0.0  ;;  %v4775_v56 = vmax.f32 %v4615_v45, 0.0  ;;  %v9386_v49 = vld [vmem:[#allocation2 + $0x240] ss:$16 sps:$4 sm:$0xff]   ;;  %v9389_v45 = vld [vmem:[#allocation2 + $0x248] ss:$16 sps:$4 sm:$0xff]  }
 0x4a9   : > { %v4774_v58 = vmax.f32 %v4424_v36, 0.0  ;;  %v4776_v59 = vmax.f32 %v4617_v2, 0.0 }
 0x4aa   : > { %v4897_v30 = vpack.c.bf16 %v4773_v39, %v4769_v29  ;;  %v11013_v33 = vpack.c.bf16 %v4775_v56, %v4771_v38  ;;  %v9394_v29 = vld [vmem:[#allocation2 + $0x264] ss:$16 sps:$4 sm:$0xff]   ;;  %v9397_v38 = vld [vmem:[#allocation2 + $0x26c] ss:$16 sps:$4 sm:$0xff]  }
 0x4ab   : > { %v4898_v28 = vpack.c.bf16 %v4774_v58, %v4770_v57  ;;  %v11015_v1 = vpack.c.bf16 %v4776_v59, %v4772_v60  ;;  %v4427_v22 = vpop.f32.mrb[196].mxu0 }
 0x4ac   : > { %v4620_v9 = vpop.f32.mrb[196].mxu1  ;;  %v4428_v46 = vadd.f32 %v4427_v22, %v10994_v42  ;;  %v4429_v63 = vpop.f32.mrb[197].mxu0 }
 0x4ad   : > { %v4621_v48 = vadd.f32 %v4620_v9, %v10997_v0  ;;  %v4622_v7 = vpop.f32.mrb[197].mxu1  ;;  %v4430_v8 = vadd.f32 %v4429_v63, %v11000_v37  ;;  %v4431_v13 = vpop.f32.mrb[198].mxu0  ;;  %5783 = vmatprep.mubr.bf16.mxu0 %v4898_v28  ;;  %6169 = vmatprep.mubr.bf16.mxu1 %v4898_v28 }
 0x4ae   : > { %v4623_v10 = vadd.f32 %v4622_v7, %v11003_v26  ;;  %v4624_v14 = vpop.f32.mrb[198].mxu1  ;;  %v4432_v15 = vadd.f32 %v4431_v13, %v10994_v42  ;;  %v4433_v41 = vpop.f32.mrb[199].mxu0  ;;  %5784 = vmatmul.mubr.bf16.vlgmr.msra.gmra.mrb[0].mxu0 %v4897_v30  ;;  %6170 = vmatmul.mubr.bf16.vlgmr.msra.gmra.mrb[0].mxu1 %v4897_v30  ;;  %v4777_v27 = vmax.f32 %v4428_v46, 0.0  ;;  %v9400_v46 = vld [vmem:[#allocation2 + $0x284] ss:$16 sps:$4 sm:$0xff]  }
 0x4af   : > { %v4625_v18 = vadd.f32 %v4624_v14, %v10997_v0  ;;  %v4626_v32 = vpop.f32.mrb[199].mxu1  ;;  %v4434_v19 = vadd.f32 %v4433_v41, %v11000_v37  ;;  %5945 = vmatpush1.bf16.msra.mxu0 %v9374_v53  ;;  %6331 = vmatpush1.bf16.msra.mxu1 %v9377_v6  ;;  %v4779_v25 = vmax.f32 %v4621_v48, 0.0  ;;  %v4778_v31 = vmax.f32 %v4430_v8, 0.0  ;;  %v9392_v53 = vld [vmem:[#allocation2 + $0x260] ss:$16 sps:$4 sm:$0xff]  }
 0x4b0   : > { %v4627_v20 = vadd.f32 %v4626_v32, %v11003_v26  ;;  %v4781_v11 = vmax.f32 %v4432_v15, 0.0  ;;  %5946 = vmatprep.subr.bf16.mxu0 %v9382_v3  ;;  %6332 = vmatprep.subr.bf16.mxu1 %v9385_v47  ;;  %v4780_v12 = vmax.f32 %v4623_v10, 0.0  ;;  %v9395_v6 = vld [vmem:[#allocation2 + $0x268] ss:$16 sps:$4 sm:$0xff]   ;;  %v9403_v47 = vld [vmem:[#allocation2 + $0x28c] ss:$16 sps:$4 sm:$0xff]  }
 0x4b1   : > { %v4783_v50 = vmax.f32 %v4625_v18, 0.0  ;;  %v4782_v16 = vmax.f32 %v4434_v19, 0.0 }
 0x4b2   : > { %v4784_v62 = vmax.f32 %v4627_v20, 0.0  ;;  %v4901_v17 = vpack.c.bf16 %v4781_v11, %v4777_v27 }
 0x4b3   : > { %v11025_v4 = vpack.c.bf16 %v4783_v50, %v4779_v25  ;;  %v4902_v61 = vpack.c.bf16 %v4782_v16, %v4778_v31  ;;  %v4437_v43 = vpop.f32.mrb[200].mxu0  ;;  %5947 = vmatpush1.bf16.msra.mxu0 %v9380_v21  ;;  %6333 = vmatpush1.bf16.msra.mxu1 %v9383_v23  ;;  %v9398_v21 = vld [vmem:[#allocation2 + $0x280] ss:$16 sps:$4 sm:$0xff]   ;;  %v9401_v23 = vld [vmem:[#allocation2 + $0x288] ss:$16 sps:$4 sm:$0xff]  }
 0x4b4   : > { %v11027_v5 = vpack.c.bf16 %v4784_v62, %v4780_v12  ;;  %v4630_v44 = vpop.f32.mrb[200].mxu1  ;;  %v4438_v34 = vadd.f32 %v4437_v43, %v10994_v42  ;;  %v4439_v36 = vpop.f32.mrb[201].mxu0  ;;  %5948 = vmatprep.subr.bf16.mxu0 %v9388_v24  ;;  %6334 = vmatprep.subr.bf16.mxu1 %v9391_v35  ;;  %v9406_v50 = vld [vmem:[#allocation2 + $0x2a4] ss:$16 sps:$4 sm:$0xff]   ;;  %v9409_v35 = vld [vmem:[#allocation2 + $0x2ac] ss:$16 sps:$4 sm:$0xff]  }
 0x4b5   : > { %v4631_v40 = vadd.f32 %v4630_v44, %v10997_v0  ;;  %v4632_v2 = vpop.f32.mrb[201].mxu1  ;;  %v4440_v39 = vadd.f32 %v4439_v36, %v11000_v37  ;;  %v4441_v57 = vpop.f32.mrb[202].mxu0  ;;  %5793 = vmatprep.mubr.bf16.mxu0 %v4902_v61  ;;  %6179 = vmatprep.mubr.bf16.mxu1 %v4902_v61  ;;  %v9412_v36 = vld [vmem:[#allocation2 + $0x2c4] ss:$16 sps:$4 sm:$0xff]  }
 0x4b6   : > { %v4633_v56 = vadd.f32 %v4632_v2, %v11003_v26  ;;  %v4634_v60 = vpop.f32.mrb[202].mxu1  ;;  %v4442_v58 = vadd.f32 %v4441_v57, %v10994_v42  ;;  %v4443_v30 = vpop.f32.mrb[203].mxu0  ;;  %5794 = vmatmul.mubr.bf16.gmra.mrb[4].mxu0 %v4901_v17  ;;  %6180 = vmatmul.mubr.bf16.gmra.mrb[4].mxu1 %v4901_v17  ;;  %v4785_v48 = vmax.f32 %v4438_v34, 0.0  ;;  %v9404_v34 = vld [vmem:[#allocation2 + $0x2a0] ss:$16 sps:$4 sm:$0xff]  }
 0x4b7   : > { %v4635_v59 = vadd.f32 %v4634_v60, %v10997_v0  ;;  %v4636_v28 = vpop.f32.mrb[203].mxu1  ;;  %v4444_v22 = vadd.f32 %v4443_v30, %v11000_v37  ;;  %5949 = vmatpush1.bf16.msra.mxu0 %v9386_v49  ;;  %6335 = vmatpush1.bf16.msra.mxu1 %v9389_v45  ;;  %v4787_v63 = vmax.f32 %v4631_v40, 0.0  ;;  %v4786_v8 = vmax.f32 %v4440_v39, 0.0  ;;  %v9407_v40 = vld [vmem:[#allocation2 + $0x2a8] ss:$16 sps:$4 sm:$0xff]  }
 0x4b8   : > { %v4637_v9 = vadd.f32 %v4636_v28, %v11003_v26  ;;  %v4789_v7 = vmax.f32 %v4442_v58, 0.0  ;;  %5950 = vmatprep.subr.bf16.mxu0 %v9394_v29  ;;  %6336 = vmatprep.subr.bf16.mxu1 %v9397_v38  ;;  %v4788_v10 = vmax.f32 %v4633_v56, 0.0  ;;  %v9415_v56 = vld [vmem:[#allocation2 + $0x2cc] ss:$16 sps:$4 sm:$0xff]  }
 0x4b9   : > { %v4791_v3 = vmax.f32 %v4635_v59, 0.0  ;;  %v4790_v13 = vmax.f32 %v4444_v22, 0.0 }
 0x4ba   : > { %v4792_v14 = vmax.f32 %v4637_v9, 0.0  ;;  %v4905_v15 = vpack.c.bf16 %v4789_v7, %v4785_v48  ;;  %v9413_v48 = vld [vmem:[#allocation2 + $0x2c8] ss:$16 sps:$4 sm:$0xff]  }
 0x4bb   : > { %v11037_v18 = vpack.c.bf16 %v4791_v3, %v4787_v63  ;;  %v4906_v41 = vpack.c.bf16 %v4790_v13, %v4786_v8  ;;  %v4447_v19 = vpop.f32.mrb[204].mxu0  ;;  %5951 = vmatpush1.bf16.msra.mxu0 %v9392_v53  ;;  %6337 = vmatpush1.bf16.msra.mxu1 %v9395_v6  ;;  %v9418_v8 = vld [vmem:[#allocation2 + $0x2e4] ss:$16 sps:$4 sm:$0xff]  }
 0x4bc   : > { %v11039_v32 = vpack.c.bf16 %v4792_v14, %v4788_v10  ;;  %v4640_v20 = vpop.f32.mrb[204].mxu1  ;;  %v4448_v24 = vadd.f32 %v4447_v19, %v10994_v42  ;;  %v4449_v25 = vpop.f32.mrb[205].mxu0  ;;  %5952 = vmatprep.subr.bf16.mxu0 %v9400_v46  ;;  %6338 = vmatprep.subr.bf16.mxu1 %v9403_v47  ;;  %v9410_v46 = vld [vmem:[#allocation2 + $0x2c0] ss:$16 sps:$4 sm:$0xff]   ;;  %v9421_v10 = vld [vmem:[#allocation2 + $0x2ec] ss:$16 sps:$4 sm:$0xff]  }
 0x4bd   : > { %v4641_v27 = vadd.f32 %v4640_v20, %v10997_v0  ;;  %v4642_v11 = vpop.f32.mrb[205].mxu1  ;;  %v4450_v31 = vadd.f32 %v4449_v25, %v11000_v37  ;;  %v4451_v16 = vpop.f32.mrb[206].mxu0  ;;  %5803 = vmatprep.mubr.bf16.mxu0 %v4906_v41  ;;  %6189 = vmatprep.mubr.bf16.mxu1 %v4906_v41  ;;  %v9416_v25 = vld [vmem:[#allocation2 + $0x2e0] ss:$16 sps:$4 sm:$0xff]  }
 0x4be   : > { %v4643_v12 = vadd.f32 %v4642_v11, %v11003_v26  ;;  %v4644_v62 = vpop.f32.mrb[206].mxu1  ;;  %v4452_v17 = vadd.f32 %v4451_v16, %v10994_v42  ;;  %v4453_v43 = vpop.f32.mrb[207].mxu0  ;;  %5804 = vmatmul.mubr.bf16.gmra.mrb[8].mxu0 %v4905_v15  ;;  %6190 = vmatmul.mubr.bf16.gmra.mrb[8].mxu1 %v4905_v15  ;;  %v4793_v2 = vmax.f32 %v4448_v24, 0.0  ;;  %v9419_v11 = vld [vmem:[#allocation2 + $0x2e8] ss:$16 sps:$4 sm:$0xff]  }
 0x4bf   : > { %v4645_v61 = vadd.f32 %v4644_v62, %v10997_v0  ;;  %v4646_v44 = vpop.f32.mrb[207].mxu1  ;;  %v4454_v49 = vadd.f32 %v4453_v43, %v11000_v37  ;;  %5953 = vmatpush1.bf16.msra.mxu0 %v9398_v21  ;;  %6339 = vmatpush1.bf16.msra.mxu1 %v9401_v23  ;;  %v4795_v29 = vmax.f32 %v4641_v27, 0.0  ;;  %v4794_v57 = vmax.f32 %v4450_v31, 0.0  ;;  %v9427_v62 = vld [vmem:[#allocation2 + $0x30c] ss:$16 sps:$4 sm:$0xff]  }
 0x4c0   : > { %v4647_v45 = vadd.f32 %v4646_v44, %v11003_v26  ;;  %v4797_v38 = vmax.f32 %v4452_v17, 0.0  ;;  %5954 = vmatprep.subr.bf16.mxu0 %v9406_v50  ;;  %6340 = vmatprep.subr.bf16.mxu1 %v9409_v35  ;;  %v4796_v60 = vmax.f32 %v4643_v12, 0.0  ;;  %v9424_v50 = vld [vmem:[#allocation2 + $0x304] ss:$16 sps:$4 sm:$0xff]  }
 0x4c1   : > { %v4799_v39 = vmax.f32 %v4645_v61, 0.0  ;;  %v4798_v58 = vmax.f32 %v4454_v49, 0.0 }
 0x4c2   : > { %v4800_v59 = vmax.f32 %v4647_v45, 0.0  ;;  %v4909_v30 = vpack.c.bf16 %v4797_v38, %v4793_v2  ;;  %v9425_v38 = vld [vmem:[#allocation2 + $0x308] ss:$16 sps:$4 sm:$0xff]  }
 0x4c3   : > { %v11049_v28 = vpack.c.bf16 %v4799_v39, %v4795_v29  ;;  %v4910_v22 = vpack.c.bf16 %v4798_v58, %v4794_v57  ;;  %v4457_v53 = vpop.f32.mrb[208].mxu0  ;;  %5955 = vmatpush1.bf16.msra.mxu0 %v9404_v34  ;;  %6341 = vmatpush1.bf16.msra.mxu1 %v9407_v40  ;;  %v9422_v29 = vld [vmem:[#allocation2 + $0x300] ss:$16 sps:$4 sm:$0xff]   ;;  %v9430_v58 = vld [vmem:[#allocation2 + $0x324] ss:$16 sps:$4 sm:$0xff]  }
 0x4c4   : > { %v11051_v9 = vpack.c.bf16 %v4800_v59, %v4796_v60  ;;  %v4650_v6 = vpop.f32.mrb[208].mxu1  ;;  %v4458_v63 = vadd.f32 %v4457_v53, %v10994_v42  ;;  %v4459_v3 = vpop.f32.mrb[209].mxu0  ;;  %5956 = vmatprep.subr.bf16.mxu0 %v9412_v36  ;;  %6342 = vmatprep.subr.bf16.mxu1 %v9415_v56  ;;  %v9433_v59 = vld [vmem:[#allocation2 + $0x32c] ss:$16 sps:$4 sm:$0xff]  }
 0x4c5   : > { %v4651_v7 = vadd.f32 %v4650_v6, %v10997_v0  ;;  %v4652_v47 = vpop.f32.mrb[209].mxu1  ;;  %v4460_v13 = vadd.f32 %v4459_v3, %v11000_v37  ;;  %v4461_v15 = vpop.f32.mrb[210].mxu0  ;;  %5813 = vmatprep.mubr.bf16.mxu0 %v4910_v22  ;;  %6199 = vmatprep.mubr.bf16.mxu1 %v4910_v22 }
 0x4c6   : > { %v4653_v14 = vadd.f32 %v4652_v47, %v11003_v26  ;;  %v4654_v41 = vpop.f32.mrb[210].mxu1  ;;  %v4462_v19 = vadd.f32 %v4461_v15, %v10994_v42  ;;  %v4463_v21 = vpop.f32.mrb[211].mxu0  ;;  %5814 = vmatmul.mubr.bf16.gmra.mrb[12].mxu0 %v4909_v30  ;;  %6200 = vmatmul.mubr.bf16.gmra.mrb[12].mxu1 %v4909_v30  ;;  %v4801_v35 = vmax.f32 %v4458_v63, 0.0 }
 0x4c7   : > { %v4655_v20 = vadd.f32 %v4654_v41, %v10997_v0  ;;  %v4656_v23 = vpop.f32.mrb[211].mxu1  ;;  %v4464_v24 = vadd.f32 %v4463_v21, %v11000_v37  ;;  %5957 = vmatpush1.bf16.msra.mxu0 %v9410_v46  ;;  %6343 = vmatpush1.bf16.msra.mxu1 %v9413_v48  ;;  %v4803_v31 = vmax.f32 %v4651_v7, 0.0  ;;  %v4802_v17 = vmax.f32 %v4460_v13, 0.0  ;;  %v9436_v13 = vld [vmem:[#allocation2 + $0x344] ss:$16 sps:$4 sm:$0xff]  }
 0x4c8   : > { %v4657_v27 = vadd.f32 %v4656_v23, %v11003_v26  ;;  %v4805_v12 = vmax.f32 %v4462_v19, 0.0  ;;  %5958 = vmatprep.subr.bf16.mxu0 %v9418_v8  ;;  %6344 = vmatprep.subr.bf16.mxu1 %v9421_v10  ;;  %v4804_v61 = vmax.f32 %v4653_v14, 0.0  ;;  %v9428_v8 = vld [vmem:[#allocation2 + $0x320] ss:$16 sps:$4 sm:$0xff]   ;;  %v9431_v10 = vld [vmem:[#allocation2 + $0x328] ss:$16 sps:$4 sm:$0xff]  }
 0x4c9   : > { %v4807_v16 = vmax.f32 %v4655_v20, 0.0  ;;  %v4806_v43 = vmax.f32 %v4464_v24, 0.0  ;;  %v9439_v20 = vld [vmem:[#allocation2 + $0x34c] ss:$16 sps:$4 sm:$0xff]  }
 0x4ca   : > { %v4808_v44 = vmax.f32 %v4657_v27, 0.0  ;;  %v4913_v49 = vpack.c.bf16 %v4805_v12, %v4801_v35 }
 0x4cb   : > { %v11061_v45 = vpack.c.bf16 %v4807_v16, %v4803_v31  ;;  %v4914_v34 = vpack.c.bf16 %v4806_v43, %v4802_v17  ;;  %v4467_v36 = vpop.f32.mrb[212].mxu0  ;;  %5959 = vmatpush1.bf16.msra.mxu0 %v9416_v25  ;;  %6345 = vmatpush1.bf16.msra.mxu1 %v9419_v11  ;;  %v9434_v16 = vld [vmem:[#allocation2 + $0x340] ss:$16 sps:$4 sm:$0xff]  }
 0x4cc   : > { %v11063_v40 = vpack.c.bf16 %v4808_v44, %v4804_v61  ;;  %v4660_v2 = vpop.f32.mrb[212].mxu1  ;;  %v4468_v39 = vadd.f32 %v4467_v36, %v10994_v42  ;;  %v4469_v57 = vpop.f32.mrb[213].mxu0  ;;  %5960 = vmatprep.subr.bf16.mxu0 %v9424_v50  ;;  %6346 = vmatprep.subr.bf16.mxu1 %v9427_v62  ;;  %v9437_v62 = vld [vmem:[#allocation2 + $0x348] ss:$16 sps:$4 sm:$0xff]  }
 0x4cd   : > { %v4661_v56 = vadd.f32 %v4660_v2, %v10997_v0  ;;  %v4662_v60 = vpop.f32.mrb[213].mxu1  ;;  %v4470_v30 = vadd.f32 %v4469_v57, %v11000_v37  ;;  %v4471_v53 = vpop.f32.mrb[214].mxu0  ;;  %5823 = vmatprep.mubr.bf16.mxu0 %v4914_v34  ;;  %6209 = vmatprep.mubr.bf16.mxu1 %v4914_v34  ;;  %v9445_v34 = vld [vmem:[#allocation2 + $0x36c] ss:$16 sps:$4 sm:$0xff]  }
 0x4ce   : > { %v4663_v22 = vadd.f32 %v4662_v60, %v11003_v26  ;;  %v4664_v6 = vpop.f32.mrb[214].mxu1  ;;  %v4472_v46 = vadd.f32 %v4471_v53, %v10994_v42  ;;  %v4473_v63 = vpop.f32.mrb[215].mxu0  ;;  %5824 = vmatmul.mubr.bf16.gmra.mrb[16].mxu0 %v4913_v49  ;;  %6210 = vmatmul.mubr.bf16.gmra.mrb[16].mxu1 %v4913_v49  ;;  %v4809_v14 = vmax.f32 %v4468_v39, 0.0  ;;  %v9442_v49 = vld [vmem:[#allocation2 + $0x364] ss:$16 sps:$4 sm:$0xff]  }
 0x4cf   : > { %v4665_v48 = vadd.f32 %v4664_v6, %v10997_v0  ;;  %v4666_v7 = vpop.f32.mrb[215].mxu1  ;;  %v4474_v3 = vadd.f32 %v4473_v63, %v11000_v37  ;;  %5961 = vmatpush1.bf16.msra.mxu0 %v9422_v29  ;;  %6347 = vmatpush1.bf16.msra.mxu1 %v9425_v38  ;;  %v4811_v15 = vmax.f32 %v4661_v56, 0.0  ;;  %v4810_v21 = vmax.f32 %v4470_v30, 0.0  ;;  %v9440_v30 = vld [vmem:[#allocation2 + $0x360] ss:$16 sps:$4 sm:$0xff]  }
 0x4d0   : > { %v4667_v47 = vadd.f32 %v4666_v7, %v11003_v26  ;;  %v4813_v41 = vmax.f32 %v4472_v46, 0.0  ;;  %5962 = vmatprep.subr.bf16.mxu0 %v9430_v58  ;;  %6348 = vmatprep.subr.bf16.mxu1 %v9433_v59  ;;  %v4812_v23 = vmax.f32 %v4663_v22, 0.0  ;;  %v9443_v22 = vld [vmem:[#allocation2 + $0x368] ss:$16 sps:$4 sm:$0xff]   ;;  %v9448_v53 = vld [vmem:[#allocation2 + $0x384] ss:$16 sps:$4 sm:$0xff]  }
 0x4d1   : > { %v4815_v19 = vmax.f32 %v4665_v48, 0.0  ;;  %v4814_v24 = vmax.f32 %v4474_v3, 0.0  ;;  %v9451_v7 = vld [vmem:[#allocation2 + $0x38c] ss:$16 sps:$4 sm:$0xff]  }
 0x4d2   : > { %v4816_v27 = vmax.f32 %v4667_v47, 0.0  ;;  %v4917_v25 = vpack.c.bf16 %v4813_v41, %v4809_v14 }
 0x4d3   : > { %v11073_v11 = vpack.c.bf16 %v4815_v19, %v4811_v15  ;;  %v4918_v50 = vpack.c.bf16 %v4814_v24, %v4810_v21  ;;  %v4477_v31 = vpop.f32.mrb[216].mxu0  ;;  %5963 = vmatpush1.bf16.msra.mxu0 %v9428_v8  ;;  %6349 = vmatpush1.bf16.msra.mxu1 %v9431_v10  ;;  %v9446_v21 = vld [vmem:[#allocation2 + $0x380] ss:$16 sps:$4 sm:$0xff]  }
 0x4d4   : > { %v11075_v35 = vpack.c.bf16 %v4816_v27, %v4812_v23  ;;  %v4670_v12 = vpop.f32.mrb[216].mxu1  ;;  %v4478_v17 = vadd.f32 %v4477_v31, %v10994_v42  ;;  %v4479_v43 = vpop.f32.mrb[217].mxu0  ;;  %5964 = vmatprep.subr.bf16.mxu0 %v9436_v13  ;;  %6350 = vmatprep.subr.bf16.mxu1 %v9439_v20  ;;  %v9449_v23 = vld [vmem:[#allocation2 + $0x388] ss:$16 sps:$4 sm:$0xff]   ;;  %v9454_v31 = vld [vmem:[#allocation2 + $0x3a4] ss:$16 sps:$4 sm:$0xff]  }
 0x4d5   : > { %v4671_v61 = vadd.f32 %v4670_v12, %v10997_v0  ;;  %v4672_v44 = vpop.f32.mrb[217].mxu1  ;;  %v4480_v36 = vadd.f32 %v4479_v43, %v11000_v37  ;;  %v4481_v29 = vpop.f32.mrb[218].mxu0  ;;  %5833 = vmatprep.mubr.bf16.mxu0 %v4918_v50  ;;  %6219 = vmatprep.mubr.bf16.mxu1 %v4918_v50  ;;  %v9457_v12 = vld [vmem:[#allocation2 + $0x3ac] ss:$16 sps:$4 sm:$0xff]  }
 0x4d6   : > { %v4673_v2 = vadd.f32 %v4672_v44, %v11003_v26  ;;  %v4674_v38 = vpop.f32.mrb[218].mxu1  ;;  %v4482_v39 = vadd.f32 %v4481_v29, %v10994_v42  ;;  %v4483_v57 = vpop.f32.mrb[219].mxu0  ;;  %5834 = vmatmul.mubr.bf16.gmra.mrb[20].mxu0 %v4917_v25  ;;  %6220 = vmatmul.mubr.bf16.gmra.mrb[20].mxu1 %v4917_v25  ;;  %v4817_v6 = vmax.f32 %v4478_v17, 0.0  ;;  %v9452_v29 = vld [vmem:[#allocation2 + $0x3a0] ss:$16 sps:$4 sm:$0xff]  }
 0x4d7   : > { %v4675_v56 = vadd.f32 %v4674_v38, %v10997_v0  ;;  %v4676_v60 = vpop.f32.mrb[219].mxu1  ;;  %v4484_v58 = vadd.f32 %v4483_v57, %v11000_v37  ;;  %5965 = vmatpush1.bf16.msra.mxu0 %v9434_v16  ;;  %6351 = vmatpush1.bf16.msra.mxu1 %v9437_v62  ;;  %v4819_v46 = vmax.f32 %v4671_v61, 0.0  ;;  %v4818_v3 = vmax.f32 %v4480_v36, 0.0  ;;  %v9455_v38 = vld [vmem:[#allocation2 + $0x3a8] ss:$16 sps:$4 sm:$0xff]  }
 0x4d8   : > { %v4677_v59 = vadd.f32 %v4676_v60, %v11003_v26  ;;  %v4821_v48 = vmax.f32 %v4482_v39, 0.0  ;;  %5966 = vmatprep.subr.bf16.mxu0 %v9442_v49  ;;  %6352 = vmatprep.subr.bf16.mxu1 %v9445_v34  ;;  %v4820_v47 = vmax.f32 %v4673_v2, 0.0  ;;  %v9460_v39 = vld [vmem:[#allocation2 + $0x3c4] ss:$16 sps:$4 sm:$0xff]  }
 0x4d9   : > { %v4823_v63 = vmax.f32 %v4675_v56, 0.0  ;;  %v4822_v8 = vmax.f32 %v4484_v58, 0.0 }
 0x4da   : > { %v4824_v10 = vmax.f32 %v4677_v59, 0.0  ;;  %v4921_v13 = vpack.c.bf16 %v4821_v48, %v4817_v6  ;;  %v9463_v59 = vld [vmem:[#allocation2 + $0x3cc] ss:$16 sps:$4 sm:$0xff]  }
 0x4db   : > { %v11085_v14 = vpack.c.bf16 %v4823_v63, %v4819_v46  ;;  %v4922_v15 = vpack.c.bf16 %v4822_v8, %v4818_v3  ;;  %v4487_v19 = vpop.f32.mrb[220].mxu0  ;;  %5967 = vmatpush1.bf16.msra.mxu0 %v9440_v30  ;;  %6353 = vmatpush1.bf16.msra.mxu1 %v9443_v22  ;;  %v9458_v8 = vld [vmem:[#allocation2 + $0x3c0] ss:$16 sps:$4 sm:$0xff]  }
 0x4dc   : > { %v11087_v41 = vpack.c.bf16 %v4824_v10, %v4820_v47  ;;  %v4680_v20 = vpop.f32.mrb[220].mxu1  ;;  %v4488_v24 = vadd.f32 %v4487_v19, %v10994_v42  ;;  %v4489_v25 = vpop.f32.mrb[221].mxu0  ;;  %5968 = vmatprep.subr.bf16.mxu0 %v9448_v53  ;;  %6354 = vmatprep.subr.bf16.mxu1 %v9451_v7  ;;  %v9461_v10 = vld [vmem:[#allocation2 + $0x3c8] ss:$16 sps:$4 sm:$0xff]  }
 0x4dd   : > { %v4681_v27 = vadd.f32 %v4680_v20, %v10997_v0  ;;  %v4682_v50 = vpop.f32.mrb[221].mxu1  ;;  %v4490_v16 = vadd.f32 %v4489_v25, %v11000_v37  ;;  %v4491_v17 = vpop.f32.mrb[222].mxu0  ;;  %5843 = vmatprep.mubr.bf16.mxu0 %v4922_v15  ;;  %6229 = vmatprep.mubr.bf16.mxu1 %v4922_v15 }
 0x4de   : > { %v4683_v62 = vadd.f32 %v4682_v50, %v11003_v26  ;;  %v4684_v61 = vpop.f32.mrb[222].mxu1  ;;  %v4492_v43 = vadd.f32 %v4491_v17, %v10994_v42  ;;  %v4493_v49 = vpop.f32.mrb[223].mxu0  ;;  %5844 = vmatmul.mubr.bf16.gmra.mrb[24].mxu0 %v4921_v13  ;;  %6230 = vmatmul.mubr.bf16.gmra.mrb[24].mxu1 %v4921_v13  ;;  %v4825_v56 = vmax.f32 %v4488_v24, 0.0 }
 0x4df   : > { %v4685_v44 = vadd.f32 %v4684_v61, %v10997_v0  ;;  %v4686_v34 = vpop.f32.mrb[223].mxu1  ;;  %v4494_v36 = vadd.f32 %v4493_v49, %v11000_v37  ;;  %5969 = vmatpush1.bf16.msra.mxu0 %v9446_v21  ;;  %6355 = vmatpush1.bf16.msra.mxu1 %v9449_v23  ;;  %v4827_v57 = vmax.f32 %v4681_v27, 0.0  ;;  %v4826_v30 = vmax.f32 %v4490_v16, 0.0  ;;  %v9466_v21 = vld [vmem:[#allocation2 + $0x3e4] ss:$16 sps:$4 sm:$0xff]  }
 0x4e0   : > { %v4687_v2 = vadd.f32 %v4686_v34, %v11003_v26  ;;  %v4829_v60 = vmax.f32 %v4492_v43, 0.0  ;;  %5970 = vmatprep.subr.bf16.mxu0 %v9454_v31  ;;  %6356 = vmatprep.subr.bf16.mxu1 %v9457_v12  ;;  %v4828_v22 = vmax.f32 %v4683_v62, 0.0  ;;  %v9469_v23 = vld [vmem:[#allocation2 + $0x3ec] ss:$16 sps:$4 sm:$0xff]   ;;  %v9464_v43 = vld [vmem:[#allocation2 + $0x3e0] ss:$16 sps:$4 sm:$0xff]  }
 0x4e1   : > { %v4831_v58 = vmax.f32 %v4685_v44, 0.0  ;;  %v4830_v53 = vmax.f32 %v4494_v36, 0.0  ;;  %v9467_v44 = vld [vmem:[#allocation2 + $0x3e8] ss:$16 sps:$4 sm:$0xff]  }
 0x4e2   : > { %v4832_v6 = vmax.f32 %v4687_v2, 0.0  ;;  %v4925_v46 = vpack.c.bf16 %v4829_v60, %v4825_v56 }
 0x4e3   : > { %v11097_v48 = vpack.c.bf16 %v4831_v58, %v4827_v57  ;;  %v4926_v63 = vpack.c.bf16 %v4830_v53, %v4826_v30  ;;  %v4497_v3 = vpop.f32.mrb[224].mxu0  ;;  %5971 = vmatpush1.bf16.msra.mxu0 %v9452_v29  ;;  %6357 = vmatpush1.bf16.msra.mxu1 %v9455_v38 }
 0x4e4   : > { %v11099_v7 = vpack.c.bf16 %v4832_v6, %v4828_v22  ;;  %v4690_v47 = vpop.f32.mrb[224].mxu1  ;;  %v4498_v13 = vadd.f32 %v4497_v3, %v10994_v42  ;;  %v4499_v19 = vpop.f32.mrb[225].mxu0  ;;  %5972 = vmatprep.subr.bf16.mxu0 %v9460_v39  ;;  %6358 = vmatprep.subr.bf16.mxu1 %v9463_v59 }
 0x4e5   : > { %v4691_v15 = vadd.f32 %v4690_v47, %v10997_v0  ;;  %v4692_v20 = vpop.f32.mrb[225].mxu1  ;;  %v4500_v24 = vadd.f32 %v4499_v19, %v11000_v37  ;;  %v4501_v25 = vpop.f32.mrb[226].mxu0  ;;  %5853 = vmatprep.mubr.bf16.mxu0 %v4926_v63  ;;  %6239 = vmatprep.mubr.bf16.mxu1 %v4926_v63 }
 0x4e6   : > { %v4693_v27 = vadd.f32 %v4692_v20, %v11003_v26  ;;  %v4694_v50 = vpop.f32.mrb[226].mxu1  ;;  %v4502_v31 = vadd.f32 %v4501_v25, %v10994_v42  ;;  %v4503_v16 = vpop.f32.mrb[227].mxu0  ;;  %5854 = vmatmul.mubr.bf16.gmra.mrb[28].mxu0 %v4925_v46  ;;  %6240 = vmatmul.mubr.bf16.gmra.mrb[28].mxu1 %v4925_v46  ;;  %v4833_v49 = vmax.f32 %v4498_v13, 0.0 }
 0x4e7   : > { %v4695_v12 = vadd.f32 %v4694_v50, %v10997_v0  ;;  %v4696_v62 = vpop.f32.mrb[227].mxu1  ;;  %v4504_v17 = vadd.f32 %v4503_v16, %v11000_v37  ;;  %5973 = vmatpush1.bf16.msra.mxu0 %v9458_v8  ;;  %6359 = vmatpush1.bf16.msra.mxu1 %v9461_v10  ;;  %v4835_v34 = vmax.f32 %v4691_v15, 0.0  ;;  %v4834_v29 = vmax.f32 %v4500_v24, 0.0 }
 0x4e8   : > { %v4697_v61 = vadd.f32 %v4696_v62, %v11003_v26  ;;  %v4837_v36 = vmax.f32 %v4502_v31, 0.0  ;;  %5974 = vmatprep.subr.bf16.mxu0 %v9466_v21  ;;  %6360 = vmatprep.subr.bf16.mxu1 %v9469_v23  ;;  %v4836_v38 = vmax.f32 %v4693_v27, 0.0 }
 0x4e9   : > { %v4839_v2 = vmax.f32 %v4695_v12, 0.0  ;;  %v4838_v39 = vmax.f32 %v4504_v17, 0.0 }
 0x4ea   : > { %v4840_v56 = vmax.f32 %v4697_v61, 0.0  ;;  %v4929_v57 = vpack.c.bf16 %v4837_v36, %v4833_v49 }
 0x4eb   : > { %v11109_v60 = vpack.c.bf16 %v4839_v2, %v4835_v34  ;;  %v4930_v58 = vpack.c.bf16 %v4838_v39, %v4834_v29  ;;  %v4507_v30 = vpop.f32.mrb[228].mxu0  ;;  %5975 = vmatpush1.bf16.msra.mxu0 %v9464_v43  ;;  %6361 = vmatpush1.bf16.msra.mxu1 %v9467_v44 }
 0x4ec   : > { %v11111_v59 = vpack.c.bf16 %v4840_v56, %v4836_v38  ;;  %v4700_v22 = vpop.f32.mrb[228].mxu1  ;;  %v4508_v53 = vadd.f32 %v4507_v30, %v10994_v42  ;;  %v4509_v46 = vpop.f32.mrb[229].mxu0 }
 0x4ed   : > { %v4701_v6 = vadd.f32 %v4700_v22, %v10997_v0  ;;  %v4702_v63 = vpop.f32.mrb[229].mxu1  ;;  %v4510_v3 = vadd.f32 %v4509_v46, %v11000_v37  ;;  %v4511_v8 = vpop.f32.mrb[230].mxu0  ;;  %5863 = vmatprep.mubr.bf16.mxu0 %v4930_v58  ;;  %6249 = vmatprep.mubr.bf16.mxu1 %v4930_v58 }
 0x4ee   : > { %v4703_v47 = vadd.f32 %v4702_v63, %v11003_v26  ;;  %v4704_v10 = vpop.f32.mrb[230].mxu1  ;;  %v4512_v13 = vadd.f32 %v4511_v8, %v10994_v42  ;;  %v4513_v19 = vpop.f32.mrb[231].mxu0  ;;  %5864 = vmatmul.mubr.bf16.gmra.mrb[32].mxu0 %v4929_v57  ;;  %6250 = vmatmul.mubr.bf16.gmra.mrb[32].mxu1 %v4929_v57  ;;  %v4841_v24 = vmax.f32 %v4508_v53, 0.0 }
 0x4ef   : > { %v4705_v15 = vadd.f32 %v4704_v10, %v10997_v0  ;;  %v4706_v20 = vpop.f32.mrb[231].mxu1  ;;  %v4514_v21 = vadd.f32 %v4513_v19, %v11000_v37  ;;  %v4843_v27 = vmax.f32 %v4701_v6, 0.0  ;;  %v4842_v31 = vmax.f32 %v4510_v3, 0.0 }
 0x4f0   : > { %v4707_v23 = vadd.f32 %v4706_v20, %v11003_v26  ;;  %v4845_v25 = vmax.f32 %v4512_v13, 0.0  ;;  %v4844_v12 = vmax.f32 %v4703_v47, 0.0 }
 0x4f1   : > { %v4847_v50 = vmax.f32 %v4705_v15, 0.0  ;;  %v4846_v16 = vmax.f32 %v4514_v21, 0.0 }
 0x4f2   : > { %v4848_v62 = vmax.f32 %v4707_v23, 0.0  ;;  %v4933_v17 = vpack.c.bf16 %v4845_v25, %v4841_v24 }
 0x4f3   : > { %v11121_v61 = vpack.c.bf16 %v4847_v50, %v4843_v27  ;;  %v4934_v43 = vpack.c.bf16 %v4846_v16, %v4842_v31  ;;  %v4517_v49 = vpop.f32.mrb[232].mxu0 }
 0x4f4   : > { %v11123_v44 = vpack.c.bf16 %v4848_v62, %v4844_v12  ;;  %v4710_v34 = vpop.f32.mrb[232].mxu1  ;;  %v4518_v36 = vadd.f32 %v4517_v49, %v10994_v42  ;;  %v4519_v29 = vpop.f32.mrb[233].mxu0 }
 0x4f5   : > { %v4711_v2 = vadd.f32 %v4710_v34, %v10997_v0  ;;  %v4712_v38 = vpop.f32.mrb[233].mxu1  ;;  %v4520_v39 = vadd.f32 %v4519_v29, %v11000_v37  ;;  %v4521_v57 = vpop.f32.mrb[234].mxu0  ;;  %5873 = vmatprep.mubr.bf16.mxu0 %v4934_v43  ;;  %6259 = vmatprep.mubr.bf16.mxu1 %v4934_v43 }
 0x4f6   : > { %v4713_v56 = vadd.f32 %v4712_v38, %v11003_v26  ;;  %v4714_v58 = vpop.f32.mrb[234].mxu1  ;;  %v4522_v30 = vadd.f32 %v4521_v57, %v10994_v42  ;;  %v4523_v53 = vpop.f32.mrb[235].mxu0  ;;  %5874 = vmatmul.mubr.bf16.gmra.mrb[36].mxu0 %v4933_v17  ;;  %6260 = vmatmul.mubr.bf16.gmra.mrb[36].mxu1 %v4933_v17  ;;  %v4849_v3 = vmax.f32 %v4518_v36, 0.0 }
 0x4f7   : > { %v4715_v22 = vadd.f32 %v4714_v58, %v10997_v0  ;;  %v4716_v6 = vpop.f32.mrb[235].mxu1  ;;  %v4524_v46 = vadd.f32 %v4523_v53, %v11000_v37  ;;  %v4851_v47 = vmax.f32 %v4711_v2, 0.0  ;;  %v4850_v13 = vmax.f32 %v4520_v39, 0.0 }
 0x4f8   : > { %v4717_v63 = vadd.f32 %v4716_v6, %v11003_v26  ;;  %v4853_v8 = vmax.f32 %v4522_v30, 0.0  ;;  %v4852_v15 = vmax.f32 %v4713_v56, 0.0 }
 0x4f9   : > { %v4855_v10 = vmax.f32 %v4715_v22, 0.0  ;;  %v4854_v19 = vmax.f32 %v4524_v46, 0.0 }
 0x4fa   : > { %v4856_v20 = vmax.f32 %v4717_v63, 0.0  ;;  %v4937_v21 = vpack.c.bf16 %v4853_v8, %v4849_v3 }
 0x4fb   : > { %v11133_v23 = vpack.c.bf16 %v4855_v10, %v4851_v47  ;;  %v4938_v24 = vpack.c.bf16 %v4854_v19, %v4850_v13  ;;  %v4527_v25 = vpop.f32.mrb[236].mxu0 }
 0x4fc   : > { %v11135_v27 = vpack.c.bf16 %v4856_v20, %v4852_v15  ;;  %v4720_v50 = vpop.f32.mrb[236].mxu1  ;;  %v4528_v31 = vadd.f32 %v4527_v25, %v10994_v42  ;;  %v4529_v16 = vpop.f32.mrb[237].mxu0 }
 0x4fd   : > { %v4721_v12 = vadd.f32 %v4720_v50, %v10997_v0  ;;  %v4722_v62 = vpop.f32.mrb[237].mxu1  ;;  %v4530_v17 = vadd.f32 %v4529_v16, %v11000_v37  ;;  %v4531_v49 = vpop.f32.mrb[238].mxu0  ;;  %5883 = vmatprep.mubr.bf16.mxu0 %v4938_v24  ;;  %6269 = vmatprep.mubr.bf16.mxu1 %v4938_v24 }
 0x4fe   : > { %v4723_v43 = vadd.f32 %v4722_v62, %v11003_v26  ;;  %v4724_v34 = vpop.f32.mrb[238].mxu1  ;;  %v4532_v36 = vadd.f32 %v4531_v49, %v10994_v42  ;;  %v4533_v29 = vpop.f32.mrb[239].mxu0  ;;  %5884 = vmatmul.mubr.bf16.gmra.mrb[40].mxu0 %v4937_v21  ;;  %6270 = vmatmul.mubr.bf16.gmra.mrb[40].mxu1 %v4937_v21  ;;  %v4857_v57 = vmax.f32 %v4528_v31, 0.0 }
 0x4ff   : > { %v4725_v2 = vadd.f32 %v4724_v34, %v10997_v0  ;;  %v4726_v38 = vpop.f32.mrb[239].mxu1  ;;  %v4534_v39 = vadd.f32 %v4533_v29, %v11000_v37  ;;  %v4859_v58 = vmax.f32 %v4721_v12, 0.0  ;;  %v4858_v53 = vmax.f32 %v4530_v17, 0.0 }
 0x500   : > { %v4727_v56 = vadd.f32 %v4726_v38, %v11003_v26  ;;  %v4861_v30 = vmax.f32 %v4532_v36, 0.0  ;;  %v4860_v6 = vmax.f32 %v4723_v43, 0.0  ;;  %v9470_v36 = vld [vmem:[%s11623_s13 + $0x40] sm:$0xff]  }
 0x501   : > { %v4863_v22 = vmax.f32 %v4725_v2, 0.0  ;;  %v4862_v46 = vmax.f32 %v4534_v39, 0.0  ;;  %8152 = vmatprep.subr.bf16.mxu0 %v9470_v36 }
 0x502   : > { %v4864_v63 = vmax.f32 %v4727_v56, 0.0  ;;  %v4941_v3 = vpack.c.bf16 %v4861_v30, %v4857_v57 }
 0x503   : > { %v11145_v47 = vpack.c.bf16 %v4863_v22, %v4859_v58  ;;  %v4942_v8 = vpack.c.bf16 %v4862_v46, %v4858_v53  ;;  %v4537_v13 = vpop.f32.mrb[240].mxu0 }
 0x504   : > { %v11147_v10 = vpack.c.bf16 %v4864_v63, %v4860_v6  ;;  %v4730_v15 = vpop.f32.mrb[240].mxu1  ;;  %v4538_v19 = vadd.f32 %v4537_v13, %v10994_v42  ;;  %v4539_v21 = vpop.f32.mrb[241].mxu0 }
 0x505   : > { %v4731_v20 = vadd.f32 %v4730_v15, %v10997_v0  ;;  %v4732_v24 = vpop.f32.mrb[241].mxu1  ;;  %v4540_v25 = vadd.f32 %v4539_v21, %v11000_v37  ;;  %v4541_v31 = vpop.f32.mrb[242].mxu0  ;;  %5893 = vmatprep.mubr.bf16.mxu0 %v4942_v8  ;;  %6279 = vmatprep.mubr.bf16.mxu1 %v4942_v8 }
 0x506   : > { %v4733_v50 = vadd.f32 %v4732_v24, %v11003_v26  ;;  %v4734_v12 = vpop.f32.mrb[242].mxu1  ;;  %v4542_v16 = vadd.f32 %v4541_v31, %v10994_v42  ;;  %v4543_v17 = vpop.f32.mrb[243].mxu0  ;;  %5894 = vmatmul.mubr.bf16.gmra.mrb[44].mxu0 %v4941_v3  ;;  %6280 = vmatmul.mubr.bf16.gmra.mrb[44].mxu1 %v4941_v3  ;;  %v4865_v2 = vmax.f32 %v4538_v19, 0.0 }
 0x507   : > { %v4735_v62 = vadd.f32 %v4734_v12, %v10997_v0  ;;  %v4736_v43 = vpop.f32.mrb[243].mxu1  ;;  %v4544_v49 = vadd.f32 %v4543_v17, %v11000_v37  ;;  %v4867_v29 = vmax.f32 %v4731_v20, 0.0  ;;  %v4866_v56 = vmax.f32 %v4540_v25, 0.0 }
 0x508   : > { %v4737_v34 = vadd.f32 %v4736_v43, %v11003_v26  ;;  %v4869_v38 = vmax.f32 %v4542_v16, 0.0  ;;  %v4868_v57 = vmax.f32 %v4733_v50, 0.0 }
 0x509   : > { %v4871_v39 = vmax.f32 %v4735_v62, 0.0  ;;  %v4870_v58 = vmax.f32 %v4544_v49, 0.0  ;;  %v9472_v62 = vld [vmem:[%s11623_s13 + $0xc0] sm:$0xff]  }
 0x50a   : > { %v4872_v30 = vmax.f32 %v4737_v34, 0.0  ;;  %v4945_v22 = vpack.c.bf16 %v4869_v38, %v4865_v2  ;;  %8264 = vmatprep.subr.bf16.mxu1 %v9472_v62 }
 0x50b   : > { %v11160_v53 = vpack.c.bf16 %v4871_v39, %v4867_v29  ;;  %v4946_v6 = vpack.c.bf16 %v4870_v58, %v4866_v56  ;;  %v4547_v63 = vpop.f32.mrb[244].mxu0 }
 0x50c   : > { %v11162_v46 = vpack.c.bf16 %v4872_v30, %v4868_v57  ;;  %v4740_v3 = vpop.f32.mrb[244].mxu1  ;;  %v4548_v8 = vadd.f32 %v4547_v63, %v10994_v42  ;;  %v4549_v15 = vpop.f32.mrb[245].mxu0 }
 0x50d   : > { %v4741_v13 = vadd.f32 %v4740_v3, %v10997_v0  ;;  %v4742_v19 = vpop.f32.mrb[245].mxu1  ;;  %v4550_v20 = vadd.f32 %v4549_v15, %v11000_v37  ;;  %v4551_v24 = vpop.f32.mrb[246].mxu0  ;;  %5903 = vmatprep.mubr.bf16.mxu0 %v4946_v6  ;;  %6289 = vmatprep.mubr.bf16.mxu1 %v4946_v6 }
 0x50e   : > { %v4743_v21 = vadd.f32 %v4742_v19, %v11003_v26  ;;  %v4744_v25 = vpop.f32.mrb[246].mxu1  ;;  %v4552_v50 = vadd.f32 %v4551_v24, %v10994_v42  ;;  %v4553_v12 = vpop.f32.mrb[247].mxu0  ;;  %5904 = vmatmul.mubr.bf16.gmra.mrb[48].mxu0 %v4945_v22  ;;  %6290 = vmatmul.mubr.bf16.gmra.mrb[48].mxu1 %v4945_v22  ;;  %v4873_v49 = vmax.f32 %v4548_v8, 0.0 }
 0x50f   : > { %v4745_v31 = vadd.f32 %v4744_v25, %v10997_v0  ;;  %v4746_v16 = vpop.f32.mrb[247].mxu1  ;;  %v4554_v17 = vadd.f32 %v4553_v12, %v11000_v37  ;;  %v4875_v34 = vmax.f32 %v4741_v13, 0.0  ;;  %v4874_v29 = vmax.f32 %v4550_v20, 0.0 }
 0x510   : > { %v4747_v43 = vadd.f32 %v4746_v16, %v11003_v26  ;;  %v4877_v36 = vmax.f32 %v4552_v50, 0.0  ;;  %v4876_v38 = vmax.f32 %v4743_v21, 0.0 }
 0x511   : > { %v4879_v2 = vmax.f32 %v4745_v31, 0.0  ;;  %v4878_v39 = vmax.f32 %v4554_v17, 0.0 }
 0x512   : > { %v4880_v56 = vmax.f32 %v4747_v43, 0.0  ;;  %v4949_v57 = vpack.c.bf16 %v4877_v36, %v4873_v49 }
 0x513   : > { %v11175_v58 = vpack.c.bf16 %v4879_v2, %v4875_v34  ;;  %v4950_v30 = vpack.c.bf16 %v4878_v39, %v4874_v29  ;;  %v4557_v6 = vpop.f32.mrb[248].mxu0 }
 0x514   : > { %v11177_v22 = vpack.c.bf16 %v4880_v56, %v4876_v38  ;;  %v4750_v63 = vpop.f32.mrb[248].mxu1  ;;  %v4558_v3 = vadd.f32 %v4557_v6, %v10994_v42  ;;  %v4559_v13 = vpop.f32.mrb[249].mxu0 }
 0x515   : > { %v4751_v8 = vadd.f32 %v4750_v63, %v10997_v0  ;;  %v4752_v15 = vpop.f32.mrb[249].mxu1  ;;  %v4560_v19 = vadd.f32 %v4559_v13, %v11000_v37  ;;  %v4561_v21 = vpop.f32.mrb[250].mxu0  ;;  %5913 = vmatprep.mubr.bf16.mxu0 %v4950_v30  ;;  %6299 = vmatprep.mubr.bf16.mxu1 %v4950_v30 }
 0x516   : > { %v4753_v20 = vadd.f32 %v4752_v15, %v11003_v26  ;;  %v4754_v24 = vpop.f32.mrb[250].mxu1  ;;  %v4562_v25 = vadd.f32 %v4561_v21, %v10994_v42  ;;  %v4563_v31 = vpop.f32.mrb[251].mxu0  ;;  %5914 = vmatmul.mubr.bf16.gmra.mrb[52].mxu0 %v4949_v57  ;;  %6300 = vmatmul.mubr.bf16.gmra.mrb[52].mxu1 %v4949_v57  ;;  %v4881_v17 = vmax.f32 %v4558_v3, 0.0 }
 0x517   : > { %v4755_v50 = vadd.f32 %v4754_v24, %v10997_v0  ;;  %v4756_v12 = vpop.f32.mrb[251].mxu1  ;;  %v4564_v16 = vadd.f32 %v4563_v31, %v11000_v37  ;;  %v4883_v43 = vmax.f32 %v4751_v8, 0.0  ;;  %v4882_v36 = vmax.f32 %v4560_v19, 0.0 }
 0x518   : > { %v4757_v62 = vadd.f32 %v4756_v12, %v11003_v26  ;;  %v4885_v49 = vmax.f32 %v4562_v25, 0.0  ;;  %v4884_v2 = vmax.f32 %v4753_v20, 0.0 }
 0x519   : > { %v4887_v34 = vmax.f32 %v4755_v50, 0.0  ;;  %v4886_v29 = vmax.f32 %v4564_v16, 0.0 }
 0x51a   : > { %v4888_v38 = vmax.f32 %v4757_v62, 0.0  ;;  %v4953_v39 = vpack.c.bf16 %v4885_v49, %v4881_v17 }
 0x51b   : > { %v11187_v56 = vpack.c.bf16 %v4887_v34, %v4883_v43  ;;  %v4954_v30 = vpack.c.bf16 %v4886_v29, %v4882_v36  ;;  %v4567_v63 = vpop.f32.mrb[252].mxu0 }
 0x51c   : > { %v11189_v6 = vpack.c.bf16 %v4888_v38, %v4884_v2  ;;  %v4760_v57 = vpop.f32.mrb[252].mxu1  ;;  %v4568_v13 = vadd.f32 %v4567_v63, %v10994_v42  ;;  %v4569_v3 = vpop.f32.mrb[253].mxu0 }
 0x51d   : > { %v4761_v15 = vadd.f32 %v4760_v57, %v10997_v0  ;;  %v4762_v8 = vpop.f32.mrb[253].mxu1  ;;  %v4570_v21 = vadd.f32 %v4569_v3, %v11000_v37  ;;  %v4571_v20 = vpop.f32.mrb[254].mxu0  ;;  %5923 = vmatprep.mubr.bf16.mxu0 %v4954_v30  ;;  %6309 = vmatprep.mubr.bf16.mxu1 %v4954_v30  ;;  %v9476_v57 = vld [vmem:[%s11623_s13 + $0xc8] sm:$0xff]   ;;  %v9481_v3 = vld [vmem:[%s11623_s13 + $0x90] sm:$0xff]  }
 0x51e   : > { %v4763_v19 = vadd.f32 %v4762_v8, %v11003_v26  ;;  %v4764_v24 = vpop.f32.mrb[254].mxu1  ;;  %v4572_v25 = vadd.f32 %v4571_v20, %v10994_v42  ;;  %v4573_v31 = vpop.f32.mrb[255].mxu0  ;;  %5924 = vmatmul.mubr.bf16.gmra.mrb[56].mxu0 %v4953_v39  ;;  %6310 = vmatmul.mubr.bf16.gmra.mrb[56].mxu1 %v4953_v39  ;;  %v4889_v17 = vmax.f32 %v4568_v13, 0.0  ;;  %v9474_v39 = vld [vmem:[%s11623_s13 + $0x48] sm:$0xff]   ;;  %v9482_v8 = vld [vmem:[%s11623_s13 + $0x58] sm:$0xff]  }
 0x51f   : > { %v4765_v50 = vadd.f32 %v4764_v24, %v10997_v0  ;;  %v4766_v12 = vpop.f32.mrb[255].mxu1  ;;  %v4574_v16 = vadd.f32 %v4573_v31, %v11000_v37  ;;  %v4891_v43 = vmax.f32 %v4761_v15, 0.0  ;;  %v4890_v36 = vmax.f32 %v4570_v21, 0.0  ;;  %v9471_v37 = vld [vmem:[%s11623_s13] sm:$0xff]   ;;  %v9477_v13 = vld [vmem:[%s11623_s13 + $0x88] sm:$0xff]   ;;  %v9479_v15 = vld [vmem:[%s11623_s13 + $0x10] sm:$0xff]  }
 0x520   : > { %v4767_v62 = vadd.f32 %v4766_v12, %v11003_v26  ;;  %v4893_v49 = vmax.f32 %v4572_v25, 0.0  ;;  %v4892_v2 = vmax.f32 %v4763_v19, 0.0  ;;  %v9473_v26 = vld [vmem:[%s11623_s13 + $0x80] sm:$0xff]   ;;  %v9484_v21 = vld [vmem:[%s11623_s13 + $0xd8] sm:$0xff]   ;;  %v9492_v31 = vld [vmem:[%s11623_s13 + $0xe8] sm:$0xff]  }
 0x521   : > { %v4895_v34 = vmax.f32 %v4765_v50, 0.0  ;;  %v4894_v29 = vmax.f32 %v4574_v16, 0.0  ;;  %v9483_v19 = vld [vmem:[%s11623_s13 + $0x18] sm:$0xff]   ;;  %v9487_v24 = vld [vmem:[%s11623_s13 + $0x20] sm:$0xff]   ;;  %v9490_v50 = vld [vmem:[%s11623_s13 + $0x68] sm:$0xff]  }
 0x522   : > { %v4896_v38 = vmax.f32 %v4767_v62, 0.0  ;;  %v4957_v30 = vpack.c.bf16 %v4893_v49, %v4889_v17  ;;  %v9485_v20 = vld [vmem:[%s11623_s13 + $0x98] sm:$0xff]   ;;  %v9489_v25 = vld [vmem:[%s11623_s13 + $0xa0] sm:$0xff]   ;;  %v9491_v12 = vld [vmem:[%s11623_s13 + $0x28] sm:$0xff]  }
 0x523   : > { %v11199_v42 = vpack.c.bf16 %v4895_v34, %v4891_v43  ;;  %v4958_v0 = vpack.c.bf16 %v4894_v29, %v4890_v36  ;;  %v9493_v16 = vld [vmem:[%s11623_s13 + $0xa8] sm:$0xff]   ;;  %v9495_v62 = vld [vmem:[%s11623_s13 + $0x30] sm:$0xff]   ;;  %v9498_v43 = vld [vmem:[%s11623_s13 + $0x78] sm:$0xff]  }
 0x524   : > { %v11201_v63 = vpack.c.bf16 %v4896_v38, %v4892_v2  ;;  %v9497_v17 = vld [vmem:[%s11623_s13 + $0xb0] sm:$0xff]   ;;  %v9500_v49 = vld [vmem:[%s11623_s13 + $0xf8] sm:$0xff]  }
 0x525   : > { %5933 = vmatprep.mubr.bf16.mxu0 %v4958_v0  ;;  %6319 = vmatprep.mubr.bf16.mxu1 %v4958_v0  ;;  %v9499_v34 = vld [vmem:[%s11623_s13 + $0x38] sm:$0xff]  }
 0x526   : > { %5934 = vmatmul.mubr.bf16.gmra.mrb[60].mxu0 %v4957_v30  ;;  %6320 = vmatmul.mubr.bf16.gmra.mrb[60].mxu1 %v4957_v30  ;;  %v9501_v36 = vld [vmem:[%s11623_s13 + $0xb8] sm:$0xff]  }
 0x527   : > { %5976 = vmatprep.mubr.bf16.mxu0 %v11015_v1  ;;  %6362 = vmatprep.mubr.bf16.mxu1 %v11015_v1  ;;  %v9475_v1 = vld [vmem:[%s11623_s13 + $0x8] sm:$0xff]  }
 0x52e   : > { %5977 = vmatmul.mubr.bf16.vlgmr.msra.gmra.mrb[0].mxu0 %v11013_v33  ;;  %6363 = vmatmul.mubr.bf16.vlgmr.msra.gmra.mrb[0].mxu1 %v11013_v33  ;;  %v9478_v33 = vld [vmem:[%s11623_s13 + $0x50] sm:$0xff]  }
 0x52f   : > { %5986 = vmatprep.mubr.bf16.mxu0 %v11027_v5  ;;  %6372 = vmatprep.mubr.bf16.mxu1 %v11027_v5  ;;  %v9480_v5 = vld [vmem:[%s11623_s13 + $0xd0] sm:$0xff]  }
 0x530   : > { %8153 = vmatpush3.bf16.msra.mxu0 %v9471_v37  ;;  %8265 = vmatpush3.bf16.msra.mxu1 %v9473_v26 }
 0x531   : > { %8154 = vmatprep.subr.bf16.mxu0 %v9474_v39  ;;  %8266 = vmatprep.subr.bf16.mxu1 %v9476_v57 }
 0x534   : > { %8155 = vmatpush3.bf16.msra.mxu0 %v9475_v1  ;;  %8267 = vmatpush3.bf16.msra.mxu1 %v9477_v13 }
 0x535   : > { %8156 = vmatprep.subr.bf16.mxu0 %v9478_v33  ;;  %8268 = vmatprep.subr.bf16.mxu1 %v9480_v5 }
 0x536   : > { %5987 = vmatmul.mubr.bf16.gmra.mrb[4].mxu0 %v11025_v4  ;;  %6373 = vmatmul.mubr.bf16.gmra.mrb[4].mxu1 %v11025_v4  ;;  %v9486_v4 = vld [vmem:[%s11623_s13 + $0x60] sm:$0xff]  }
 0x537   : > { %5996 = vmatprep.mubr.bf16.mxu0 %v11039_v32  ;;  %6382 = vmatprep.mubr.bf16.mxu1 %v11039_v32  ;;  %v9488_v32 = vld [vmem:[%s11623_s13 + $0xe0] sm:$0xff]  }
 0x538   : > { %8157 = vmatpush3.bf16.msra.mxu0 %v9479_v15  ;;  %8269 = vmatpush3.bf16.msra.mxu1 %v9481_v3 }
 0x539   : > { %8158 = vmatprep.subr.bf16.mxu0 %v9482_v8  ;;  %8270 = vmatprep.subr.bf16.mxu1 %v9484_v21 }
 0x53c   : > { %8159 = vmatpush3.bf16.msra.mxu0 %v9483_v19  ;;  %8271 = vmatpush3.bf16.msra.mxu1 %v9485_v20 }
 0x53d   : > { %8160 = vmatprep.subr.bf16.mxu0 %v9486_v4  ;;  %8272 = vmatprep.subr.bf16.mxu1 %v9488_v32 }
 0x53e   : > { %5997 = vmatmul.mubr.bf16.gmra.mrb[8].mxu0 %v11037_v18  ;;  %6383 = vmatmul.mubr.bf16.gmra.mrb[8].mxu1 %v11037_v18  ;;  %v9494_v18 = vld [vmem:[%s11623_s13 + $0x70] sm:$0xff]  }
 0x53f   : > { %6006 = vmatprep.mubr.bf16.mxu0 %v11051_v9  ;;  %6392 = vmatprep.mubr.bf16.mxu1 %v11051_v9  ;;  %v9496_v9 = vld [vmem:[%s11623_s13 + $0xf0] sm:$0xff]  }
 0x540   : > { %8161 = vmatpush3.bf16.msra.mxu0 %v9487_v24  ;;  %8273 = vmatpush3.bf16.msra.mxu1 %v9489_v25 }
 0x541   : > { %8162 = vmatprep.subr.bf16.mxu0 %v9490_v50  ;;  %8274 = vmatprep.subr.bf16.mxu1 %v9492_v31 }
 0x544   : > { %8163 = vmatpush3.bf16.msra.mxu0 %v9491_v12  ;;  %8275 = vmatpush3.bf16.msra.mxu1 %v9493_v16 }
 0x545   : > { %8164 = vmatprep.subr.bf16.mxu0 %v9494_v18  ;;  %8276 = vmatprep.subr.bf16.mxu1 %v9496_v9 }
 0x546   : > { %6007 = vmatmul.mubr.bf16.gmra.mrb[12].mxu0 %v11049_v28  ;;  %6393 = vmatmul.mubr.bf16.gmra.mrb[12].mxu1 %v11049_v28  ;;  %v5089_v28 = vld [vmem:[%s11622_s12] sm:$0xf] }
 0x547   : > { %6016 = vmatprep.mubr.bf16.mxu0 %v11063_v40  ;;  %6402 = vmatprep.mubr.bf16.mxu1 %v11063_v40  ;;  %v11364_v40 = vrot.slane %v5089_v28, %v10105_v52 }
 0x548   : > { %8165 = vmatpush3.bf16.msra.mxu0 %v9495_v62  ;;  %8277 = vmatpush3.bf16.msra.mxu1 %v9497_v17 }
 0x549   : > { %8166 = vmatprep.subr.bf16.mxu0 %v9498_v43  ;;  %8278 = vmatprep.subr.bf16.mxu1 %v9500_v49 }
 0x54c   : > { %8167 = vmatpush3.bf16.msra.mxu0 %v9499_v34  ;;  %8279 = vmatpush3.bf16.msra.mxu1 %v9501_v36 }
 0x54e   : > { %6017 = vmatmul.mubr.bf16.gmra.mrb[16].mxu0 %v11061_v45  ;;  %6403 = vmatmul.mubr.bf16.gmra.mrb[16].mxu1 %v11061_v45  ;;  %v11361_v45 = vrot.slane %v5089_v28, %v10103_v51 }
 0x54f   : > { %6026 = vmatprep.mubr.bf16.mxu0 %v11075_v35  ;;  %6412 = vmatprep.mubr.bf16.mxu1 %v11075_v35  ;;  %v11370_v35 = vrot.slane %v5089_v28, %v10112_v55 }
 0x556   : > { %6027 = vmatmul.mubr.bf16.gmra.mrb[20].mxu0 %v11073_v11  ;;  %6413 = vmatmul.mubr.bf16.gmra.mrb[20].mxu1 %v11073_v11  ;;  %v11367_v11 = vrot.slane %v5089_v28, %v10110_v54 }
 0x557   : > { %6036 = vmatprep.mubr.bf16.mxu0 %v11087_v41  ;;  %6422 = vmatprep.mubr.bf16.mxu1 %v11087_v41 }
 0x55e   : > { %6037 = vmatmul.mubr.bf16.gmra.mrb[24].mxu0 %v11085_v14  ;;  %6423 = vmatmul.mubr.bf16.gmra.mrb[24].mxu1 %v11085_v14 }
 0x55f   : > { %6046 = vmatprep.mubr.bf16.mxu0 %v11099_v7  ;;  %6432 = vmatprep.mubr.bf16.mxu1 %v11099_v7 }
 0x566   : > { %6047 = vmatmul.mubr.bf16.gmra.mrb[28].mxu0 %v11097_v48  ;;  %6433 = vmatmul.mubr.bf16.gmra.mrb[28].mxu1 %v11097_v48 }
 0x567   : > { %6056 = vmatprep.mubr.bf16.mxu0 %v11111_v59  ;;  %6442 = vmatprep.mubr.bf16.mxu1 %v11111_v59 }
 0x56e   : > { %6057 = vmatmul.mubr.bf16.gmra.mrb[32].mxu0 %v11109_v60  ;;  %6443 = vmatmul.mubr.bf16.gmra.mrb[32].mxu1 %v11109_v60 }
 0x56f   : > { %6066 = vmatprep.mubr.bf16.mxu0 %v11123_v44  ;;  %6452 = vmatprep.mubr.bf16.mxu1 %v11123_v44 }
 0x576   : > { %6067 = vmatmul.mubr.bf16.gmra.mrb[36].mxu0 %v11121_v61  ;;  %6453 = vmatmul.mubr.bf16.gmra.mrb[36].mxu1 %v11121_v61 }
 0x577   : > { %6076 = vmatprep.mubr.bf16.mxu0 %v11135_v27  ;;  %6462 = vmatprep.mubr.bf16.mxu1 %v11135_v27 }
 0x57e   : > { %6077 = vmatmul.mubr.bf16.gmra.mrb[40].mxu0 %v11133_v23  ;;  %6463 = vmatmul.mubr.bf16.gmra.mrb[40].mxu1 %v11133_v23 }
 0x57f   : > { %6086 = vmatprep.mubr.bf16.mxu0 %v11147_v10  ;;  %6472 = vmatprep.mubr.bf16.mxu1 %v11147_v10 }
 0x586   : > { %6087 = vmatmul.mubr.bf16.gmra.mrb[44].mxu0 %v11145_v47  ;;  %6473 = vmatmul.mubr.bf16.gmra.mrb[44].mxu1 %v11145_v47 }
 0x587   : > { %6096 = vmatprep.mubr.bf16.mxu0 %v11162_v46  ;;  %6482 = vmatprep.mubr.bf16.mxu1 %v11162_v46 }
 0x58e   : > { %6097 = vmatmul.mubr.bf16.gmra.mrb[48].mxu0 %v11160_v53  ;;  %6483 = vmatmul.mubr.bf16.gmra.mrb[48].mxu1 %v11160_v53 }
 0x58f   : > { %6106 = vmatprep.mubr.bf16.mxu0 %v11177_v22  ;;  %6492 = vmatprep.mubr.bf16.mxu1 %v11177_v22 }
 0x596   : > { %6107 = vmatmul.mubr.bf16.gmra.mrb[52].mxu0 %v11175_v58  ;;  %6493 = vmatmul.mubr.bf16.gmra.mrb[52].mxu1 %v11175_v58 }
 0x597   : > { %6116 = vmatprep.mubr.bf16.mxu0 %v11189_v6  ;;  %6502 = vmatprep.mubr.bf16.mxu1 %v11189_v6 }
 0x59e   : > { %6117 = vmatmul.mubr.bf16.gmra.mrb[56].mxu0 %v11187_v56  ;;  %6503 = vmatmul.mubr.bf16.gmra.mrb[56].mxu1 %v11187_v56 }
 0x59f   : > { %6126 = vmatprep.mubr.bf16.mxu0 %v11201_v63  ;;  %6512 = vmatprep.mubr.bf16.mxu1 %v11201_v63 }
 0x5a6   : > { %6127 = vmatmul.mubr.bf16.gmra.mrb[60].mxu0 %v11199_v42  ;;  %6513 = vmatmul.mubr.bf16.gmra.mrb[60].mxu1 %v11199_v42 }
 0x601   : > { %v5978_v14 = vpop.f32.mrb[0].mxu0  ;;  %v6364_v41 = vpop.f32.mrb[0].mxu1 }
 0x602   : > { %v8504_v48 = vadd.f32 %v5978_v14, %v11361_v45  ;;  %v8568_v7 = vadd.f32 %v6364_v41, %v11364_v40  ;;  %v5980_v60 = vpop.f32.mrb[1].mxu0  ;;  %v6366_v59 = vpop.f32.mrb[1].mxu1 }
 0x603   : > { %v8505_v51 = vadd.f32 %v5980_v60, %v11367_v11  ;;  %v8569_v61 = vadd.f32 %v6366_v59, %v11370_v35  ;;  %v5982_v52 = vpop.f32.mrb[2].mxu0  ;;  %v6368_v44 = vpop.f32.mrb[2].mxu1 }
 0x604   : > { %v8506_v54 = vadd.f32 %v5982_v52, %v11361_v45  ;;  %v8570_v23 = vadd.f32 %v6368_v44, %v11364_v40  ;;  %v5984_v55 = vpop.f32.mrb[3].mxu0  ;;  %v6370_v27 = vpop.f32.mrb[3].mxu1  ;;  %v6523_v53 = vmax.f32 %v8504_v48, 0.0  ;;  %v6525_v46 = vmax.f32 %v8568_v7, 0.0 }
 0x605   : > { %v8507_v47 = vadd.f32 %v5984_v55, %v11367_v11  ;;  %v8571_v10 = vadd.f32 %v6370_v27, %v11370_v35  ;;  %v6524_v56 = vmax.f32 %v8505_v51, 0.0  ;;  %v6526_v6 = vmax.f32 %v8569_v61, 0.0 }
 0x606   : > { %v6527_v58 = vmax.f32 %v8506_v54, 0.0  ;;  %v6529_v22 = vmax.f32 %v8570_v23, 0.0 }
 0x607   : > { %v6528_v2 = vmax.f32 %v8507_v47, 0.0  ;;  %v6530_v29 = vmax.f32 %v8571_v10, 0.0 }
 0x608   : > { %v6651_v38 = vpack.c.bf16 %v6527_v58, %v6523_v53  ;;  %v6653_v30 = vpack.c.bf16 %v6529_v22, %v6525_v46 }
 0x609   : > { %v6652_v42 = vpack.c.bf16 %v6528_v2, %v6524_v56  ;;  %v6654_v0 = vpack.c.bf16 %v6530_v29, %v6526_v6  ;;  %v5988_v63 = vpop.f32.mrb[4].mxu0  ;;  %v6374_v37 = vpop.f32.mrb[4].mxu1 }
 0x60a   : > { %v8508_v26 = vadd.f32 %v5988_v63, %v11361_v45  ;;  %v8572_v39 = vadd.f32 %v6374_v37, %v11364_v40  ;;  %v5990_v57 = vpop.f32.mrb[5].mxu0  ;;  %v6376_v1 = vpop.f32.mrb[5].mxu1 }
 0x60b   : > { %v8509_v13 = vadd.f32 %v5990_v57, %v11367_v11  ;;  %v8573_v33 = vadd.f32 %v6376_v1, %v11370_v35  ;;  %v5992_v5 = vpop.f32.mrb[6].mxu0  ;;  %v6378_v15 = vpop.f32.mrb[6].mxu1  ;;  %7010 = vmatprep.mubr.bf16.mxu0 %v6652_v42  ;;  %7171 = vmatprep.mubr.bf16.mxu1 %v6654_v0 }
 0x60c   : > { %v8510_v3 = vadd.f32 %v5992_v5, %v11361_v45  ;;  %v8574_v8 = vadd.f32 %v6378_v15, %v11364_v40  ;;  %v5994_v21 = vpop.f32.mrb[7].mxu0  ;;  %v6380_v19 = vpop.f32.mrb[7].mxu1  ;;  %7011 = vmatmul.mubr.bf16.vlgmr.msra.gmra.mrb[64].mxu0 %v6651_v38  ;;  %7172 = vmatmul.mubr.bf16.vlgmr.msra.gmra.mrb[64].mxu1 %v6653_v30  ;;  %v6531_v32 = vmax.f32 %v8508_v26, 0.0  ;;  %v6533_v24 = vmax.f32 %v8572_v39, 0.0 }
 0x60d   : > { %v8511_v20 = vadd.f32 %v5994_v21, %v11367_v11  ;;  %v8575_v4 = vadd.f32 %v6380_v19, %v11370_v35  ;;  %v6532_v31 = vmax.f32 %v8509_v13, 0.0  ;;  %v6534_v12 = vmax.f32 %v8573_v33, 0.0 }
 0x60e   : > { %v6535_v25 = vmax.f32 %v8510_v3, 0.0  ;;  %v6537_v50 = vmax.f32 %v8574_v8, 0.0 }
 0x60f   : > { %v6536_v16 = vmax.f32 %v8511_v20, 0.0  ;;  %v6538_v18 = vmax.f32 %v8575_v4, 0.0 }
 0x610   : > { %v6655_v9 = vpack.c.bf16 %v6535_v25, %v6531_v32  ;;  %v6657_v62 = vpack.c.bf16 %v6537_v50, %v6533_v24 }
 0x611   : > { %v6656_v17 = vpack.c.bf16 %v6536_v16, %v6532_v31  ;;  %v6658_v43 = vpack.c.bf16 %v6538_v18, %v6534_v12  ;;  %v5998_v49 = vpop.f32.mrb[8].mxu0  ;;  %v6384_v34 = vpop.f32.mrb[8].mxu1 }
 0x612   : > { %v8512_v36 = vadd.f32 %v5998_v49, %v11361_v45  ;;  %v8576_v28 = vadd.f32 %v6384_v34, %v11364_v40  ;;  %v6000_v14 = vpop.f32.mrb[9].mxu0  ;;  %v6386_v41 = vpop.f32.mrb[9].mxu1 }
 0x613   : > { %v8513_v48 = vadd.f32 %v6000_v14, %v11367_v11  ;;  %v8577_v7 = vadd.f32 %v6386_v41, %v11370_v35  ;;  %v6002_v60 = vpop.f32.mrb[10].mxu0  ;;  %v6388_v59 = vpop.f32.mrb[10].mxu1  ;;  %7018 = vmatprep.mubr.bf16.mxu0 %v6656_v17  ;;  %7179 = vmatprep.mubr.bf16.mxu1 %v6658_v43 }
 0x614   : > { %v8514_v51 = vadd.f32 %v6002_v60, %v11361_v45  ;;  %v8578_v61 = vadd.f32 %v6388_v59, %v11364_v40  ;;  %v6004_v52 = vpop.f32.mrb[11].mxu0  ;;  %v6390_v44 = vpop.f32.mrb[11].mxu1  ;;  %7019 = vmatmul.mubr.bf16.gmra.mrb[68].mxu0 %v6655_v9  ;;  %7180 = vmatmul.mubr.bf16.gmra.mrb[68].mxu1 %v6657_v62  ;;  %v6539_v55 = vmax.f32 %v8512_v36, 0.0  ;;  %v6541_v27 = vmax.f32 %v8576_v28, 0.0 }
 0x615   : > { %v8515_v54 = vadd.f32 %v6004_v52, %v11367_v11  ;;  %v8579_v23 = vadd.f32 %v6390_v44, %v11370_v35  ;;  %v6540_v53 = vmax.f32 %v8513_v48, 0.0  ;;  %v6542_v46 = vmax.f32 %v8577_v7, 0.0 }
 0x616   : > { %v6543_v47 = vmax.f32 %v8514_v51, 0.0  ;;  %v6545_v10 = vmax.f32 %v8578_v61, 0.0 }
 0x617   : > { %v6544_v58 = vmax.f32 %v8515_v54, 0.0  ;;  %v6546_v22 = vmax.f32 %v8579_v23, 0.0 }
 0x618   : > { %v6659_v56 = vpack.c.bf16 %v6543_v47, %v6539_v55  ;;  %v6661_v6 = vpack.c.bf16 %v6545_v10, %v6541_v27 }
 0x619   : > { %v6660_v2 = vpack.c.bf16 %v6544_v58, %v6540_v53  ;;  %v6662_v29 = vpack.c.bf16 %v6546_v22, %v6542_v46  ;;  %v6008_v38 = vpop.f32.mrb[12].mxu0  ;;  %v6394_v30 = vpop.f32.mrb[12].mxu1 }
 0x61a   : > { %v8516_v42 = vadd.f32 %v6008_v38, %v11361_v45  ;;  %v8580_v0 = vadd.f32 %v6394_v30, %v11364_v40  ;;  %v6010_v63 = vpop.f32.mrb[13].mxu0  ;;  %v6396_v37 = vpop.f32.mrb[13].mxu1 }
 0x61b   : > { %v8517_v26 = vadd.f32 %v6010_v63, %v11367_v11  ;;  %v8581_v39 = vadd.f32 %v6396_v37, %v11370_v35  ;;  %v6012_v57 = vpop.f32.mrb[14].mxu0  ;;  %v6398_v1 = vpop.f32.mrb[14].mxu1  ;;  %7026 = vmatprep.mubr.bf16.mxu0 %v6660_v2  ;;  %7187 = vmatprep.mubr.bf16.mxu1 %v6662_v29 }
 0x61c   : > { %v8518_v13 = vadd.f32 %v6012_v57, %v11361_v45  ;;  %v8582_v33 = vadd.f32 %v6398_v1, %v11364_v40  ;;  %v6014_v5 = vpop.f32.mrb[15].mxu0  ;;  %v6400_v15 = vpop.f32.mrb[15].mxu1  ;;  %7027 = vmatmul.mubr.bf16.gmra.mrb[72].mxu0 %v6659_v56  ;;  %7188 = vmatmul.mubr.bf16.gmra.mrb[72].mxu1 %v6661_v6  ;;  %v6547_v21 = vmax.f32 %v8516_v42, 0.0  ;;  %v6549_v19 = vmax.f32 %v8580_v0, 0.0 }
 0x61d   : > { %v8519_v3 = vadd.f32 %v6014_v5, %v11367_v11  ;;  %v8583_v8 = vadd.f32 %v6400_v15, %v11370_v35  ;;  %v6548_v32 = vmax.f32 %v8517_v26, 0.0  ;;  %v6550_v24 = vmax.f32 %v8581_v39, 0.0 }
 0x61e   : > { %v6551_v20 = vmax.f32 %v8518_v13, 0.0  ;;  %v6553_v4 = vmax.f32 %v8582_v33, 0.0 }
 0x61f   : > { %v6552_v25 = vmax.f32 %v8519_v3, 0.0  ;;  %v6554_v50 = vmax.f32 %v8583_v8, 0.0 }
 0x620   : > { %v6663_v31 = vpack.c.bf16 %v6551_v20, %v6547_v21  ;;  %v6665_v12 = vpack.c.bf16 %v6553_v4, %v6549_v19 }
 0x621   : > { %v6664_v16 = vpack.c.bf16 %v6552_v25, %v6548_v32  ;;  %v6666_v18 = vpack.c.bf16 %v6554_v50, %v6550_v24  ;;  %v6018_v9 = vpop.f32.mrb[16].mxu0  ;;  %v6404_v62 = vpop.f32.mrb[16].mxu1 }
 0x622   : > { %v8520_v17 = vadd.f32 %v6018_v9, %v11361_v45  ;;  %v8584_v43 = vadd.f32 %v6404_v62, %v11364_v40  ;;  %v6020_v49 = vpop.f32.mrb[17].mxu0  ;;  %v6406_v34 = vpop.f32.mrb[17].mxu1 }
 0x623   : > { %v8521_v36 = vadd.f32 %v6020_v49, %v11367_v11  ;;  %v8585_v28 = vadd.f32 %v6406_v34, %v11370_v35  ;;  %v6022_v14 = vpop.f32.mrb[18].mxu0  ;;  %v6408_v41 = vpop.f32.mrb[18].mxu1  ;;  %7034 = vmatprep.mubr.bf16.mxu0 %v6664_v16  ;;  %7195 = vmatprep.mubr.bf16.mxu1 %v6666_v18 }
 0x624   : > { %v8522_v48 = vadd.f32 %v6022_v14, %v11361_v45  ;;  %v8586_v7 = vadd.f32 %v6408_v41, %v11364_v40  ;;  %v6024_v60 = vpop.f32.mrb[19].mxu0  ;;  %v6410_v59 = vpop.f32.mrb[19].mxu1  ;;  %7035 = vmatmul.mubr.bf16.gmra.mrb[76].mxu0 %v6663_v31  ;;  %7196 = vmatmul.mubr.bf16.gmra.mrb[76].mxu1 %v6665_v12  ;;  %v6555_v52 = vmax.f32 %v8520_v17, 0.0  ;;  %v6557_v44 = vmax.f32 %v8584_v43, 0.0 }
 0x625   : > { %v8523_v51 = vadd.f32 %v6024_v60, %v11367_v11  ;;  %v8587_v61 = vadd.f32 %v6410_v59, %v11370_v35  ;;  %v6556_v55 = vmax.f32 %v8521_v36, 0.0  ;;  %v6558_v27 = vmax.f32 %v8585_v28, 0.0 }
 0x626   : > { %v6559_v54 = vmax.f32 %v8522_v48, 0.0  ;;  %v6561_v23 = vmax.f32 %v8586_v7, 0.0 }
 0x627   : > { %v6560_v47 = vmax.f32 %v8523_v51, 0.0  ;;  %v6562_v10 = vmax.f32 %v8587_v61, 0.0 }
 0x628   : > { %v6667_v53 = vpack.c.bf16 %v6559_v54, %v6555_v52  ;;  %v6669_v46 = vpack.c.bf16 %v6561_v23, %v6557_v44 }
 0x629   : > { %v6668_v58 = vpack.c.bf16 %v6560_v47, %v6556_v55  ;;  %v6670_v22 = vpack.c.bf16 %v6562_v10, %v6558_v27  ;;  %v6028_v56 = vpop.f32.mrb[20].mxu0  ;;  %v6414_v6 = vpop.f32.mrb[20].mxu1 }
 0x62a   : > { %v8524_v2 = vadd.f32 %v6028_v56, %v11361_v45  ;;  %v8588_v29 = vadd.f32 %v6414_v6, %v11364_v40  ;;  %v6030_v38 = vpop.f32.mrb[21].mxu0  ;;  %v6416_v30 = vpop.f32.mrb[21].mxu1 }
 0x62b   : > { %v8525_v42 = vadd.f32 %v6030_v38, %v11367_v11  ;;  %v8589_v0 = vadd.f32 %v6416_v30, %v11370_v35  ;;  %v6032_v63 = vpop.f32.mrb[22].mxu0  ;;  %v6418_v37 = vpop.f32.mrb[22].mxu1  ;;  %7042 = vmatprep.mubr.bf16.mxu0 %v6668_v58  ;;  %7203 = vmatprep.mubr.bf16.mxu1 %v6670_v22 }
 0x62c   : > { %v8526_v26 = vadd.f32 %v6032_v63, %v11361_v45  ;;  %v8590_v39 = vadd.f32 %v6418_v37, %v11364_v40  ;;  %v6034_v57 = vpop.f32.mrb[23].mxu0  ;;  %v6420_v1 = vpop.f32.mrb[23].mxu1  ;;  %7043 = vmatmul.mubr.bf16.gmra.mrb[80].mxu0 %v6667_v53  ;;  %7204 = vmatmul.mubr.bf16.gmra.mrb[80].mxu1 %v6669_v46  ;;  %v6563_v5 = vmax.f32 %v8524_v2, 0.0  ;;  %v6565_v15 = vmax.f32 %v8588_v29, 0.0 }
 0x62d   : > { %v8527_v13 = vadd.f32 %v6034_v57, %v11367_v11  ;;  %v8591_v33 = vadd.f32 %v6420_v1, %v11370_v35  ;;  %v6564_v21 = vmax.f32 %v8525_v42, 0.0  ;;  %v6566_v19 = vmax.f32 %v8589_v0, 0.0 }
 0x62e   : > { %v6567_v3 = vmax.f32 %v8526_v26, 0.0  ;;  %v6569_v8 = vmax.f32 %v8590_v39, 0.0 }
 0x62f   : > { %v6568_v20 = vmax.f32 %v8527_v13, 0.0  ;;  %v6570_v4 = vmax.f32 %v8591_v33, 0.0 }
 0x630   : > { %v6671_v32 = vpack.c.bf16 %v6567_v3, %v6563_v5  ;;  %v6673_v24 = vpack.c.bf16 %v6569_v8, %v6565_v15 }
 0x631   : > { %v6672_v25 = vpack.c.bf16 %v6568_v20, %v6564_v21  ;;  %v6674_v50 = vpack.c.bf16 %v6570_v4, %v6566_v19  ;;  %v6038_v31 = vpop.f32.mrb[24].mxu0  ;;  %v6424_v12 = vpop.f32.mrb[24].mxu1 }
 0x632   : > { %v8528_v16 = vadd.f32 %v6038_v31, %v11361_v45  ;;  %v8592_v18 = vadd.f32 %v6424_v12, %v11364_v40  ;;  %v6040_v9 = vpop.f32.mrb[25].mxu0  ;;  %v6426_v62 = vpop.f32.mrb[25].mxu1 }
 0x633   : > { %v8529_v17 = vadd.f32 %v6040_v9, %v11367_v11  ;;  %v8593_v43 = vadd.f32 %v6426_v62, %v11370_v35  ;;  %v6042_v49 = vpop.f32.mrb[26].mxu0  ;;  %v6428_v34 = vpop.f32.mrb[26].mxu1  ;;  %7050 = vmatprep.mubr.bf16.mxu0 %v6672_v25  ;;  %7211 = vmatprep.mubr.bf16.mxu1 %v6674_v50 }
 0x634   : > { %v8530_v36 = vadd.f32 %v6042_v49, %v11361_v45  ;;  %v8594_v28 = vadd.f32 %v6428_v34, %v11364_v40  ;;  %v6044_v14 = vpop.f32.mrb[27].mxu0  ;;  %v6430_v41 = vpop.f32.mrb[27].mxu1  ;;  %7051 = vmatmul.mubr.bf16.gmra.mrb[84].mxu0 %v6671_v32  ;;  %7212 = vmatmul.mubr.bf16.gmra.mrb[84].mxu1 %v6673_v24  ;;  %v6571_v60 = vmax.f32 %v8528_v16, 0.0  ;;  %v6573_v59 = vmax.f32 %v8592_v18, 0.0 }
 0x635   : > { %v8531_v48 = vadd.f32 %v6044_v14, %v11367_v11  ;;  %v8595_v7 = vadd.f32 %v6430_v41, %v11370_v35  ;;  %v6572_v52 = vmax.f32 %v8529_v17, 0.0  ;;  %v6574_v44 = vmax.f32 %v8593_v43, 0.0 }
 0x636   : > { %v6575_v51 = vmax.f32 %v8530_v36, 0.0  ;;  %v6577_v61 = vmax.f32 %v8594_v28, 0.0 }
 0x637   : > { %v6576_v54 = vmax.f32 %v8531_v48, 0.0  ;;  %v6578_v23 = vmax.f32 %v8595_v7, 0.0 }
 0x638   : > { %v6675_v55 = vpack.c.bf16 %v6575_v51, %v6571_v60  ;;  %v6677_v27 = vpack.c.bf16 %v6577_v61, %v6573_v59 }
 0x639   : > { %v6676_v47 = vpack.c.bf16 %v6576_v54, %v6572_v52  ;;  %v6678_v10 = vpack.c.bf16 %v6578_v23, %v6574_v44  ;;  %v6048_v53 = vpop.f32.mrb[28].mxu0  ;;  %v6434_v46 = vpop.f32.mrb[28].mxu1 }
 0x63a   : > { %v8532_v58 = vadd.f32 %v6048_v53, %v11361_v45  ;;  %v8596_v22 = vadd.f32 %v6434_v46, %v11364_v40  ;;  %v6050_v56 = vpop.f32.mrb[29].mxu0  ;;  %v6436_v6 = vpop.f32.mrb[29].mxu1 }
 0x63b   : > { %v8533_v2 = vadd.f32 %v6050_v56, %v11367_v11  ;;  %v8597_v29 = vadd.f32 %v6436_v6, %v11370_v35  ;;  %v6052_v38 = vpop.f32.mrb[30].mxu0  ;;  %v6438_v30 = vpop.f32.mrb[30].mxu1  ;;  %7058 = vmatprep.mubr.bf16.mxu0 %v6676_v47  ;;  %7219 = vmatprep.mubr.bf16.mxu1 %v6678_v10 }
 0x63c   : > { %v8534_v42 = vadd.f32 %v6052_v38, %v11361_v45  ;;  %v8598_v0 = vadd.f32 %v6438_v30, %v11364_v40  ;;  %v6054_v63 = vpop.f32.mrb[31].mxu0  ;;  %v6440_v37 = vpop.f32.mrb[31].mxu1  ;;  %7059 = vmatmul.mubr.bf16.gmra.mrb[88].mxu0 %v6675_v55  ;;  %7220 = vmatmul.mubr.bf16.gmra.mrb[88].mxu1 %v6677_v27  ;;  %v6579_v57 = vmax.f32 %v8532_v58, 0.0  ;;  %v6581_v1 = vmax.f32 %v8596_v22, 0.0 }
 0x63d   : > { %v8535_v26 = vadd.f32 %v6054_v63, %v11367_v11  ;;  %v8599_v39 = vadd.f32 %v6440_v37, %v11370_v35  ;;  %v6580_v5 = vmax.f32 %v8533_v2, 0.0  ;;  %v6582_v15 = vmax.f32 %v8597_v29, 0.0 }
 0x63e   : > { %v6583_v13 = vmax.f32 %v8534_v42, 0.0  ;;  %v6585_v33 = vmax.f32 %v8598_v0, 0.0 }
 0x63f   : > { %v6584_v3 = vmax.f32 %v8535_v26, 0.0  ;;  %v6586_v8 = vmax.f32 %v8599_v39, 0.0 }
 0x640   : > { %v6679_v21 = vpack.c.bf16 %v6583_v13, %v6579_v57  ;;  %v6681_v19 = vpack.c.bf16 %v6585_v33, %v6581_v1 }
 0x641   : > { %v6680_v20 = vpack.c.bf16 %v6584_v3, %v6580_v5  ;;  %v6682_v4 = vpack.c.bf16 %v6586_v8, %v6582_v15  ;;  %v6058_v32 = vpop.f32.mrb[32].mxu0  ;;  %v6444_v24 = vpop.f32.mrb[32].mxu1 }
 0x642   : > { %v8536_v25 = vadd.f32 %v6058_v32, %v11361_v45  ;;  %v8600_v50 = vadd.f32 %v6444_v24, %v11364_v40  ;;  %v6060_v31 = vpop.f32.mrb[33].mxu0  ;;  %v6446_v12 = vpop.f32.mrb[33].mxu1 }
 0x643   : > { %v8537_v16 = vadd.f32 %v6060_v31, %v11367_v11  ;;  %v8601_v18 = vadd.f32 %v6446_v12, %v11370_v35  ;;  %v6062_v9 = vpop.f32.mrb[34].mxu0  ;;  %v6448_v62 = vpop.f32.mrb[34].mxu1  ;;  %7066 = vmatprep.mubr.bf16.mxu0 %v6680_v20  ;;  %7227 = vmatprep.mubr.bf16.mxu1 %v6682_v4 }
 0x644   : > { %v8538_v17 = vadd.f32 %v6062_v9, %v11361_v45  ;;  %v8602_v43 = vadd.f32 %v6448_v62, %v11364_v40  ;;  %v6064_v49 = vpop.f32.mrb[35].mxu0  ;;  %v6450_v34 = vpop.f32.mrb[35].mxu1  ;;  %7067 = vmatmul.mubr.bf16.gmra.mrb[92].mxu0 %v6679_v21  ;;  %7228 = vmatmul.mubr.bf16.gmra.mrb[92].mxu1 %v6681_v19  ;;  %v6587_v14 = vmax.f32 %v8536_v25, 0.0  ;;  %v6589_v41 = vmax.f32 %v8600_v50, 0.0 }
 0x645   : > { %v8539_v36 = vadd.f32 %v6064_v49, %v11367_v11  ;;  %v8603_v28 = vadd.f32 %v6450_v34, %v11370_v35  ;;  %v6588_v60 = vmax.f32 %v8537_v16, 0.0  ;;  %v6590_v59 = vmax.f32 %v8601_v18, 0.0 }
 0x646   : > { %v6591_v48 = vmax.f32 %v8538_v17, 0.0  ;;  %v6593_v7 = vmax.f32 %v8602_v43, 0.0 }
 0x647   : > { %v6592_v51 = vmax.f32 %v8539_v36, 0.0  ;;  %v6594_v61 = vmax.f32 %v8603_v28, 0.0 }
 0x648   : > { %v6683_v52 = vpack.c.bf16 %v6591_v48, %v6587_v14  ;;  %v6685_v44 = vpack.c.bf16 %v6593_v7, %v6589_v41 }
 0x649   : > { %v6684_v54 = vpack.c.bf16 %v6592_v51, %v6588_v60  ;;  %v6686_v23 = vpack.c.bf16 %v6594_v61, %v6590_v59  ;;  %v6068_v55 = vpop.f32.mrb[36].mxu0  ;;  %v6454_v27 = vpop.f32.mrb[36].mxu1 }
 0x64a   : > { %v8540_v47 = vadd.f32 %v6068_v55, %v11361_v45  ;;  %v8604_v10 = vadd.f32 %v6454_v27, %v11364_v40  ;;  %v6070_v53 = vpop.f32.mrb[37].mxu0  ;;  %v6456_v46 = vpop.f32.mrb[37].mxu1 }
 0x64b   : > { %v8541_v58 = vadd.f32 %v6070_v53, %v11367_v11  ;;  %v8605_v22 = vadd.f32 %v6456_v46, %v11370_v35  ;;  %v6072_v56 = vpop.f32.mrb[38].mxu0  ;;  %v6458_v6 = vpop.f32.mrb[38].mxu1  ;;  %7074 = vmatprep.mubr.bf16.mxu0 %v6684_v54  ;;  %7235 = vmatprep.mubr.bf16.mxu1 %v6686_v23 }
 0x64c   : > { %v8542_v2 = vadd.f32 %v6072_v56, %v11361_v45  ;;  %v8606_v29 = vadd.f32 %v6458_v6, %v11364_v40  ;;  %v6074_v38 = vpop.f32.mrb[39].mxu0  ;;  %v6460_v30 = vpop.f32.mrb[39].mxu1  ;;  %7075 = vmatmul.mubr.bf16.gmra.mrb[96].mxu0 %v6683_v52  ;;  %7236 = vmatmul.mubr.bf16.gmra.mrb[96].mxu1 %v6685_v44  ;;  %v6595_v63 = vmax.f32 %v8540_v47, 0.0  ;;  %v6597_v37 = vmax.f32 %v8604_v10, 0.0 }
 0x64d   : > { %v8543_v42 = vadd.f32 %v6074_v38, %v11367_v11  ;;  %v8607_v0 = vadd.f32 %v6460_v30, %v11370_v35  ;;  %v6596_v57 = vmax.f32 %v8541_v58, 0.0  ;;  %v6598_v1 = vmax.f32 %v8605_v22, 0.0 }
 0x64e   : > { %v6599_v26 = vmax.f32 %v8542_v2, 0.0  ;;  %v6601_v39 = vmax.f32 %v8606_v29, 0.0 }
 0x64f   : > { %v6600_v13 = vmax.f32 %v8543_v42, 0.0  ;;  %v6602_v33 = vmax.f32 %v8607_v0, 0.0 }
 0x650   : > { %v6687_v5 = vpack.c.bf16 %v6599_v26, %v6595_v63  ;;  %v6689_v15 = vpack.c.bf16 %v6601_v39, %v6597_v37 }
 0x651   : > { %v6688_v3 = vpack.c.bf16 %v6600_v13, %v6596_v57  ;;  %v6690_v8 = vpack.c.bf16 %v6602_v33, %v6598_v1  ;;  %v6078_v21 = vpop.f32.mrb[40].mxu0  ;;  %v6464_v19 = vpop.f32.mrb[40].mxu1 }
 0x652   : > { %v8544_v20 = vadd.f32 %v6078_v21, %v11361_v45  ;;  %v8608_v4 = vadd.f32 %v6464_v19, %v11364_v40  ;;  %v6080_v32 = vpop.f32.mrb[41].mxu0  ;;  %v6466_v24 = vpop.f32.mrb[41].mxu1 }
 0x653   : > { %v8545_v25 = vadd.f32 %v6080_v32, %v11367_v11  ;;  %v8609_v50 = vadd.f32 %v6466_v24, %v11370_v35  ;;  %v6082_v31 = vpop.f32.mrb[42].mxu0  ;;  %v6468_v12 = vpop.f32.mrb[42].mxu1  ;;  %7082 = vmatprep.mubr.bf16.mxu0 %v6688_v3  ;;  %7243 = vmatprep.mubr.bf16.mxu1 %v6690_v8 }
 0x654   : > { %v8546_v16 = vadd.f32 %v6082_v31, %v11361_v45  ;;  %v8610_v18 = vadd.f32 %v6468_v12, %v11364_v40  ;;  %v6084_v9 = vpop.f32.mrb[43].mxu0  ;;  %v6470_v62 = vpop.f32.mrb[43].mxu1  ;;  %7083 = vmatmul.mubr.bf16.gmra.mrb[100].mxu0 %v6687_v5  ;;  %7244 = vmatmul.mubr.bf16.gmra.mrb[100].mxu1 %v6689_v15  ;;  %v6603_v49 = vmax.f32 %v8544_v20, 0.0  ;;  %v6605_v34 = vmax.f32 %v8608_v4, 0.0 }
 0x655   : > { %v8547_v17 = vadd.f32 %v6084_v9, %v11367_v11  ;;  %v8611_v43 = vadd.f32 %v6470_v62, %v11370_v35  ;;  %v6604_v14 = vmax.f32 %v8545_v25, 0.0  ;;  %v6606_v41 = vmax.f32 %v8609_v50, 0.0 }
 0x656   : > { %v6607_v36 = vmax.f32 %v8546_v16, 0.0  ;;  %v6609_v28 = vmax.f32 %v8610_v18, 0.0 }
 0x657   : > { %v6608_v48 = vmax.f32 %v8547_v17, 0.0  ;;  %v6610_v7 = vmax.f32 %v8611_v43, 0.0 }
 0x658   : > { %v6691_v60 = vpack.c.bf16 %v6607_v36, %v6603_v49  ;;  %v6693_v59 = vpack.c.bf16 %v6609_v28, %v6605_v34 }
 0x659   : > { %v6692_v51 = vpack.c.bf16 %v6608_v48, %v6604_v14  ;;  %v6694_v61 = vpack.c.bf16 %v6610_v7, %v6606_v41  ;;  %v6088_v52 = vpop.f32.mrb[44].mxu0  ;;  %v6474_v44 = vpop.f32.mrb[44].mxu1 }
 0x65a   : > { %v8548_v54 = vadd.f32 %v6088_v52, %v11361_v45  ;;  %v8612_v23 = vadd.f32 %v6474_v44, %v11364_v40  ;;  %v6090_v55 = vpop.f32.mrb[45].mxu0  ;;  %v6476_v27 = vpop.f32.mrb[45].mxu1 }
 0x65b   : > { %v8549_v47 = vadd.f32 %v6090_v55, %v11367_v11  ;;  %v8613_v10 = vadd.f32 %v6476_v27, %v11370_v35  ;;  %v6092_v53 = vpop.f32.mrb[46].mxu0  ;;  %v6478_v46 = vpop.f32.mrb[46].mxu1  ;;  %7090 = vmatprep.mubr.bf16.mxu0 %v6692_v51  ;;  %7251 = vmatprep.mubr.bf16.mxu1 %v6694_v61 }
 0x65c   : > { %v8550_v58 = vadd.f32 %v6092_v53, %v11361_v45  ;;  %v8614_v22 = vadd.f32 %v6478_v46, %v11364_v40  ;;  %v6094_v56 = vpop.f32.mrb[47].mxu0  ;;  %v6480_v6 = vpop.f32.mrb[47].mxu1  ;;  %7091 = vmatmul.mubr.bf16.gmra.mrb[104].mxu0 %v6691_v60  ;;  %7252 = vmatmul.mubr.bf16.gmra.mrb[104].mxu1 %v6693_v59  ;;  %v6611_v38 = vmax.f32 %v8548_v54, 0.0  ;;  %v6613_v30 = vmax.f32 %v8612_v23, 0.0 }
 0x65d   : > { %v8551_v2 = vadd.f32 %v6094_v56, %v11367_v11  ;;  %v8615_v29 = vadd.f32 %v6480_v6, %v11370_v35  ;;  %v6612_v63 = vmax.f32 %v8549_v47, 0.0  ;;  %v6614_v37 = vmax.f32 %v8613_v10, 0.0 }
 0x65e   : > { %v6615_v42 = vmax.f32 %v8550_v58, 0.0  ;;  %v6617_v0 = vmax.f32 %v8614_v22, 0.0 }
 0x65f   : > { %v6616_v26 = vmax.f32 %v8551_v2, 0.0  ;;  %v6618_v39 = vmax.f32 %v8615_v29, 0.0 }
 0x660   : > { %v6695_v57 = vpack.c.bf16 %v6615_v42, %v6611_v38  ;;  %v6697_v1 = vpack.c.bf16 %v6617_v0, %v6613_v30 }
 0x661   : > { %v6696_v13 = vpack.c.bf16 %v6616_v26, %v6612_v63  ;;  %v6698_v33 = vpack.c.bf16 %v6618_v39, %v6614_v37  ;;  %v6098_v5 = vpop.f32.mrb[48].mxu0  ;;  %v6484_v15 = vpop.f32.mrb[48].mxu1 }
 0x662   : > { %v8552_v3 = vadd.f32 %v6098_v5, %v11361_v45  ;;  %v8616_v8 = vadd.f32 %v6484_v15, %v11364_v40  ;;  %v6100_v21 = vpop.f32.mrb[49].mxu0  ;;  %v6486_v19 = vpop.f32.mrb[49].mxu1 }
 0x663   : > { %v8553_v20 = vadd.f32 %v6100_v21, %v11367_v11  ;;  %v8617_v4 = vadd.f32 %v6486_v19, %v11370_v35  ;;  %v6102_v32 = vpop.f32.mrb[50].mxu0  ;;  %v6488_v24 = vpop.f32.mrb[50].mxu1  ;;  %7098 = vmatprep.mubr.bf16.mxu0 %v6696_v13  ;;  %7259 = vmatprep.mubr.bf16.mxu1 %v6698_v33 }
 0x664   : > { %v8554_v25 = vadd.f32 %v6102_v32, %v11361_v45  ;;  %v8618_v50 = vadd.f32 %v6488_v24, %v11364_v40  ;;  %v6104_v31 = vpop.f32.mrb[51].mxu0  ;;  %v6490_v12 = vpop.f32.mrb[51].mxu1  ;;  %7099 = vmatmul.mubr.bf16.gmra.mrb[108].mxu0 %v6695_v57  ;;  %7260 = vmatmul.mubr.bf16.gmra.mrb[108].mxu1 %v6697_v1  ;;  %v6619_v9 = vmax.f32 %v8552_v3, 0.0  ;;  %v6621_v62 = vmax.f32 %v8616_v8, 0.0 }
 0x665   : > { %v8555_v16 = vadd.f32 %v6104_v31, %v11367_v11  ;;  %v8619_v18 = vadd.f32 %v6490_v12, %v11370_v35  ;;  %v6620_v49 = vmax.f32 %v8553_v20, 0.0  ;;  %v6622_v34 = vmax.f32 %v8617_v4, 0.0 }
 0x666   : > { %v6623_v17 = vmax.f32 %v8554_v25, 0.0  ;;  %v6625_v43 = vmax.f32 %v8618_v50, 0.0 }
 0x667   : > { %v6624_v36 = vmax.f32 %v8555_v16, 0.0  ;;  %v6626_v28 = vmax.f32 %v8619_v18, 0.0 }
 0x668   : > { %v6699_v14 = vpack.c.bf16 %v6623_v17, %v6619_v9  ;;  %v6701_v41 = vpack.c.bf16 %v6625_v43, %v6621_v62 }
 0x669   : > { %v6700_v48 = vpack.c.bf16 %v6624_v36, %v6620_v49  ;;  %v6702_v7 = vpack.c.bf16 %v6626_v28, %v6622_v34  ;;  %v6108_v60 = vpop.f32.mrb[52].mxu0  ;;  %v6494_v59 = vpop.f32.mrb[52].mxu1 }
 0x66a   : > { %v8556_v51 = vadd.f32 %v6108_v60, %v11361_v45  ;;  %v8620_v61 = vadd.f32 %v6494_v59, %v11364_v40  ;;  %v6110_v52 = vpop.f32.mrb[53].mxu0  ;;  %v6496_v44 = vpop.f32.mrb[53].mxu1 }
 0x66b   : > { %v8557_v54 = vadd.f32 %v6110_v52, %v11367_v11  ;;  %v8621_v23 = vadd.f32 %v6496_v44, %v11370_v35  ;;  %v6112_v55 = vpop.f32.mrb[54].mxu0  ;;  %v6498_v27 = vpop.f32.mrb[54].mxu1  ;;  %7106 = vmatprep.mubr.bf16.mxu0 %v6700_v48  ;;  %7267 = vmatprep.mubr.bf16.mxu1 %v6702_v7 }
 0x66c   : > { %v8558_v47 = vadd.f32 %v6112_v55, %v11361_v45  ;;  %v8622_v10 = vadd.f32 %v6498_v27, %v11364_v40  ;;  %v6114_v53 = vpop.f32.mrb[55].mxu0  ;;  %v6500_v46 = vpop.f32.mrb[55].mxu1  ;;  %7107 = vmatmul.mubr.bf16.gmra.mrb[112].mxu0 %v6699_v14  ;;  %7268 = vmatmul.mubr.bf16.gmra.mrb[112].mxu1 %v6701_v41  ;;  %v6627_v56 = vmax.f32 %v8556_v51, 0.0  ;;  %v6629_v6 = vmax.f32 %v8620_v61, 0.0 }
 0x66d   : > { %v8559_v58 = vadd.f32 %v6114_v53, %v11367_v11  ;;  %v8623_v22 = vadd.f32 %v6500_v46, %v11370_v35  ;;  %v6628_v38 = vmax.f32 %v8557_v54, 0.0  ;;  %v6630_v30 = vmax.f32 %v8621_v23, 0.0 }
 0x66e   : > { %v6631_v2 = vmax.f32 %v8558_v47, 0.0  ;;  %v6633_v29 = vmax.f32 %v8622_v10, 0.0 }
 0x66f   : > { %v6632_v42 = vmax.f32 %v8559_v58, 0.0  ;;  %v6634_v0 = vmax.f32 %v8623_v22, 0.0 }
 0x670   : > { %v6703_v63 = vpack.c.bf16 %v6631_v2, %v6627_v56  ;;  %v6705_v37 = vpack.c.bf16 %v6633_v29, %v6629_v6 }
 0x671   : > { %v6704_v26 = vpack.c.bf16 %v6632_v42, %v6628_v38  ;;  %v6706_v39 = vpack.c.bf16 %v6634_v0, %v6630_v30  ;;  %v6118_v57 = vpop.f32.mrb[56].mxu0  ;;  %v6504_v1 = vpop.f32.mrb[56].mxu1 }
 0x672   : > { %v8560_v13 = vadd.f32 %v6118_v57, %v11361_v45  ;;  %v8624_v33 = vadd.f32 %v6504_v1, %v11364_v40  ;;  %v6120_v5 = vpop.f32.mrb[57].mxu0  ;;  %v6506_v15 = vpop.f32.mrb[57].mxu1 }
 0x673   : > { %v8561_v3 = vadd.f32 %v6120_v5, %v11367_v11  ;;  %v8625_v8 = vadd.f32 %v6506_v15, %v11370_v35  ;;  %v6122_v21 = vpop.f32.mrb[58].mxu0  ;;  %v6508_v19 = vpop.f32.mrb[58].mxu1  ;;  %7114 = vmatprep.mubr.bf16.mxu0 %v6704_v26  ;;  %7275 = vmatprep.mubr.bf16.mxu1 %v6706_v39 }
 0x674   : > { %v8562_v20 = vadd.f32 %v6122_v21, %v11361_v45  ;;  %v8626_v4 = vadd.f32 %v6508_v19, %v11364_v40  ;;  %v6124_v32 = vpop.f32.mrb[59].mxu0  ;;  %v6510_v24 = vpop.f32.mrb[59].mxu1  ;;  %7115 = vmatmul.mubr.bf16.gmra.mrb[116].mxu0 %v6703_v63  ;;  %7276 = vmatmul.mubr.bf16.gmra.mrb[116].mxu1 %v6705_v37  ;;  %v6635_v31 = vmax.f32 %v8560_v13, 0.0  ;;  %v6637_v12 = vmax.f32 %v8624_v33, 0.0 }
 0x675   : > { %v8563_v25 = vadd.f32 %v6124_v32, %v11367_v11  ;;  %v8627_v50 = vadd.f32 %v6510_v24, %v11370_v35  ;;  %v6636_v9 = vmax.f32 %v8561_v3, 0.0  ;;  %v6638_v62 = vmax.f32 %v8625_v8, 0.0 }
 0x676   : > { %v6639_v16 = vmax.f32 %v8562_v20, 0.0  ;;  %v6641_v18 = vmax.f32 %v8626_v4, 0.0 }
 0x677   : > { %v6640_v17 = vmax.f32 %v8563_v25, 0.0  ;;  %v6642_v43 = vmax.f32 %v8627_v50, 0.0 }
 0x678   : > { %v6707_v49 = vpack.c.bf16 %v6639_v16, %v6635_v31  ;;  %v6709_v34 = vpack.c.bf16 %v6641_v18, %v6637_v12 }
 0x679   : > { %v6708_v36 = vpack.c.bf16 %v6640_v17, %v6636_v9  ;;  %v6710_v28 = vpack.c.bf16 %v6642_v43, %v6638_v62  ;;  %v6128_v14 = vpop.f32.mrb[60].mxu0  ;;  %v6514_v41 = vpop.f32.mrb[60].mxu1 }
 0x67a   : > { %v8564_v48 = vadd.f32 %v6128_v14, %v11361_v45  ;;  %v8628_v7 = vadd.f32 %v6514_v41, %v11364_v40  ;;  %v6130_v60 = vpop.f32.mrb[61].mxu0  ;;  %v6516_v59 = vpop.f32.mrb[61].mxu1 }
 0x67b   : > { %v8565_v51 = vadd.f32 %v6130_v60, %v11367_v11  ;;  %v8629_v61 = vadd.f32 %v6516_v59, %v11370_v35  ;;  %v6132_v52 = vpop.f32.mrb[62].mxu0  ;;  %v6518_v44 = vpop.f32.mrb[62].mxu1  ;;  %7122 = vmatprep.mubr.bf16.mxu0 %v6708_v36  ;;  %7283 = vmatprep.mubr.bf16.mxu1 %v6710_v28 }
 0x67c   : > { %v8566_v54 = vadd.f32 %v6132_v52, %v11361_v45  ;;  %v8630_v23 = vadd.f32 %v6518_v44, %v11364_v40  ;;  %v6134_v55 = vpop.f32.mrb[63].mxu0  ;;  %v6520_v27 = vpop.f32.mrb[63].mxu1  ;;  %7123 = vmatmul.mubr.bf16.gmra.mrb[120].mxu0 %v6707_v49  ;;  %7284 = vmatmul.mubr.bf16.gmra.mrb[120].mxu1 %v6709_v34  ;;  %v6643_v53 = vmax.f32 %v8564_v48, 0.0  ;;  %v6645_v46 = vmax.f32 %v8628_v7, 0.0 }
 0x67d   : > { %v8567_v47 = vadd.f32 %v6134_v55, %v11367_v11  ;;  %v8631_v10 = vadd.f32 %v6520_v27, %v11370_v35  ;;  %v6644_v56 = vmax.f32 %v8565_v51, 0.0  ;;  %v6646_v6 = vmax.f32 %v8629_v61, 0.0  ;;  %v11503_v35 = vld [vmem:[%s11624_s14] ss:$0 sm:$0xff] }
 0x67e   : > { %v6647_v58 = vmax.f32 %v8566_v54, 0.0  ;;  %v6649_v22 = vmax.f32 %v8630_v23, 0.0 }
 0x67f   : > { %v6648_v2 = vmax.f32 %v8567_v47, 0.0  ;;  %v6650_v29 = vmax.f32 %v8631_v10, 0.0 }
 0x680   : > { %v6711_v38 = vpack.c.bf16 %v6647_v58, %v6643_v53  ;;  %v6713_v45 = vpack.c.bf16 %v6649_v22, %v6645_v46 }
 0x681   : > { %v6712_v30 = vpack.c.bf16 %v6648_v2, %v6644_v56  ;;  %v6714_v40 = vpack.c.bf16 %v6650_v29, %v6646_v6 }
 0x683   : > { %7130 = vmatprep.mubr.bf16.mxu0 %v6712_v30  ;;  %7291 = vmatprep.mubr.bf16.mxu1 %v6714_v40 }
 0x684   : > { %7131 = vmatmul.mubr.bf16.gmra.mrb[124].mxu0 %v6711_v38  ;;  %7292 = vmatmul.mubr.bf16.gmra.mrb[124].mxu1 %v6713_v45 }
 0x6df   : > { %v8168_v11 = vpop.f32.mrb[64].mxu0  ;;  %v8280_v42 = vpop.f32.mrb[64].mxu1 }
 0x6e0   : > { %v8169_v0 = vpop.f32.mrb[65].mxu0  ;;  %v8281_v63 = vpop.f32.mrb[65].mxu1 }
 0x6e1   : > { %v8170_v37 = vadd.f32 %v8169_v0, %v8168_v11  ;;  %v8282_v26 = vadd.f32 %v8281_v63, %v8280_v42  ;;  %v8171_v39 = vpop.f32.mrb[66].mxu0  ;;  %v8283_v57 = vpop.f32.mrb[66].mxu1 }
 0x6e2   : > { %v8172_v1 = vpop.f32.mrb[67].mxu0  ;;  %v8284_v13 = vpop.f32.mrb[67].mxu1 }
 0x6e3   : > { %v7013_v33 = vadd.f32 %v8170_v37, %v11503_v35  ;;  %v8173_v5 = vadd.f32 %v8172_v1, %v8171_v39  ;;  %v8285_v15 = vadd.f32 %v8284_v13, %v8283_v57 }
 0x6e5   : > { %v7174_v3 = vadd.f32 %v8282_v26, %v7013_v33  ;;  %v7016_v8 = vadd.f32 %v8173_v5, %v11503_v35 }
 0x6e7   : > { %7333 = vst.msk [vmem:[%s11510_s28] sm:$0xff] %vm7332_vm3, %v7174_v3  ;;  %v7177_v21 = vadd.f32 %v8285_v15, %v7016_v8  ;;  %v8174_v19 = vpop.f32.mrb[68].mxu0  ;;  %v8286_v20 = vpop.f32.mrb[68].mxu1 }
 0x6e8   : > { %v8175_v4 = vpop.f32.mrb[69].mxu0  ;;  %v8287_v32 = vpop.f32.mrb[69].mxu1 }
 0x6e9   : > { %7334 = vst.msk [vmem:[%s11510_s28 + $0x8] sm:$0xff] %vm7332_vm3, %v7177_v21  ;;  %v8176_v24 = vadd.f32 %v8175_v4, %v8174_v19  ;;  %v8288_v25 = vadd.f32 %v8287_v32, %v8286_v20  ;;  %v8177_v50 = vpop.f32.mrb[70].mxu0  ;;  %v8289_v31 = vpop.f32.mrb[70].mxu1 }
 0x6ea   : > { %v8178_v12 = vpop.f32.mrb[71].mxu0  ;;  %v8290_v16 = vpop.f32.mrb[71].mxu1 }
 0x6eb   : > { %v7021_v18 = vadd.f32 %v8176_v24, %v11503_v35  ;;  %v8179_v9 = vadd.f32 %v8178_v12, %v8177_v50  ;;  %v8291_v62 = vadd.f32 %v8290_v16, %v8289_v31 }
 0x6ed   : > { %v7182_v17 = vadd.f32 %v8288_v25, %v7021_v18  ;;  %v7024_v43 = vadd.f32 %v8179_v9, %v11503_v35 }
 0x6ef   : > { %7335 = vst.msk [vmem:[%s11510_s28 + $0x10] sm:$0xff] %vm7332_vm3, %v7182_v17  ;;  %v7185_v49 = vadd.f32 %v8291_v62, %v7024_v43  ;;  %v8180_v34 = vpop.f32.mrb[72].mxu0  ;;  %v8292_v36 = vpop.f32.mrb[72].mxu1 }
 0x6f0   : > { %v8181_v28 = vpop.f32.mrb[73].mxu0  ;;  %v8293_v14 = vpop.f32.mrb[73].mxu1 }
 0x6f1   : > { %7336 = vst.msk [vmem:[%s11510_s28 + $0x18] sm:$0xff] %vm7332_vm3, %v7185_v49  ;;  %v8182_v41 = vadd.f32 %v8181_v28, %v8180_v34  ;;  %v8294_v48 = vadd.f32 %v8293_v14, %v8292_v36  ;;  %v8183_v7 = vpop.f32.mrb[74].mxu0  ;;  %v8295_v60 = vpop.f32.mrb[74].mxu1 }
 0x6f2   : > { %v8184_v59 = vpop.f32.mrb[75].mxu0  ;;  %v8296_v51 = vpop.f32.mrb[75].mxu1 }
 0x6f3   : > { %v7029_v61 = vadd.f32 %v8182_v41, %v11503_v35  ;;  %v8185_v52 = vadd.f32 %v8184_v59, %v8183_v7  ;;  %v8297_v44 = vadd.f32 %v8296_v51, %v8295_v60 }
 0x6f5   : > { %v7190_v54 = vadd.f32 %v8294_v48, %v7029_v61  ;;  %v7032_v23 = vadd.f32 %v8185_v52, %v11503_v35 }
 0x6f7   : > { %7337 = vst.msk [vmem:[%s11510_s28 + $0x20] sm:$0xff] %vm7332_vm3, %v7190_v54  ;;  %v7193_v55 = vadd.f32 %v8297_v44, %v7032_v23  ;;  %v8186_v27 = vpop.f32.mrb[76].mxu0  ;;  %v8298_v47 = vpop.f32.mrb[76].mxu1 }
 0x6f8   : > { %v8187_v10 = vpop.f32.mrb[77].mxu0  ;;  %v8299_v53 = vpop.f32.mrb[77].mxu1 }
 0x6f9   : > { %7338 = vst.msk [vmem:[%s11510_s28 + $0x28] sm:$0xff] %vm7332_vm3, %v7193_v55  ;;  %v8188_v46 = vadd.f32 %v8187_v10, %v8186_v27  ;;  %v8300_v58 = vadd.f32 %v8299_v53, %v8298_v47  ;;  %v8189_v22 = vpop.f32.mrb[78].mxu0  ;;  %v8301_v56 = vpop.f32.mrb[78].mxu1 }
 0x6fa   : > { %v8190_v6 = vpop.f32.mrb[79].mxu0  ;;  %v8302_v2 = vpop.f32.mrb[79].mxu1 }
 0x6fb   : > { %v7037_v29 = vadd.f32 %v8188_v46, %v11503_v35  ;;  %v8191_v38 = vadd.f32 %v8190_v6, %v8189_v22  ;;  %v8303_v45 = vadd.f32 %v8302_v2, %v8301_v56 }
 0x6fd   : > { %v7198_v30 = vadd.f32 %v8300_v58, %v7037_v29  ;;  %v7040_v40 = vadd.f32 %v8191_v38, %v11503_v35 }
 0x6ff   : > { %7339 = vst.msk [vmem:[%s11510_s28 + $0x30] sm:$0xff] %vm7332_vm3, %v7198_v30  ;;  %v7201_v11 = vadd.f32 %v8303_v45, %v7040_v40  ;;  %v8192_v42 = vpop.f32.mrb[80].mxu0  ;;  %v8304_v0 = vpop.f32.mrb[80].mxu1 }
 0x700   : > { %v8193_v63 = vpop.f32.mrb[81].mxu0  ;;  %v8305_v37 = vpop.f32.mrb[81].mxu1 }
 0x701   : > { %7340 = vst.msk [vmem:[%s11510_s28 + $0x38] sm:$0xff] %vm7332_vm3, %v7201_v11  ;;  %v8194_v26 = vadd.f32 %v8193_v63, %v8192_v42  ;;  %v8306_v39 = vadd.f32 %v8305_v37, %v8304_v0  ;;  %v8195_v57 = vpop.f32.mrb[82].mxu0  ;;  %v8307_v1 = vpop.f32.mrb[82].mxu1 }
 0x702   : > { %v8196_v13 = vpop.f32.mrb[83].mxu0  ;;  %v8308_v33 = vpop.f32.mrb[83].mxu1 }
 0x703   : > { %v7045_v5 = vadd.f32 %v8194_v26, %v11503_v35  ;;  %v8197_v15 = vadd.f32 %v8196_v13, %v8195_v57  ;;  %v8309_v3 = vadd.f32 %v8308_v33, %v8307_v1 }
 0x705   : > { %v7206_v8 = vadd.f32 %v8306_v39, %v7045_v5  ;;  %v7048_v21 = vadd.f32 %v8197_v15, %v11503_v35 }
 0x707   : > { %7341 = vst.msk [vmem:[%s11510_s28 + $0x40] sm:$0xff] %vm7332_vm3, %v7206_v8  ;;  %v7209_v19 = vadd.f32 %v8309_v3, %v7048_v21  ;;  %v8198_v20 = vpop.f32.mrb[84].mxu0  ;;  %v8310_v4 = vpop.f32.mrb[84].mxu1 }
 0x708   : > { %v8199_v32 = vpop.f32.mrb[85].mxu0  ;;  %v8311_v24 = vpop.f32.mrb[85].mxu1 }
 0x709   : > { %7342 = vst.msk [vmem:[%s11510_s28 + $0x48] sm:$0xff] %vm7332_vm3, %v7209_v19  ;;  %v8200_v25 = vadd.f32 %v8199_v32, %v8198_v20  ;;  %v8312_v50 = vadd.f32 %v8311_v24, %v8310_v4  ;;  %v8201_v31 = vpop.f32.mrb[86].mxu0  ;;  %v8313_v12 = vpop.f32.mrb[86].mxu1 }
 0x70a   : > { %v8202_v16 = vpop.f32.mrb[87].mxu0  ;;  %v8314_v18 = vpop.f32.mrb[87].mxu1 }
 0x70b   : > { %v7053_v9 = vadd.f32 %v8200_v25, %v11503_v35  ;;  %v8203_v62 = vadd.f32 %v8202_v16, %v8201_v31  ;;  %v8315_v17 = vadd.f32 %v8314_v18, %v8313_v12 }
 0x70d   : > { %v7214_v43 = vadd.f32 %v8312_v50, %v7053_v9  ;;  %v7056_v49 = vadd.f32 %v8203_v62, %v11503_v35 }
 0x70f   : > { %7343 = vst.msk [vmem:[%s11510_s28 + $0x50] sm:$0xff] %vm7332_vm3, %v7214_v43  ;;  %v7217_v34 = vadd.f32 %v8315_v17, %v7056_v49  ;;  %v8204_v36 = vpop.f32.mrb[88].mxu0  ;;  %v8316_v28 = vpop.f32.mrb[88].mxu1 }
 0x710   : > { %v8205_v14 = vpop.f32.mrb[89].mxu0  ;;  %v8317_v41 = vpop.f32.mrb[89].mxu1 }
 0x711   : > { %7344 = vst.msk [vmem:[%s11510_s28 + $0x58] sm:$0xff] %vm7332_vm3, %v7217_v34  ;;  %v8206_v48 = vadd.f32 %v8205_v14, %v8204_v36  ;;  %v8318_v7 = vadd.f32 %v8317_v41, %v8316_v28  ;;  %v8207_v60 = vpop.f32.mrb[90].mxu0  ;;  %v8319_v59 = vpop.f32.mrb[90].mxu1 }
 0x712   : > { %v8208_v51 = vpop.f32.mrb[91].mxu0  ;;  %v8320_v61 = vpop.f32.mrb[91].mxu1 }
 0x713   : > { %v7061_v52 = vadd.f32 %v8206_v48, %v11503_v35  ;;  %v8209_v44 = vadd.f32 %v8208_v51, %v8207_v60  ;;  %v8321_v54 = vadd.f32 %v8320_v61, %v8319_v59 }
 0x715   : > { %v7222_v23 = vadd.f32 %v8318_v7, %v7061_v52  ;;  %v7064_v55 = vadd.f32 %v8209_v44, %v11503_v35 }
 0x717   : > { %7345 = vst.msk [vmem:[%s11510_s28 + $0x60] sm:$0xff] %vm7332_vm3, %v7222_v23  ;;  %v7225_v27 = vadd.f32 %v8321_v54, %v7064_v55  ;;  %v8210_v47 = vpop.f32.mrb[92].mxu0  ;;  %v8322_v10 = vpop.f32.mrb[92].mxu1 }
 0x718   : > { %v8211_v53 = vpop.f32.mrb[93].mxu0  ;;  %v8323_v46 = vpop.f32.mrb[93].mxu1 }
 0x719   : > { %7346 = vst.msk [vmem:[%s11510_s28 + $0x68] sm:$0xff] %vm7332_vm3, %v7225_v27  ;;  %v8212_v58 = vadd.f32 %v8211_v53, %v8210_v47  ;;  %v8324_v22 = vadd.f32 %v8323_v46, %v8322_v10  ;;  %v8213_v56 = vpop.f32.mrb[94].mxu0  ;;  %v8325_v6 = vpop.f32.mrb[94].mxu1 }
 0x71a   : > { %v8214_v2 = vpop.f32.mrb[95].mxu0  ;;  %v8326_v29 = vpop.f32.mrb[95].mxu1 }
 0x71b   : > { %v7069_v38 = vadd.f32 %v8212_v58, %v11503_v35  ;;  %v8215_v45 = vadd.f32 %v8214_v2, %v8213_v56  ;;  %v8327_v30 = vadd.f32 %v8326_v29, %v8325_v6 }
 0x71d   : > { %v7230_v40 = vadd.f32 %v8324_v22, %v7069_v38  ;;  %v7072_v11 = vadd.f32 %v8215_v45, %v11503_v35 }
 0x71f   : > { %7347 = vst.msk [vmem:[%s11510_s28 + $0x70] sm:$0xff] %vm7332_vm3, %v7230_v40  ;;  %v7233_v42 = vadd.f32 %v8327_v30, %v7072_v11  ;;  %v8216_v0 = vpop.f32.mrb[96].mxu0  ;;  %v8328_v63 = vpop.f32.mrb[96].mxu1 }
 0x720   : > { %v8217_v37 = vpop.f32.mrb[97].mxu0  ;;  %v8329_v26 = vpop.f32.mrb[97].mxu1 }
 0x721   : > { %7348 = vst.msk [vmem:[%s11510_s28 + $0x78] sm:$0xff] %vm7332_vm3, %v7233_v42  ;;  %v8218_v39 = vadd.f32 %v8217_v37, %v8216_v0  ;;  %v8330_v57 = vadd.f32 %v8329_v26, %v8328_v63  ;;  %v8219_v1 = vpop.f32.mrb[98].mxu0  ;;  %v8331_v13 = vpop.f32.mrb[98].mxu1 }
 0x722   : > { %v8220_v33 = vpop.f32.mrb[99].mxu0  ;;  %v8332_v5 = vpop.f32.mrb[99].mxu1 }
 0x723   : > { %v7077_v15 = vadd.f32 %v8218_v39, %v11503_v35  ;;  %v8221_v3 = vadd.f32 %v8220_v33, %v8219_v1  ;;  %v8333_v8 = vadd.f32 %v8332_v5, %v8331_v13 }
 0x725   : > { %v7238_v21 = vadd.f32 %v8330_v57, %v7077_v15  ;;  %v7080_v19 = vadd.f32 %v8221_v3, %v11503_v35 }
 0x727   : > { %7349 = vst.msk [vmem:[%s11510_s28 + $0x80] sm:$0xff] %vm7332_vm3, %v7238_v21  ;;  %v7241_v20 = vadd.f32 %v8333_v8, %v7080_v19  ;;  %v8222_v4 = vpop.f32.mrb[100].mxu0  ;;  %v8334_v32 = vpop.f32.mrb[100].mxu1 }
 0x728   : > { %v8223_v24 = vpop.f32.mrb[101].mxu0  ;;  %v8335_v25 = vpop.f32.mrb[101].mxu1 }
 0x729   : > { %7350 = vst.msk [vmem:[%s11510_s28 + $0x88] sm:$0xff] %vm7332_vm3, %v7241_v20  ;;  %v8224_v50 = vadd.f32 %v8223_v24, %v8222_v4  ;;  %v8336_v31 = vadd.f32 %v8335_v25, %v8334_v32  ;;  %v8225_v12 = vpop.f32.mrb[102].mxu0  ;;  %v8337_v16 = vpop.f32.mrb[102].mxu1 }
 0x72a   : > { %v8226_v18 = vpop.f32.mrb[103].mxu0  ;;  %v8338_v9 = vpop.f32.mrb[103].mxu1 }
 0x72b   : > { %v7085_v62 = vadd.f32 %v8224_v50, %v11503_v35  ;;  %v8227_v17 = vadd.f32 %v8226_v18, %v8225_v12  ;;  %v8339_v43 = vadd.f32 %v8338_v9, %v8337_v16 }
 0x72d   : > { %v7246_v49 = vadd.f32 %v8336_v31, %v7085_v62  ;;  %v7088_v34 = vadd.f32 %v8227_v17, %v11503_v35 }
 0x72f   : > { %7351 = vst.msk [vmem:[%s11510_s28 + $0x90] sm:$0xff] %vm7332_vm3, %v7246_v49  ;;  %v7249_v36 = vadd.f32 %v8339_v43, %v7088_v34  ;;  %v8228_v28 = vpop.f32.mrb[104].mxu0  ;;  %v8340_v14 = vpop.f32.mrb[104].mxu1 }
 0x730   : > { %v8229_v41 = vpop.f32.mrb[105].mxu0  ;;  %v8341_v48 = vpop.f32.mrb[105].mxu1 }
 0x731   : > { %7352 = vst.msk [vmem:[%s11510_s28 + $0x98] sm:$0xff] %vm7332_vm3, %v7249_v36  ;;  %v8230_v7 = vadd.f32 %v8229_v41, %v8228_v28  ;;  %v8342_v60 = vadd.f32 %v8341_v48, %v8340_v14  ;;  %v8231_v59 = vpop.f32.mrb[106].mxu0  ;;  %v8343_v51 = vpop.f32.mrb[106].mxu1 }
 0x732   : > { %v8232_v61 = vpop.f32.mrb[107].mxu0  ;;  %v8344_v52 = vpop.f32.mrb[107].mxu1 }
 0x733   : > { %v7093_v44 = vadd.f32 %v8230_v7, %v11503_v35  ;;  %v8233_v54 = vadd.f32 %v8232_v61, %v8231_v59  ;;  %v8345_v23 = vadd.f32 %v8344_v52, %v8343_v51 }
 0x735   : > { %v7254_v55 = vadd.f32 %v8342_v60, %v7093_v44  ;;  %v7096_v27 = vadd.f32 %v8233_v54, %v11503_v35 }
 0x737   : > { %7353 = vst.msk [vmem:[%s11510_s28 + $0xa0] sm:$0xff] %vm7332_vm3, %v7254_v55  ;;  %v7257_v47 = vadd.f32 %v8345_v23, %v7096_v27  ;;  %v8234_v10 = vpop.f32.mrb[108].mxu0  ;;  %v8346_v53 = vpop.f32.mrb[108].mxu1 }
 0x738   : > { %v8235_v46 = vpop.f32.mrb[109].mxu0  ;;  %v8347_v58 = vpop.f32.mrb[109].mxu1 }
 0x739   : > { %7354 = vst.msk [vmem:[%s11510_s28 + $0xa8] sm:$0xff] %vm7332_vm3, %v7257_v47  ;;  %v8236_v22 = vadd.f32 %v8235_v46, %v8234_v10  ;;  %v8348_v56 = vadd.f32 %v8347_v58, %v8346_v53  ;;  %v8237_v6 = vpop.f32.mrb[110].mxu0  ;;  %v8349_v2 = vpop.f32.mrb[110].mxu1 }
 0x73a   : > { %v8238_v29 = vpop.f32.mrb[111].mxu0  ;;  %v8350_v38 = vpop.f32.mrb[111].mxu1 }
 0x73b   : > { %v7101_v45 = vadd.f32 %v8236_v22, %v11503_v35  ;;  %v8239_v30 = vadd.f32 %v8238_v29, %v8237_v6  ;;  %v8351_v40 = vadd.f32 %v8350_v38, %v8349_v2 }
 0x73d   : > { %v7262_v11 = vadd.f32 %v8348_v56, %v7101_v45  ;;  %v7104_v42 = vadd.f32 %v8239_v30, %v11503_v35 }
 0x73f   : > { %7355 = vst.msk [vmem:[%s11510_s28 + $0xb0] sm:$0xff] %vm7332_vm3, %v7262_v11  ;;  %v7265_v0 = vadd.f32 %v8351_v40, %v7104_v42  ;;  %v8240_v63 = vpop.f32.mrb[112].mxu0  ;;  %v8352_v37 = vpop.f32.mrb[112].mxu1 }
 0x740   : > { %v8241_v26 = vpop.f32.mrb[113].mxu0  ;;  %v8353_v39 = vpop.f32.mrb[113].mxu1 }
 0x741   : > { %7356 = vst.msk [vmem:[%s11510_s28 + $0xb8] sm:$0xff] %vm7332_vm3, %v7265_v0  ;;  %v8242_v57 = vadd.f32 %v8241_v26, %v8240_v63  ;;  %v8354_v1 = vadd.f32 %v8353_v39, %v8352_v37  ;;  %v8243_v13 = vpop.f32.mrb[114].mxu0  ;;  %v8355_v33 = vpop.f32.mrb[114].mxu1 }
 0x742   : > { %v8244_v5 = vpop.f32.mrb[115].mxu0  ;;  %v8356_v15 = vpop.f32.mrb[115].mxu1 }
 0x743   : > { %v7109_v3 = vadd.f32 %v8242_v57, %v11503_v35  ;;  %v8245_v8 = vadd.f32 %v8244_v5, %v8243_v13  ;;  %v8357_v21 = vadd.f32 %v8356_v15, %v8355_v33 }
 0x745   : > { %v7270_v19 = vadd.f32 %v8354_v1, %v7109_v3  ;;  %v7112_v20 = vadd.f32 %v8245_v8, %v11503_v35 }
 0x747   : > { %7357 = vst.msk [vmem:[%s11510_s28 + $0xc0] sm:$0xff] %vm7332_vm3, %v7270_v19  ;;  %v7273_v4 = vadd.f32 %v8357_v21, %v7112_v20  ;;  %v8246_v32 = vpop.f32.mrb[116].mxu0  ;;  %v8358_v24 = vpop.f32.mrb[116].mxu1 }
 0x748   : > { %v8247_v25 = vpop.f32.mrb[117].mxu0  ;;  %v8359_v50 = vpop.f32.mrb[117].mxu1 }
 0x749   : > { %7358 = vst.msk [vmem:[%s11510_s28 + $0xc8] sm:$0xff] %vm7332_vm3, %v7273_v4  ;;  %v8248_v31 = vadd.f32 %v8247_v25, %v8246_v32  ;;  %v8360_v12 = vadd.f32 %v8359_v50, %v8358_v24  ;;  %v8249_v16 = vpop.f32.mrb[118].mxu0  ;;  %v8361_v18 = vpop.f32.mrb[118].mxu1 }
 0x74a   : > { %v8250_v9 = vpop.f32.mrb[119].mxu0  ;;  %v8362_v62 = vpop.f32.mrb[119].mxu1 }
 0x74b   : > { %v7117_v17 = vadd.f32 %v8248_v31, %v11503_v35  ;;  %v8251_v43 = vadd.f32 %v8250_v9, %v8249_v16  ;;  %v8363_v49 = vadd.f32 %v8362_v62, %v8361_v18 }
 0x74d   : > { %v7278_v34 = vadd.f32 %v8360_v12, %v7117_v17  ;;  %v7120_v36 = vadd.f32 %v8251_v43, %v11503_v35 }
 0x74f   : > { %7359 = vst.msk [vmem:[%s11510_s28 + $0xd0] sm:$0xff] %vm7332_vm3, %v7278_v34  ;;  %v7281_v28 = vadd.f32 %v8363_v49, %v7120_v36  ;;  %v8252_v14 = vpop.f32.mrb[120].mxu0  ;;  %v8364_v41 = vpop.f32.mrb[120].mxu1 }
 0x750   : > { %v8253_v48 = vpop.f32.mrb[121].mxu0  ;;  %v8365_v7 = vpop.f32.mrb[121].mxu1 }
 0x751   : > { %7360 = vst.msk [vmem:[%s11510_s28 + $0xd8] sm:$0xff] %vm7332_vm3, %v7281_v28  ;;  %v8254_v60 = vadd.f32 %v8253_v48, %v8252_v14  ;;  %v8366_v59 = vadd.f32 %v8365_v7, %v8364_v41  ;;  %v8255_v51 = vpop.f32.mrb[122].mxu0  ;;  %v8367_v61 = vpop.f32.mrb[122].mxu1 }
 0x752   : > { %v8256_v52 = vpop.f32.mrb[123].mxu0  ;;  %v8368_v44 = vpop.f32.mrb[123].mxu1 }
 0x753   : > { %v7125_v54 = vadd.f32 %v8254_v60, %v11503_v35  ;;  %v8257_v23 = vadd.f32 %v8256_v52, %v8255_v51  ;;  %v8369_v55 = vadd.f32 %v8368_v44, %v8367_v61 }
 0x755   : > { %v7286_v27 = vadd.f32 %v8366_v59, %v7125_v54  ;;  %v7128_v47 = vadd.f32 %v8257_v23, %v11503_v35 }
 0x757   : > { %7361 = vst.msk [vmem:[%s11510_s28 + $0xe0] sm:$0xff] %vm7332_vm3, %v7286_v27  ;;  %v7289_v10 = vadd.f32 %v8369_v55, %v7128_v47  ;;  %v8258_v53 = vpop.f32.mrb[124].mxu0  ;;  %v8370_v46 = vpop.f32.mrb[124].mxu1 }
 0x758   : > { %v8259_v58 = vpop.f32.mrb[125].mxu0  ;;  %v8371_v22 = vpop.f32.mrb[125].mxu1 }
 0x759   : > { %7362 = vst.msk [vmem:[%s11510_s28 + $0xe8] sm:$0xff] %vm7332_vm3, %v7289_v10  ;;  %v8260_v56 = vadd.f32 %v8259_v58, %v8258_v53  ;;  %v8372_v6 = vadd.f32 %v8371_v22, %v8370_v46  ;;  %v8261_v2 = vpop.f32.mrb[126].mxu0  ;;  %v8373_v29 = vpop.f32.mrb[126].mxu1 }
 0x75a   : > { %v8262_v38 = vpop.f32.mrb[127].mxu0  ;;  %v8374_v45 = vpop.f32.mrb[127].mxu1 }
 0x75b   : > { %v7133_v30 = vadd.f32 %v8260_v56, %v11503_v35  ;;  %v8263_v40 = vadd.f32 %v8262_v38, %v8261_v2  ;;  %v8375_v11 = vadd.f32 %v8374_v45, %v8373_v29 }
 0x75d   : > { %v7294_v42 = vadd.f32 %v8372_v6, %v7133_v30  ;;  %v7136_v0 = vadd.f32 %v8263_v40, %v11503_v35 }
 0x75f   : > { %7363 = vst.msk [vmem:[%s11510_s28 + $0xf0] sm:$0xff] %vm7332_vm3, %v7294_v42  ;;  %v7297_v63 = vadd.f32 %v8375_v11, %v7136_v0 }
 0x761   : > { %7364 = vst.msk [vmem:[%s11510_s28 + $0xf8] sm:$0xff] %vm7332_vm3, %v7297_v63 }
 0x762 PF: > { %s28_s21 = sadd.s32 1, %s9540_s21  }
 0x763   : > { %p25_p3 = scmp.ge.s32.totalorder %s28_s21, 4  }
 0x765   :  { %27 = sbr.rel (!%p25_p3) target bundleno = 3 (0x3), region = 130 }
 0x76c   :  { %7404 = vsyncpa [#allocation3], 1 }
 0x76d   :  { %7406 = vsyncpa [#allocation3 + $0x1], 1 }

</bundles_post_ra>
